<compile_context>
chip_gen: v6e
topology: v6e:2x2x1
jax: 0.10.0
libtpu: 0.0.40
codegen_flags: <defaults>
</compile_context>

<pallas_src>
import functools

import jax
import jax.numpy as jnp
from jax.experimental import pallas as pl
from jax.experimental.pallas import tpu as pltpu


def _decoder_layer_kernel(
    x_ref,          # (BB, T, E)   f32
    wqkv_ref,       # (E, 3*NH*H)  bf16  (wq columns pre-scaled by 1/sqrt(H))
    wp_ref,         # (NH*H, E)    bf16  (head-major rows, matches torch concat)
    bp_ref,         # (1, E)       f32
    g1_ref,         # (1, E)       norm1 gamma
    be1_ref,        # (1, E)       norm1 beta
    g2_ref,         # (1, E)       norm2 gamma
    be2_ref,        # (1, E)       norm2 beta
    w1_ref,         # (E, DFF)     bf16
    fb1_ref,        # (1, DFF)     f32
    w2_ref,         # (DFF, E)     bf16
    fb2_ref,        # (1, E)       f32
    out_ref,        # (BB, T*E) if lane_dense else (BB, T, E)   f32
    *maybe_attn_ref,  # optional (BB, NH*T*T) / (BB, NH, T, T)  f32
    num_heads,
    head_size,
    lane_dense,
):
    attn_ref = maybe_attn_ref[0] if maybe_attn_ref else None
    eps = 1e-5
    f32, bf16 = jnp.float32, jnp.bfloat16

    x = x_ref[...]                                  # (BB, T, E)
    BB, T, E = x.shape
    NH, H = num_heads, head_size
    HH = NH * H
    N = BB * T
    Z = BB * NH

    xf = x.reshape(N, E)                            # fold batch into sublanes

    # ---- LayerNorm 1 (biased variance, matches PyTorch; f32 elementwise) ----
    mu = jnp.mean(xf, axis=-1, keepdims=True)
    var = jnp.mean((xf - mu) ** 2, axis=-1, keepdims=True)
    x1 = (xf - mu) * jax.lax.rsqrt(var + eps) * g1_ref[0] + be1_ref[0]

    # ---- Fused QKV projection: ONE lane-dense MXU call, bf16 cast ONCE ----
    qkv = jnp.dot(x1.astype(bf16), wqkv_ref[...],
                  preferred_element_type=f32).astype(bf16)      # (N, 3*HH)

    # Assemble a fused (BB*NH) leading axis.  Only cheap, tile-aligned ops:
    # lane slices of the qkv result + a stack on a new leading dim.
    # TODO(synk): when H is a multiple of 128 this becomes a plain lane-tile
    #             aligned reshape (no slicing needed).
    def gather_heads(off):                          # -> (Z, T, H), Z = (b, h)
        pieces = [qkv[:, off + h * H: off + (h + 1) * H].reshape(BB, T, H)
                  for h in range(NH)]
        return jnp.stack(pieces, axis=1).reshape(Z, T, H)

    qh = gather_heads(0)
    kh = gather_heads(HH)
    vh = gather_heads(2 * HH)

    # ---- Batched causal attention (scale already folded into wq) ----
    # Contract on the last dims directly: no k.T, no per-head XLU transpose.
    s = jnp.einsum('ztd,zsd->zts', qh, kh,
                   preferred_element_type=f32)                  # (Z, T, T)

    row = jax.lax.broadcasted_iota(jnp.int32, (T, T), 0)
    col = jax.lax.broadcasted_iota(jnp.int32, (T, T), 1)
    causal = (row >= col)[None, :, :]
    s = jnp.where(causal, s, -jnp.inf)
    s = s - jnp.max(s, axis=-1, keepdims=True)
    e = jnp.exp(s)
    denom = jnp.sum(e, axis=-1, keepdims=True)
    # Exact reciprocal when the maps are materialized as outputs (they must sum
    # to ~1); EUP approx reciprocal on the output-only path (free slot).
    inv = pl.reciprocal(denom, approx=(attn_ref is None))
    p = e * inv                                                 # (Z, T, T) f32

    if attn_ref is not None:
        if lane_dense:
            attn_ref[...] = p.reshape(BB, NH * T * T)           # lane-dense store
        else:
            attn_ref[...] = p.reshape(BB, NH, T, T)

    o = jnp.einsum('zts,zsd->ztd', p.astype(bf16), vh,
                   preferred_element_type=f32)                  # (Z, T, H)

    # ---- Single output projection over the full NH*H contraction ----
    o4 = o.reshape(BB, NH, T, H)
    o_cat = jnp.concatenate([o4[:, h] for h in range(NH)], axis=-1)  # (BB,T,HH)
    o_cat = o_cat.reshape(N, HH)
    attn_out = jnp.dot(o_cat.astype(bf16), wp_ref[...],
                       preferred_element_type=f32) + bp_ref[0]

    # residual (module adds attention output to the *normalized* x)
    x2 = x1 + attn_out

    # ---- LayerNorm 2 ----
    mu2 = jnp.mean(x2, axis=-1, keepdims=True)
    var2 = jnp.mean((x2 - mu2) ** 2, axis=-1, keepdims=True)
    x3 = (x2 - mu2) * jax.lax.rsqrt(var2 + eps) * g2_ref[0] + be2_ref[0]

    # ---- FeedForward: Linear -> ReLU -> Linear (bf16 MXU, f32 accum) ----
    h1 = jnp.dot(x3.astype(bf16), w1_ref[...],
                 preferred_element_type=f32) + fb1_ref[0]
    h1 = jnp.maximum(h1, 0.0)
    ff = jnp.dot(h1.astype(bf16), w2_ref[...],
                 preferred_element_type=f32) + fb2_ref[0]

    y = x3 + ff                                                 # (N, E)
    if lane_dense:
        out_ref[...] = y.reshape(BB, T * E)                     # lane-dense store
    else:
        out_ref[...] = y.reshape(BB, T, E)


def prepare_params(params):
    """One-time weight transform: fuse QKV, fold attention scale, cast to bf16."""
    NH, E, H = params["wq"].shape
    scale = H ** -0.5

    def heads_to_2d(w):                             # (NH, E, H) -> (E, NH*H)
        return jnp.transpose(w, (1, 0, 2)).reshape(E, NH * H)

    w_qkv = jnp.concatenate(
        [heads_to_2d(params["wq"]) * scale,         # scale folded into wq
         heads_to_2d(params["wk"]),
         heads_to_2d(params["wv"])], axis=-1).astype(jnp.bfloat16)

    return {
        "num_heads": NH, "head_size": H,
        "w_qkv": w_qkv,
        "wp": params["wp"].astype(jnp.bfloat16),    # (NH*H, E), head-major rows
        "bp": params["bp"].astype(jnp.float32),
        "g1": params["g1"].astype(jnp.float32),
        "be1": params["be1"].astype(jnp.float32),
        "g2": params["g2"].astype(jnp.float32),
        "be2": params["be2"].astype(jnp.float32),
        "w1": params["w1"].astype(jnp.bfloat16),
        "fb1": params["fb1"].astype(jnp.float32),
        "w2": params["w2"].astype(jnp.bfloat16),
        "fb2": params["fb2"].astype(jnp.float32),
    }


def _pick_batch_block(B, T, *, target_rows=256, min_grid_steps=1):
    """Pick rows-per-step so bb*T approaches the MXU edge (128 v5e / 256 v6e+).

    min_grid_steps=2 gives both v7x TensorCores balanced 'parallel' work; on
    single-TC chips (v5e/v6e) leave it at 1 so the matmul row count is maximal.
    """
    bb = min(B, max(1, -(-target_rows // T)))       # ceil(target_rows / T)
    if min_grid_steps > 1:
        bb = min(bb, max(1, B // min_grid_steps))
    while B % bb:
        bb -= 1
    return max(bb, 1)


def decoder_layer(x, prepared, *, return_attn=False, batch_block=None,
                  min_grid_steps=1):
    """x: (B, T, E) float32. Returns out (B,T,E) [, attn (NH,B,T,T)]."""
    B, T, E = x.shape
    NH, H = prepared["num_heads"], prepared["head_size"]
    HH = NH * H
    DFF = prepared["w1"].shape[-1]
    bb = batch_block if batch_block is not None else _pick_batch_block(
        B, T, min_grid_steps=min_grid_steps)
    assert B % bb == 0
    grid = (B // bb,)

    weights = (prepared["w_qkv"], prepared["wp"], prepared["bp"],
               prepared["g1"], prepared["be1"], prepared["g2"], prepared["be2"],
               prepared["w1"], prepared["fb1"], prepared["w2"], prepared["fb2"])

    # ---- advisory cost estimate for XLA scheduling around the custom call ----
    rows = B * T
    flops = 2 * rows * E * 3 * HH                    # fused QKV
    flops += 2 * (B * NH) * T * T * H * 2            # scores + p@v
    flops += 2 * rows * HH * E                       # output projection
    flops += 2 * rows * E * DFF * 2                  # FFN
    transcendentals = B * NH * T * T                 # softmax exp
    w_bytes = sum(int(w.size) * w.dtype.itemsize for w in weights)
    io_bytes = int(x.size) * 4 + rows * E * 4
    if return_attn:
        io_bytes += B * NH * T * T * 4
    cost = pl.CostEstimate(flops=int(flops),
                           transcendentals=int(transcendentals),
                           bytes_accessed=int(w_bytes + io_bytes))

    # ---- explicit scoped-VMEM budget (defaults are only 16/32 MiB) ----
    blk_bytes = 2 * (bb * T * E * 4) * 2             # x + out blocks, 2 buffers
    if return_attn:
        blk_bytes += bb * NH * T * T * 4 * 2
    scratch_bytes = 6 * bb * T * max(3 * HH, DFF, E) * 4
    vmem_limit = int(min(max(2 * (w_bytes + blk_bytes + scratch_bytes),
                             32 * 1024 * 1024), 48 * 1024 * 1024))

    def _call(single_buffer_weights, lane_dense):
        pm = pl.Buffered(1) if single_buffer_weights else None

        def const_spec(arr):
            shape = arr.shape
            if pm is None:
                return pl.BlockSpec(shape, lambda b: (0,) * len(shape))
            return pl.BlockSpec(shape, lambda b: (0,) * len(shape),
                                pipeline_mode=pm)

        in_specs = ([pl.BlockSpec((bb, T, E), lambda b: (b, 0, 0))]
                    + [const_spec(w) for w in weights])

        if lane_dense:
            out_x_spec = pl.BlockSpec((bb, T * E), lambda b: (b, 0))
            out_x_shape = jax.ShapeDtypeStruct((B, T * E), jnp.float32)
            attn_spec = pl.BlockSpec((bb, NH * T * T), lambda b: (b, 0))
            attn_shape = jax.ShapeDtypeStruct((B, NH * T * T), jnp.float32)
        else:
            out_x_spec = pl.BlockSpec((bb, T, E), lambda b: (b, 0, 0))
            out_x_shape = jax.ShapeDtypeStruct((B, T, E), jnp.float32)
            attn_spec = pl.BlockSpec((bb, NH, T, T), lambda b: (b, 0, 0, 0))
            attn_shape = jax.ShapeDtypeStruct((B, NH, T, T), jnp.float32)

        if return_attn:
            out_specs = (out_x_spec, attn_spec)
            out_shape = (out_x_shape, attn_shape)
        else:
            out_specs = out_x_spec
            out_shape = out_x_shape

        kernel = functools.partial(_decoder_layer_kernel,
                                   num_heads=NH, head_size=H,
                                   lane_dense=lane_dense)

        res = pl.pallas_call(
            kernel,
            grid=grid,
            in_specs=in_specs,
            out_specs=out_specs,
            out_shape=out_shape,
            cost_estimate=cost,
            compiler_params=pltpu.CompilerParams(
                dimension_semantics=("parallel",),
                vmem_limit_bytes=vmem_limit),
        )(x, *weights)

        if return_attn:
            out, attn = res
        else:
            out, attn = res, None
        if lane_dense:
            out = out.reshape(B, T, E)
            if attn is not None:
                attn = attn.reshape(B, NH, T, T)
        if attn is not None:
            attn = jnp.transpose(attn, (1, 0, 2, 3))  # (NH, B, T, T)
        return (out, attn) if return_attn else out

    # Preferred config first (single-buffered constant weights, lane-dense
    # output packing); degrade gracefully if the installed jax/libtpu rejects
    # pl.Buffered(1) or the lane-packing reshape — a running kernel beats an
    # optimal one that does not compile.
    attempts = ((True, True), (True, False), (False, True), (False, False))
    for i, (sb, ld) in enumerate(attempts):
        try:
            return _call(sb, ld)
        except Exception:                       # noqa: BLE001 - deliberate fallback
            if i == len(attempts) - 1:
                raise


def _reference(x, params):
    """Pure-JAX f32 reference mirroring the PyTorch forward, for validation."""
    eps = 1e-5

    def ln(v, g, b):
        mu = jnp.mean(v, axis=-1, keepdims=True)
        var = jnp.mean((v - mu) ** 2, axis=-1, keepdims=True)
        return (v - mu) / jnp.sqrt(var + eps) * g[0] + b[0]

    B, T, E = x.shape
    NH, _, H = params["wq"].shape
    x1 = ln(x, params["g1"], params["be1"])
    tril = jnp.tril(jnp.ones((T, T)))
    outs, maps = [], []
    for h in range(NH):
        q = x1 @ params["wq"][h]
        k = x1 @ params["wk"][h]
        v = x1 @ params["wv"][h]
        wei = q @ jnp.swapaxes(k, -1, -2) * (H ** -0.5)
        wei = jnp.where(tril == 0, -jnp.inf, wei)
        wei = jax.nn.softmax(wei, axis=-1)
        maps.append(wei)
        outs.append(wei @ v)
    cat = jnp.concatenate(outs, axis=-1)
    attn_out = cat @ params["wp"] + params["bp"][0]
    x2 = x1 + attn_out
    x3 = ln(x2, params["g2"], params["be2"])
    ff = jnp.maximum(x3 @ params["w1"] + params["fb1"][0], 0.0) @ params["w2"] \
        + params["fb2"][0]
    return x3 + ff, jnp.stack(maps, axis=0)


if __name__ == "__main__":
    # Small, module-consistent shapes.
    B, T, E, NH, DFF = 4, 8, 32, 4, 64
    H = E // NH  # head_size

    key = jax.random.PRNGKey(0)
    ks = jax.random.split(key, 12)
    s = 0.1
    params = {
        "wq":  s * jax.random.normal(ks[0], (NH, E, H), jnp.float32),
        "wk":  s * jax.random.normal(ks[1], (NH, E, H), jnp.float32),
        "wv":  s * jax.random.normal(ks[2], (NH, E, H), jnp.float32),
        "wp":  s * jax.random.normal(ks[3], (NH * H, E), jnp.float32),
        "bp":  s * jax.random.normal(ks[4], (1, E), jnp.float32),
        "g1":  jnp.ones((1, E), jnp.float32),
        "be1": jnp.zeros((1, E), jnp.float32),
        "g2":  jnp.ones((1, E), jnp.float32),
        "be2": jnp.zeros((1, E), jnp.float32),
        "w1":  s * jax.random.normal(ks[5], (E, DFF), jnp.float32),
        "fb1": s * jax.random.normal(ks[6], (1, DFF), jnp.float32),
        "w2":  s * jax.random.normal(ks[7], (DFF, E), jnp.float32),
        "fb2": s * jax.random.normal(ks[8], (1, E), jnp.float32),
    }

    x = jax.random.normal(ks[9], (B, T, E), jnp.float32)

    prepared = prepare_params(params)  # one-time weight transform

    # Default fast path: no attention-map writeback.
    out_fast = jax.block_until_ready(decoder_layer(x, prepared))
    # Validation path: maps requested.
    out, attn = jax.block_until_ready(
        decoder_layer(x, prepared, return_attn=True))

    ref_out, ref_attn = _reference(x, params)
    # Tolerances account for the deliberate bf16-at-the-MXU-boundary cast
    # and the EUP approx reciprocal on the output-only softmax path.
    assert jnp.allclose(out_fast, ref_out, atol=5e-2, rtol=5e-2), "output mismatch"
    assert jnp.allclose(out, ref_out, atol=5e-2, rtol=5e-2), "output mismatch"
    assert jnp.allclose(attn, ref_attn, atol=2e-2, rtol=2e-2), "attn map mismatch"

    print("KERNEL_OK")
</pallas_src>

<mosaic_0001>
module attributes {stable_mosaic.version = 11 : i64} {
  func.func @_decoder_layer_kernel(%arg0: i32, %arg1: memref<4x8x32xf32, #tpu.memory_space<vmem>>, %arg2: memref<32x96xbf16, #tpu.memory_space<vmem>>, %arg3: memref<32x32xbf16, #tpu.memory_space<vmem>>, %arg4: memref<1x32xf32, #tpu.memory_space<vmem>>, %arg5: memref<1x32xf32, #tpu.memory_space<vmem>>, %arg6: memref<1x32xf32, #tpu.memory_space<vmem>>, %arg7: memref<1x32xf32, #tpu.memory_space<vmem>>, %arg8: memref<1x32xf32, #tpu.memory_space<vmem>>, %arg9: memref<32x64xbf16, #tpu.memory_space<vmem>>, %arg10: memref<1x64xf32, #tpu.memory_space<vmem>>, %arg11: memref<64x32xbf16, #tpu.memory_space<vmem>>, %arg12: memref<1x32xf32, #tpu.memory_space<vmem>>, %arg13: memref<4x256xf32, #tpu.memory_space<vmem>>) attributes {dimension_semantics = [#tpu.dimension_semantics<parallel>], iteration_bounds = array<i64: 1>, scalar_prefetch = 0 : i64, scratch_operands = 0 : i64, tpu.core_type = #tpu.core_type<tc>, window_params = [{transform_indices = @transform_0, window_bounds = array<i64: 4, 8, 32>}, {pipeline_mode = #tpu.pipeline_mode<synchronous>, transform_indices = @transform_1, window_bounds = array<i64: 32, 96>}, {pipeline_mode = #tpu.pipeline_mode<synchronous>, transform_indices = @transform_2, window_bounds = array<i64: 32, 32>}, {pipeline_mode = #tpu.pipeline_mode<synchronous>, transform_indices = @transform_3, window_bounds = array<i64: 1, 32>}, {pipeline_mode = #tpu.pipeline_mode<synchronous>, transform_indices = @transform_4, window_bounds = array<i64: 1, 32>}, {pipeline_mode = #tpu.pipeline_mode<synchronous>, transform_indices = @transform_5, window_bounds = array<i64: 1, 32>}, {pipeline_mode = #tpu.pipeline_mode<synchronous>, transform_indices = @transform_6, window_bounds = array<i64: 1, 32>}, {pipeline_mode = #tpu.pipeline_mode<synchronous>, transform_indices = @transform_7, window_bounds = array<i64: 1, 32>}, {pipeline_mode = #tpu.pipeline_mode<synchronous>, transform_indices = @transform_8, window_bounds = array<i64: 32, 64>}, {pipeline_mode = #tpu.pipeline_mode<synchronous>, transform_indices = @transform_9, window_bounds = array<i64: 1, 64>}, {pipeline_mode = #tpu.pipeline_mode<synchronous>, transform_indices = @transform_10, window_bounds = array<i64: 64, 32>}, {pipeline_mode = #tpu.pipeline_mode<synchronous>, transform_indices = @transform_11, window_bounds = array<i64: 1, 32>}, {transform_indices = @transform_12, window_bounds = array<i64: 4, 256>}]} {
    %c0 = arith.constant 0 : index
    %c0_0 = arith.constant 0 : index
    %c0_1 = arith.constant 0 : index
    %0 = vector.load %arg1[%c0, %c0_0, %c0_1] : memref<4x8x32xf32, #tpu.memory_space<vmem>>, vector<4x8x32xf32>
    %1 = vector.shape_cast %0 : vector<4x8x32xf32> to vector<32x32xf32>
    %cst = arith.constant dense<0.000000e+00> : vector<32xf32>
    %2 = vector.multi_reduction <add>, %1, %cst [1] : vector<32x32xf32> to vector<32xf32>
    %3 = vector.shape_cast %2 : vector<32xf32> to vector<32x1xf32>
    %cst_2 = arith.constant 3.200000e+01 : f32
    %4 = vector.broadcast %cst_2 : f32 to vector<32x1xf32>
    %5 = arith.divf %3, %4 : vector<32x1xf32>
    %6 = vector.broadcast %5 : vector<32x1xf32> to vector<32x32xf32>
    %7 = arith.subf %1, %6 : vector<32x32xf32>
    %8 = arith.mulf %7, %7 : vector<32x32xf32>
    %cst_3 = arith.constant dense<0.000000e+00> : vector<32xf32>
    %9 = vector.multi_reduction <add>, %8, %cst_3 [1] : vector<32x32xf32> to vector<32xf32>
    %10 = vector.shape_cast %9 : vector<32xf32> to vector<32x1xf32>
    %cst_4 = arith.constant 3.200000e+01 : f32
    %11 = vector.broadcast %cst_4 : f32 to vector<32x1xf32>
    %12 = arith.divf %10, %11 : vector<32x1xf32>
    %13 = vector.broadcast %5 : vector<32x1xf32> to vector<32x32xf32>
    %14 = arith.subf %1, %13 : vector<32x32xf32>
    %cst_5 = arith.constant 9.99999974E-6 : f32
    %15 = vector.broadcast %cst_5 : f32 to vector<32x1xf32>
    %16 = arith.addf %12, %15 : vector<32x1xf32>
    %17 = math.rsqrt %16 : vector<32x1xf32>
    %18 = vector.broadcast %17 : vector<32x1xf32> to vector<32x32xf32>
    %19 = arith.mulf %14, %18 : vector<32x32xf32>
    %c0_6 = arith.constant 0 : index
    %c0_7 = arith.constant 0 : index
    %20 = vector.load %arg5[%c0_6, %c0_7] : memref<1x32xf32, #tpu.memory_space<vmem>>, vector<1x32xf32>
    %21 = vector.shape_cast %20 : vector<1x32xf32> to vector<32xf32>
    %22 = vector.shape_cast %21 : vector<32xf32> to vector<1x32xf32>
    %23 = vector.broadcast %22 : vector<1x32xf32> to vector<32x32xf32>
    %24 = arith.mulf %19, %23 : vector<32x32xf32>
    %c0_8 = arith.constant 0 : index
    %c0_9 = arith.constant 0 : index
    %25 = vector.load %arg6[%c0_8, %c0_9] : memref<1x32xf32, #tpu.memory_space<vmem>>, vector<1x32xf32>
    %26 = vector.shape_cast %25 : vector<1x32xf32> to vector<32xf32>
    %27 = vector.shape_cast %26 : vector<32xf32> to vector<1x32xf32>
    %28 = vector.broadcast %27 : vector<1x32xf32> to vector<32x32xf32>
    %29 = arith.addf %24, %28 : vector<32x32xf32>
    %30 = arith.truncf %29 : vector<32x32xf32> to vector<32x32xbf16>
    %c0_10 = arith.constant 0 : index
    %c0_11 = arith.constant 0 : index
    %31 = vector.load %arg2[%c0_10, %c0_11] : memref<32x96xbf16, #tpu.memory_space<vmem>>, vector<32x96xbf16>
    %cst_12 = arith.constant dense<0.000000e+00> : vector<32x96xf32>
    %32 = tpu.matmul %30, %31, %cst_12 {dimension_numbers = #tpu.dot_dimension_numbers<[1], [0], [0], [1], [0, 0, 1, 1], [], []>} : vector<32x32xbf16>, vector<32x96xbf16>, vector<32x96xf32> -> vector<32x96xf32>
    %33 = arith.truncf %32 : vector<32x96xf32> to vector<32x96xbf16>
    %34 = vector.extract_strided_slice %33 {offsets = [0, 0], sizes = [32, 8], strides = [1, 1]} : vector<32x96xbf16> to vector<32x8xbf16>
    %35 = vector.shape_cast %34 : vector<32x8xbf16> to vector<4x8x8xbf16>
    %36 = vector.extract_strided_slice %33 {offsets = [0, 8], sizes = [32, 8], strides = [1, 1]} : vector<32x96xbf16> to vector<32x8xbf16>
    %37 = vector.shape_cast %36 : vector<32x8xbf16> to vector<4x8x8xbf16>
    %38 = vector.extract_strided_slice %33 {offsets = [0, 16], sizes = [32, 8], strides = [1, 1]} : vector<32x96xbf16> to vector<32x8xbf16>
    %39 = vector.shape_cast %38 : vector<32x8xbf16> to vector<4x8x8xbf16>
    %40 = vector.extract_strided_slice %33 {offsets = [0, 24], sizes = [32, 8], strides = [1, 1]} : vector<32x96xbf16> to vector<32x8xbf16>
    %41 = vector.shape_cast %40 : vector<32x8xbf16> to vector<4x8x8xbf16>
    %42 = vector.shape_cast %35 : vector<4x8x8xbf16> to vector<4x1x8x8xbf16>
    %43 = vector.shape_cast %37 : vector<4x8x8xbf16> to vector<4x1x8x8xbf16>
    %44 = vector.shape_cast %39 : vector<4x8x8xbf16> to vector<4x1x8x8xbf16>
    %45 = vector.shape_cast %41 : vector<4x8x8xbf16> to vector<4x1x8x8xbf16>
    %46 = tpu.concatenate %42, %43, %44, %45 in 1 : vector<4x1x8x8xbf16>, vector<4x1x8x8xbf16>, vector<4x1x8x8xbf16>, vector<4x1x8x8xbf16> -> vector<4x4x8x8xbf16>
    %47 = vector.shape_cast %46 : vector<4x4x8x8xbf16> to vector<16x8x8xbf16>
    %48 = vector.extract_strided_slice %33 {offsets = [0, 32], sizes = [32, 8], strides = [1, 1]} : vector<32x96xbf16> to vector<32x8xbf16>
    %49 = vector.shape_cast %48 : vector<32x8xbf16> to vector<4x8x8xbf16>
    %50 = vector.extract_strided_slice %33 {offsets = [0, 40], sizes = [32, 8], strides = [1, 1]} : vector<32x96xbf16> to vector<32x8xbf16>
    %51 = vector.shape_cast %50 : vector<32x8xbf16> to vector<4x8x8xbf16>
    %52 = vector.extract_strided_slice %33 {offsets = [0, 48], sizes = [32, 8], strides = [1, 1]} : vector<32x96xbf16> to vector<32x8xbf16>
    %53 = vector.shape_cast %52 : vector<32x8xbf16> to vector<4x8x8xbf16>
    %54 = vector.extract_strided_slice %33 {offsets = [0, 56], sizes = [32, 8], strides = [1, 1]} : vector<32x96xbf16> to vector<32x8xbf16>
    %55 = vector.shape_cast %54 : vector<32x8xbf16> to vector<4x8x8xbf16>
    %56 = vector.shape_cast %49 : vector<4x8x8xbf16> to vector<4x1x8x8xbf16>
    %57 = vector.shape_cast %51 : vector<4x8x8xbf16> to vector<4x1x8x8xbf16>
    %58 = vector.shape_cast %53 : vector<4x8x8xbf16> to vector<4x1x8x8xbf16>
    %59 = vector.shape_cast %55 : vector<4x8x8xbf16> to vector<4x1x8x8xbf16>
    %60 = tpu.concatenate %56, %57, %58, %59 in 1 : vector<4x1x8x8xbf16>, vector<4x1x8x8xbf16>, vector<4x1x8x8xbf16>, vector<4x1x8x8xbf16> -> vector<4x4x8x8xbf16>
    %61 = vector.shape_cast %60 : vector<4x4x8x8xbf16> to vector<16x8x8xbf16>
    %62 = vector.extract_strided_slice %33 {offsets = [0, 64], sizes = [32, 8], strides = [1, 1]} : vector<32x96xbf16> to vector<32x8xbf16>
    %63 = vector.shape_cast %62 : vector<32x8xbf16> to vector<4x8x8xbf16>
    %64 = vector.extract_strided_slice %33 {offsets = [0, 72], sizes = [32, 8], strides = [1, 1]} : vector<32x96xbf16> to vector<32x8xbf16>
    %65 = vector.shape_cast %64 : vector<32x8xbf16> to vector<4x8x8xbf16>
    %66 = vector.extract_strided_slice %33 {offsets = [0, 80], sizes = [32, 8], strides = [1, 1]} : vector<32x96xbf16> to vector<32x8xbf16>
    %67 = vector.shape_cast %66 : vector<32x8xbf16> to vector<4x8x8xbf16>
    %68 = vector.extract_strided_slice %33 {offsets = [0, 88], sizes = [32, 8], strides = [1, 1]} : vector<32x96xbf16> to vector<32x8xbf16>
    %69 = vector.shape_cast %68 : vector<32x8xbf16> to vector<4x8x8xbf16>
    %70 = vector.shape_cast %63 : vector<4x8x8xbf16> to vector<4x1x8x8xbf16>
    %71 = vector.shape_cast %65 : vector<4x8x8xbf16> to vector<4x1x8x8xbf16>
    %72 = vector.shape_cast %67 : vector<4x8x8xbf16> to vector<4x1x8x8xbf16>
    %73 = vector.shape_cast %69 : vector<4x8x8xbf16> to vector<4x1x8x8xbf16>
    %74 = tpu.concatenate %70, %71, %72, %73 in 1 : vector<4x1x8x8xbf16>, vector<4x1x8x8xbf16>, vector<4x1x8x8xbf16>, vector<4x1x8x8xbf16> -> vector<4x4x8x8xbf16>
    %75 = vector.shape_cast %74 : vector<4x4x8x8xbf16> to vector<16x8x8xbf16>
    "tpu.trace_start"() <{level = 10 : i32, message = "ztd,zsd->zts"}> : () -> ()
    %cst_13 = arith.constant dense<0.000000e+00> : vector<16x8x8xf32>
    %76 = tpu.matmul %47, %61, %cst_13 {dimension_numbers = #tpu.dot_dimension_numbers<[2], [2], [1], [1], [0, 0, 0, 1, 1, 1], [0], [0]>} : vector<16x8x8xbf16>, vector<16x8x8xbf16>, vector<16x8x8xf32> -> vector<16x8x8xf32>
    "tpu.trace_stop"() : () -> ()
    %77 = tpu.iota {dimensions = array<i32: 0>} : vector<8x8xi32>
    %78 = tpu.iota {dimensions = array<i32: 1>} : vector<8x8xi32>
    %79 = arith.cmpi sge, %77, %78 : vector<8x8xi32>
    %80 = vector.shape_cast %79 : vector<8x8xi1> to vector<1x8x8xi1>
    %cst_14 = arith.constant 0xFF800000 : f32
    %81 = vector.shape_cast %80 : vector<1x8x8xi1> to vector<1x8x8xi1>
    %82 = vector.broadcast %81 : vector<1x8x8xi1> to vector<16x8x8xi1>
    %83 = vector.broadcast %cst_14 : f32 to vector<16x8x8xf32>
    %84 = arith.select %82, %76, %83 : vector<16x8x8xi1>, vector<16x8x8xf32>
    %cst_15 = arith.constant dense<0xFF800000> : vector<16x8xf32>
    %85 = vector.multi_reduction <maximumf>, %84, %cst_15 [2] : vector<16x8x8xf32> to vector<16x8xf32>
    %86 = vector.shape_cast %85 : vector<16x8xf32> to vector<16x8x1xf32>
    %87 = vector.broadcast %86 : vector<16x8x1xf32> to vector<16x8x8xf32>
    %88 = arith.subf %84, %87 : vector<16x8x8xf32>
    %89 = math.exp %88 : vector<16x8x8xf32>
    %cst_16 = arith.constant dense<0.000000e+00> : vector<16x8xf32>
    %90 = vector.multi_reduction <add>, %89, %cst_16 [2] : vector<16x8x8xf32> to vector<16x8xf32>
    %91 = vector.shape_cast %90 : vector<16x8xf32> to vector<16x8x1xf32>
    %92 = tpu.reciprocal %91 {approx = true} : vector<16x8x1xf32> -> vector<16x8x1xf32>
    %93 = vector.broadcast %92 : vector<16x8x1xf32> to vector<16x8x8xf32>
    %94 = arith.mulf %89, %93 : vector<16x8x8xf32>
    %95 = arith.truncf %94 : vector<16x8x8xf32> to vector<16x8x8xbf16>
    "tpu.trace_start"() <{level = 10 : i32, message = "zts,zsd->ztd"}> : () -> ()
    %cst_17 = arith.constant dense<0.000000e+00> : vector<16x8x8xf32>
    %96 = tpu.matmul %95, %75, %cst_17 {dimension_numbers = #tpu.dot_dimension_numbers<[2], [1], [1], [2], [0, 0, 0, 1, 1, 2], [0], [0]>} : vector<16x8x8xbf16>, vector<16x8x8xbf16>, vector<16x8x8xf32> -> vector<16x8x8xf32>
    "tpu.trace_stop"() : () -> ()
    %97 = vector.shape_cast %96 : vector<16x8x8xf32> to vector<4x4x8x8xf32>
    %98 = vector.extract_strided_slice %97 {offsets = [0, 0, 0, 0], sizes = [4, 1, 8, 8], strides = [1, 1, 1, 1]} : vector<4x4x8x8xf32> to vector<4x1x8x8xf32>
    %99 = vector.shape_cast %98 : vector<4x1x8x8xf32> to vector<4x8x8xf32>
    %100 = vector.extract_strided_slice %97 {offsets = [0, 1, 0, 0], sizes = [4, 1, 8, 8], strides = [1, 1, 1, 1]} : vector<4x4x8x8xf32> to vector<4x1x8x8xf32>
    %101 = vector.shape_cast %100 : vector<4x1x8x8xf32> to vector<4x8x8xf32>
    %102 = vector.extract_strided_slice %97 {offsets = [0, 2, 0, 0], sizes = [4, 1, 8, 8], strides = [1, 1, 1, 1]} : vector<4x4x8x8xf32> to vector<4x1x8x8xf32>
    %103 = vector.shape_cast %102 : vector<4x1x8x8xf32> to vector<4x8x8xf32>
    %104 = vector.extract_strided_slice %97 {offsets = [0, 3, 0, 0], sizes = [4, 1, 8, 8], strides = [1, 1, 1, 1]} : vector<4x4x8x8xf32> to vector<4x1x8x8xf32>
    %105 = vector.shape_cast %104 : vector<4x1x8x8xf32> to vector<4x8x8xf32>
    %106 = tpu.concatenate %99, %101, %103, %105 in 2 : vector<4x8x8xf32>, vector<4x8x8xf32>, vector<4x8x8xf32>, vector<4x8x8xf32> -> vector<4x8x32xf32>
    %107 = vector.shape_cast %106 : vector<4x8x32xf32> to vector<32x32xf32>
    %108 = arith.truncf %107 : vector<32x32xf32> to vector<32x32xbf16>
    %c0_18 = arith.constant 0 : index
    %c0_19 = arith.constant 0 : index
    %109 = vector.load %arg3[%c0_18, %c0_19] : memref<32x32xbf16, #tpu.memory_space<vmem>>, vector<32x32xbf16>
    %cst_20 = arith.constant dense<0.000000e+00> : vector<32x32xf32>
    %110 = tpu.matmul %108, %109, %cst_20 {dimension_numbers = #tpu.dot_dimension_numbers<[1], [0], [0], [1], [0, 0, 1, 1], [], []>} : vector<32x32xbf16>, vector<32x32xbf16>, vector<32x32xf32> -> vector<32x32xf32>
    %c0_21 = arith.constant 0 : index
    %c0_22 = arith.constant 0 : index
    %111 = vector.load %arg4[%c0_21, %c0_22] : memref<1x32xf32, #tpu.memory_space<vmem>>, vector<1x32xf32>
    %112 = vector.shape_cast %111 : vector<1x32xf32> to vector<32xf32>
    %113 = vector.shape_cast %112 : vector<32xf32> to vector<1x32xf32>
    %114 = vector.broadcast %113 : vector<1x32xf32> to vector<32x32xf32>
    %115 = arith.addf %110, %114 : vector<32x32xf32>
    %116 = arith.addf %29, %115 : vector<32x32xf32>
    %cst_23 = arith.constant dense<0.000000e+00> : vector<32xf32>
    %117 = vector.multi_reduction <add>, %116, %cst_23 [1] : vector<32x32xf32> to vector<32xf32>
    %118 = vector.shape_cast %117 : vector<32xf32> to vector<32x1xf32>
    %cst_24 = arith.constant 3.200000e+01 : f32
    %119 = vector.broadcast %cst_24 : f32 to vector<32x1xf32>
    %120 = arith.divf %118, %119 : vector<32x1xf32>
    %121 = vector.broadcast %120 : vector<32x1xf32> to vector<32x32xf32>
    %122 = arith.subf %116, %121 : vector<32x32xf32>
    %123 = arith.mulf %122, %122 : vector<32x32xf32>
    %cst_25 = arith.constant dense<0.000000e+00> : vector<32xf32>
    %124 = vector.multi_reduction <add>, %123, %cst_25 [1] : vector<32x32xf32> to vector<32xf32>
    %125 = vector.shape_cast %124 : vector<32xf32> to vector<32x1xf32>
    %cst_26 = arith.constant 3.200000e+01 : f32
    %126 = vector.broadcast %cst_26 : f32 to vector<32x1xf32>
    %127 = arith.divf %125, %126 : vector<32x1xf32>
    %128 = vector.broadcast %120 : vector<32x1xf32> to vector<32x32xf32>
    %129 = arith.subf %116, %128 : vector<32x32xf32>
    %cst_27 = arith.constant 9.99999974E-6 : f32
    %130 = vector.broadcast %cst_27 : f32 to vector<32x1xf32>
    %131 = arith.addf %127, %130 : vector<32x1xf32>
    %132 = math.rsqrt %131 : vector<32x1xf32>
    %133 = vector.broadcast %132 : vector<32x1xf32> to vector<32x32xf32>
    %134 = arith.mulf %129, %133 : vector<32x32xf32>
    %c0_28 = arith.constant 0 : index
    %c0_29 = arith.constant 0 : index
    %135 = vector.load %arg7[%c0_28, %c0_29] : memref<1x32xf32, #tpu.memory_space<vmem>>, vector<1x32xf32>
    %136 = vector.shape_cast %135 : vector<1x32xf32> to vector<32xf32>
    %137 = vector.shape_cast %136 : vector<32xf32> to vector<1x32xf32>
    %138 = vector.broadcast %137 : vector<1x32xf32> to vector<32x32xf32>
    %139 = arith.mulf %134, %138 : vector<32x32xf32>
    %c0_30 = arith.constant 0 : index
    %c0_31 = arith.constant 0 : index
    %140 = vector.load %arg8[%c0_30, %c0_31] : memref<1x32xf32, #tpu.memory_space<vmem>>, vector<1x32xf32>
    %141 = vector.shape_cast %140 : vector<1x32xf32> to vector<32xf32>
    %142 = vector.shape_cast %141 : vector<32xf32> to vector<1x32xf32>
    %143 = vector.broadcast %142 : vector<1x32xf32> to vector<32x32xf32>
    %144 = arith.addf %139, %143 : vector<32x32xf32>
    %145 = arith.truncf %144 : vector<32x32xf32> to vector<32x32xbf16>
    %c0_32 = arith.constant 0 : index
    %c0_33 = arith.constant 0 : index
    %146 = vector.load %arg9[%c0_32, %c0_33] : memref<32x64xbf16, #tpu.memory_space<vmem>>, vector<32x64xbf16>
    %cst_34 = arith.constant dense<0.000000e+00> : vector<32x64xf32>
    %147 = tpu.matmul %145, %146, %cst_34 {dimension_numbers = #tpu.dot_dimension_numbers<[1], [0], [0], [1], [0, 0, 1, 1], [], []>} : vector<32x32xbf16>, vector<32x64xbf16>, vector<32x64xf32> -> vector<32x64xf32>
    %c0_35 = arith.constant 0 : index
    %c0_36 = arith.constant 0 : index
    %148 = vector.load %arg10[%c0_35, %c0_36] : memref<1x64xf32, #tpu.memory_space<vmem>>, vector<1x64xf32>
    %149 = vector.shape_cast %148 : vector<1x64xf32> to vector<64xf32>
    %150 = vector.shape_cast %149 : vector<64xf32> to vector<1x64xf32>
    %151 = vector.broadcast %150 : vector<1x64xf32> to vector<32x64xf32>
    %152 = arith.addf %147, %151 : vector<32x64xf32>
    %cst_37 = arith.constant 0.000000e+00 : f32
    %153 = vector.broadcast %cst_37 : f32 to vector<32x64xf32>
    %154 = arith.maximumf %152, %153 : vector<32x64xf32>
    %155 = arith.truncf %154 : vector<32x64xf32> to vector<32x64xbf16>
    %c0_38 = arith.constant 0 : index
    %c0_39 = arith.constant 0 : index
    %156 = vector.load %arg11[%c0_38, %c0_39] : memref<64x32xbf16, #tpu.memory_space<vmem>>, vector<64x32xbf16>
    %cst_40 = arith.constant dense<0.000000e+00> : vector<32x32xf32>
    %157 = tpu.matmul %155, %156, %cst_40 {dimension_numbers = #tpu.dot_dimension_numbers<[1], [0], [0], [1], [0, 0, 1, 1], [], []>} : vector<32x64xbf16>, vector<64x32xbf16>, vector<32x32xf32> -> vector<32x32xf32>
    %c0_41 = arith.constant 0 : index
    %c0_42 = arith.constant 0 : index
    %158 = vector.load %arg12[%c0_41, %c0_42] : memref<1x32xf32, #tpu.memory_space<vmem>>, vector<1x32xf32>
    %159 = vector.shape_cast %158 : vector<1x32xf32> to vector<32xf32>
    %160 = vector.shape_cast %159 : vector<32xf32> to vector<1x32xf32>
    %161 = vector.broadcast %160 : vector<1x32xf32> to vector<32x32xf32>
    %162 = arith.addf %157, %161 : vector<32x32xf32>
    %163 = arith.addf %144, %162 : vector<32x32xf32>
    %164 = vector.shape_cast %163 : vector<32x32xf32> to vector<4x256xf32>
    %c0_43 = arith.constant 0 : index
    %c0_44 = arith.constant 0 : index
    %165 = vector.load %arg13[%c0_43, %c0_44] : memref<4x256xf32, #tpu.memory_space<vmem>>, vector<4x256xf32>
    tpu.vector_store %arg13[%c0_43, %c0_44], %164 {strides = array<i32>} : memref<4x256xf32, #tpu.memory_space<vmem>>, vector<4x256xf32>,
    return
  }
  func.func @transform_0(%arg0: i32) -> (i32, i32, i32) {
    %c0_i32 = arith.constant 0 : i32
    %c0_i32_0 = arith.constant 0 : i32
    %c0_i32_1 = arith.constant 0 : i32
    return %arg0, %c0_i32, %c0_i32_0 : i32, i32, i32
  }
  func.func @transform_1(%arg0: i32) -> (i32, i32) {
    %c0_i32 = arith.constant 0 : i32
    %c0_i32_0 = arith.constant 0 : i32
    %c0_i32_1 = arith.constant 0 : i32
    return %c0_i32, %c0_i32_0 : i32, i32
  }
  func.func @transform_2(%arg0: i32) -> (i32, i32) {
    %c0_i32 = arith.constant 0 : i32
    %c0_i32_0 = arith.constant 0 : i32
    %c0_i32_1 = arith.constant 0 : i32
    return %c0_i32, %c0_i32_0 : i32, i32
  }
  func.func @transform_3(%arg0: i32) -> (i32, i32) {
    %c0_i32 = arith.constant 0 : i32
    %c0_i32_0 = arith.constant 0 : i32
    %c0_i32_1 = arith.constant 0 : i32
    return %c0_i32, %c0_i32_0 : i32, i32
  }
  func.func @transform_4(%arg0: i32) -> (i32, i32) {
    %c0_i32 = arith.constant 0 : i32
    %c0_i32_0 = arith.constant 0 : i32
    %c0_i32_1 = arith.constant 0 : i32
    return %c0_i32, %c0_i32_0 : i32, i32
  }
  func.func @transform_5(%arg0: i32) -> (i32, i32) {
    %c0_i32 = arith.constant 0 : i32
    %c0_i32_0 = arith.constant 0 : i32
    %c0_i32_1 = arith.constant 0 : i32
    return %c0_i32, %c0_i32_0 : i32, i32
  }
  func.func @transform_6(%arg0: i32) -> (i32, i32) {
    %c0_i32 = arith.constant 0 : i32
    %c0_i32_0 = arith.constant 0 : i32
    %c0_i32_1 = arith.constant 0 : i32
    return %c0_i32, %c0_i32_0 : i32, i32
  }
  func.func @transform_7(%arg0: i32) -> (i32, i32) {
    %c0_i32 = arith.constant 0 : i32
    %c0_i32_0 = arith.constant 0 : i32
    %c0_i32_1 = arith.constant 0 : i32
    return %c0_i32, %c0_i32_0 : i32, i32
  }
  func.func @transform_8(%arg0: i32) -> (i32, i32) {
    %c0_i32 = arith.constant 0 : i32
    %c0_i32_0 = arith.constant 0 : i32
    %c0_i32_1 = arith.constant 0 : i32
    return %c0_i32, %c0_i32_0 : i32, i32
  }
  func.func @transform_9(%arg0: i32) -> (i32, i32) {
    %c0_i32 = arith.constant 0 : i32
    %c0_i32_0 = arith.constant 0 : i32
    %c0_i32_1 = arith.constant 0 : i32
    return %c0_i32, %c0_i32_0 : i32, i32
  }
  func.func @transform_10(%arg0: i32) -> (i32, i32) {
    %c0_i32 = arith.constant 0 : i32
    %c0_i32_0 = arith.constant 0 : i32
    %c0_i32_1 = arith.constant 0 : i32
    return %c0_i32, %c0_i32_0 : i32, i32
  }
  func.func @transform_11(%arg0: i32) -> (i32, i32) {
    %c0_i32 = arith.constant 0 : i32
    %c0_i32_0 = arith.constant 0 : i32
    %c0_i32_1 = arith.constant 0 : i32
    return %c0_i32, %c0_i32_0 : i32, i32
  }
  func.func @transform_12(%arg0: i32) -> (i32, i32) {
    %c0_i32 = arith.constant 0 : i32
    %c0_i32_0 = arith.constant 0 : i32
    return %arg0, %c0_i32 : i32, i32
  }
}

module attributes {stable_mosaic.version = 11 : i64} {
  func.func @_decoder_layer_kernel(%arg0: i32, %arg1: memref<4x8x32xf32, #tpu.memory_space<vmem>>, %arg2: memref<32x96xbf16, #tpu.memory_space<vmem>>, %arg3: memref<32x32xbf16, #tpu.memory_space<vmem>>, %arg4: memref<1x32xf32, #tpu.memory_space<vmem>>, %arg5: memref<1x32xf32, #tpu.memory_space<vmem>>, %arg6: memref<1x32xf32, #tpu.memory_space<vmem>>, %arg7: memref<1x32xf32, #tpu.memory_space<vmem>>, %arg8: memref<1x32xf32, #tpu.memory_space<vmem>>, %arg9: memref<32x64xbf16, #tpu.memory_space<vmem>>, %arg10: memref<1x64xf32, #tpu.memory_space<vmem>>, %arg11: memref<64x32xbf16, #tpu.memory_space<vmem>>, %arg12: memref<1x32xf32, #tpu.memory_space<vmem>>, %arg13: memref<4x8x32xf32, #tpu.memory_space<vmem>>) attributes {dimension_semantics = [#tpu.dimension_semantics<parallel>], iteration_bounds = array<i64: 1>, scalar_prefetch = 0 : i64, scratch_operands = 0 : i64, tpu.core_type = #tpu.core_type<tc>, window_params = [{transform_indices = @transform_0, window_bounds = array<i64: 4, 8, 32>}, {pipeline_mode = #tpu.pipeline_mode<synchronous>, transform_indices = @transform_1, window_bounds = array<i64: 32, 96>}, {pipeline_mode = #tpu.pipeline_mode<synchronous>, transform_indices = @transform_2, window_bounds = array<i64: 32, 32>}, {pipeline_mode = #tpu.pipeline_mode<synchronous>, transform_indices = @transform_3, window_bounds = array<i64: 1, 32>}, {pipeline_mode = #tpu.pipeline_mode<synchronous>, transform_indices = @transform_4, window_bounds = array<i64: 1, 32>}, {pipeline_mode = #tpu.pipeline_mode<synchronous>, transform_indices = @transform_5, window_bounds = array<i64: 1, 32>}, {pipeline_mode = #tpu.pipeline_mode<synchronous>, transform_indices = @transform_6, window_bounds = array<i64: 1, 32>}, {pipeline_mode = #tpu.pipeline_mode<synchronous>, transform_indices = @transform_7, window_bounds = array<i64: 1, 32>}, {pipeline_mode = #tpu.pipeline_mode<synchronous>, transform_indices = @transform_8, window_bounds = array<i64: 32, 64>}, {pipeline_mode = #tpu.pipeline_mode<synchronous>, transform_indices = @transform_9, window_bounds = array<i64: 1, 64>}, {pipeline_mode = #tpu.pipeline_mode<synchronous>, transform_indices = @transform_10, window_bounds = array<i64: 64, 32>}, {pipeline_mode = #tpu.pipeline_mode<synchronous>, transform_indices = @transform_11, window_bounds = array<i64: 1, 32>}, {transform_indices = @transform_12, window_bounds = array<i64: 4, 8, 32>}]} {
    %c0 = arith.constant 0 : index
    %c0_0 = arith.constant 0 : index
    %c0_1 = arith.constant 0 : index
    %0 = vector.load %arg1[%c0, %c0_0, %c0_1] : memref<4x8x32xf32, #tpu.memory_space<vmem>>, vector<4x8x32xf32>
    %1 = vector.shape_cast %0 : vector<4x8x32xf32> to vector<32x32xf32>
    %cst = arith.constant dense<0.000000e+00> : vector<32xf32>
    %2 = vector.multi_reduction <add>, %1, %cst [1] : vector<32x32xf32> to vector<32xf32>
    %3 = vector.shape_cast %2 : vector<32xf32> to vector<32x1xf32>
    %cst_2 = arith.constant 3.200000e+01 : f32
    %4 = vector.broadcast %cst_2 : f32 to vector<32x1xf32>
    %5 = arith.divf %3, %4 : vector<32x1xf32>
    %6 = vector.broadcast %5 : vector<32x1xf32> to vector<32x32xf32>
    %7 = arith.subf %1, %6 : vector<32x32xf32>
    %8 = arith.mulf %7, %7 : vector<32x32xf32>
    %cst_3 = arith.constant dense<0.000000e+00> : vector<32xf32>
    %9 = vector.multi_reduction <add>, %8, %cst_3 [1] : vector<32x32xf32> to vector<32xf32>
    %10 = vector.shape_cast %9 : vector<32xf32> to vector<32x1xf32>
    %cst_4 = arith.constant 3.200000e+01 : f32
    %11 = vector.broadcast %cst_4 : f32 to vector<32x1xf32>
    %12 = arith.divf %10, %11 : vector<32x1xf32>
    %13 = vector.broadcast %5 : vector<32x1xf32> to vector<32x32xf32>
    %14 = arith.subf %1, %13 : vector<32x32xf32>
    %cst_5 = arith.constant 9.99999974E-6 : f32
    %15 = vector.broadcast %cst_5 : f32 to vector<32x1xf32>
    %16 = arith.addf %12, %15 : vector<32x1xf32>
    %17 = math.rsqrt %16 : vector<32x1xf32>
    %18 = vector.broadcast %17 : vector<32x1xf32> to vector<32x32xf32>
    %19 = arith.mulf %14, %18 : vector<32x32xf32>
    %c0_6 = arith.constant 0 : index
    %c0_7 = arith.constant 0 : index
    %20 = vector.load %arg5[%c0_6, %c0_7] : memref<1x32xf32, #tpu.memory_space<vmem>>, vector<1x32xf32>
    %21 = vector.shape_cast %20 : vector<1x32xf32> to vector<32xf32>
    %22 = vector.shape_cast %21 : vector<32xf32> to vector<1x32xf32>
    %23 = vector.broadcast %22 : vector<1x32xf32> to vector<32x32xf32>
    %24 = arith.mulf %19, %23 : vector<32x32xf32>
    %c0_8 = arith.constant 0 : index
    %c0_9 = arith.constant 0 : index
    %25 = vector.load %arg6[%c0_8, %c0_9] : memref<1x32xf32, #tpu.memory_space<vmem>>, vector<1x32xf32>
    %26 = vector.shape_cast %25 : vector<1x32xf32> to vector<32xf32>
    %27 = vector.shape_cast %26 : vector<32xf32> to vector<1x32xf32>
    %28 = vector.broadcast %27 : vector<1x32xf32> to vector<32x32xf32>
    %29 = arith.addf %24, %28 : vector<32x32xf32>
    %30 = arith.truncf %29 : vector<32x32xf32> to vector<32x32xbf16>
    %c0_10 = arith.constant 0 : index
    %c0_11 = arith.constant 0 : index
    %31 = vector.load %arg2[%c0_10, %c0_11] : memref<32x96xbf16, #tpu.memory_space<vmem>>, vector<32x96xbf16>
    %cst_12 = arith.constant dense<0.000000e+00> : vector<32x96xf32>
    %32 = tpu.matmul %30, %31, %cst_12 {dimension_numbers = #tpu.dot_dimension_numbers<[1], [0], [0], [1], [0, 0, 1, 1], [], []>} : vector<32x32xbf16>, vector<32x96xbf16>, vector<32x96xf32> -> vector<32x96xf32>
    %33 = arith.truncf %32 : vector<32x96xf32> to vector<32x96xbf16>
    %34 = vector.extract_strided_slice %33 {offsets = [0, 0], sizes = [32, 8], strides = [1, 1]} : vector<32x96xbf16> to vector<32x8xbf16>
    %35 = vector.shape_cast %34 : vector<32x8xbf16> to vector<4x8x8xbf16>
    %36 = vector.extract_strided_slice %33 {offsets = [0, 8], sizes = [32, 8], strides = [1, 1]} : vector<32x96xbf16> to vector<32x8xbf16>
    %37 = vector.shape_cast %36 : vector<32x8xbf16> to vector<4x8x8xbf16>
    %38 = vector.extract_strided_slice %33 {offsets = [0, 16], sizes = [32, 8], strides = [1, 1]} : vector<32x96xbf16> to vector<32x8xbf16>
    %39 = vector.shape_cast %38 : vector<32x8xbf16> to vector<4x8x8xbf16>
    %40 = vector.extract_strided_slice %33 {offsets = [0, 24], sizes = [32, 8], strides = [1, 1]} : vector<32x96xbf16> to vector<32x8xbf16>
    %41 = vector.shape_cast %40 : vector<32x8xbf16> to vector<4x8x8xbf16>
    %42 = vector.shape_cast %35 : vector<4x8x8xbf16> to vector<4x1x8x8xbf16>
    %43 = vector.shape_cast %37 : vector<4x8x8xbf16> to vector<4x1x8x8xbf16>
    %44 = vector.shape_cast %39 : vector<4x8x8xbf16> to vector<4x1x8x8xbf16>
    %45 = vector.shape_cast %41 : vector<4x8x8xbf16> to vector<4x1x8x8xbf16>
    %46 = tpu.concatenate %42, %43, %44, %45 in 1 : vector<4x1x8x8xbf16>, vector<4x1x8x8xbf16>, vector<4x1x8x8xbf16>, vector<4x1x8x8xbf16> -> vector<4x4x8x8xbf16>
    %47 = vector.shape_cast %46 : vector<4x4x8x8xbf16> to vector<16x8x8xbf16>
    %48 = vector.extract_strided_slice %33 {offsets = [0, 32], sizes = [32, 8], strides = [1, 1]} : vector<32x96xbf16> to vector<32x8xbf16>
    %49 = vector.shape_cast %48 : vector<32x8xbf16> to vector<4x8x8xbf16>
    %50 = vector.extract_strided_slice %33 {offsets = [0, 40], sizes = [32, 8], strides = [1, 1]} : vector<32x96xbf16> to vector<32x8xbf16>
    %51 = vector.shape_cast %50 : vector<32x8xbf16> to vector<4x8x8xbf16>
    %52 = vector.extract_strided_slice %33 {offsets = [0, 48], sizes = [32, 8], strides = [1, 1]} : vector<32x96xbf16> to vector<32x8xbf16>
    %53 = vector.shape_cast %52 : vector<32x8xbf16> to vector<4x8x8xbf16>
    %54 = vector.extract_strided_slice %33 {offsets = [0, 56], sizes = [32, 8], strides = [1, 1]} : vector<32x96xbf16> to vector<32x8xbf16>
    %55 = vector.shape_cast %54 : vector<32x8xbf16> to vector<4x8x8xbf16>
    %56 = vector.shape_cast %49 : vector<4x8x8xbf16> to vector<4x1x8x8xbf16>
    %57 = vector.shape_cast %51 : vector<4x8x8xbf16> to vector<4x1x8x8xbf16>
    %58 = vector.shape_cast %53 : vector<4x8x8xbf16> to vector<4x1x8x8xbf16>
    %59 = vector.shape_cast %55 : vector<4x8x8xbf16> to vector<4x1x8x8xbf16>
    %60 = tpu.concatenate %56, %57, %58, %59 in 1 : vector<4x1x8x8xbf16>, vector<4x1x8x8xbf16>, vector<4x1x8x8xbf16>, vector<4x1x8x8xbf16> -> vector<4x4x8x8xbf16>
    %61 = vector.shape_cast %60 : vector<4x4x8x8xbf16> to vector<16x8x8xbf16>
    %62 = vector.extract_strided_slice %33 {offsets = [0, 64], sizes = [32, 8], strides = [1, 1]} : vector<32x96xbf16> to vector<32x8xbf16>
    %63 = vector.shape_cast %62 : vector<32x8xbf16> to vector<4x8x8xbf16>
    %64 = vector.extract_strided_slice %33 {offsets = [0, 72], sizes = [32, 8], strides = [1, 1]} : vector<32x96xbf16> to vector<32x8xbf16>
    %65 = vector.shape_cast %64 : vector<32x8xbf16> to vector<4x8x8xbf16>
    %66 = vector.extract_strided_slice %33 {offsets = [0, 80], sizes = [32, 8], strides = [1, 1]} : vector<32x96xbf16> to vector<32x8xbf16>
    %67 = vector.shape_cast %66 : vector<32x8xbf16> to vector<4x8x8xbf16>
    %68 = vector.extract_strided_slice %33 {offsets = [0, 88], sizes = [32, 8], strides = [1, 1]} : vector<32x96xbf16> to vector<32x8xbf16>
    %69 = vector.shape_cast %68 : vector<32x8xbf16> to vector<4x8x8xbf16>
    %70 = vector.shape_cast %63 : vector<4x8x8xbf16> to vector<4x1x8x8xbf16>
    %71 = vector.shape_cast %65 : vector<4x8x8xbf16> to vector<4x1x8x8xbf16>
    %72 = vector.shape_cast %67 : vector<4x8x8xbf16> to vector<4x1x8x8xbf16>
    %73 = vector.shape_cast %69 : vector<4x8x8xbf16> to vector<4x1x8x8xbf16>
    %74 = tpu.concatenate %70, %71, %72, %73 in 1 : vector<4x1x8x8xbf16>, vector<4x1x8x8xbf16>, vector<4x1x8x8xbf16>, vector<4x1x8x8xbf16> -> vector<4x4x8x8xbf16>
    %75 = vector.shape_cast %74 : vector<4x4x8x8xbf16> to vector<16x8x8xbf16>
    "tpu.trace_start"() <{level = 10 : i32, message = "ztd,zsd->zts"}> : () -> ()
    %cst_13 = arith.constant dense<0.000000e+00> : vector<16x8x8xf32>
    %76 = tpu.matmul %47, %61, %cst_13 {dimension_numbers = #tpu.dot_dimension_numbers<[2], [2], [1], [1], [0, 0, 0, 1, 1, 1], [0], [0]>} : vector<16x8x8xbf16>, vector<16x8x8xbf16>, vector<16x8x8xf32> -> vector<16x8x8xf32>
    "tpu.trace_stop"() : () -> ()
    %77 = tpu.iota {dimensions = array<i32: 0>} : vector<8x8xi32>
    %78 = tpu.iota {dimensions = array<i32: 1>} : vector<8x8xi32>
    %79 = arith.cmpi sge, %77, %78 : vector<8x8xi32>
    %80 = vector.shape_cast %79 : vector<8x8xi1> to vector<1x8x8xi1>
    %cst_14 = arith.constant 0xFF800000 : f32
    %81 = vector.shape_cast %80 : vector<1x8x8xi1> to vector<1x8x8xi1>
    %82 = vector.broadcast %81 : vector<1x8x8xi1> to vector<16x8x8xi1>
    %83 = vector.broadcast %cst_14 : f32 to vector<16x8x8xf32>
    %84 = arith.select %82, %76, %83 : vector<16x8x8xi1>, vector<16x8x8xf32>
    %cst_15 = arith.constant dense<0xFF800000> : vector<16x8xf32>
    %85 = vector.multi_reduction <maximumf>, %84, %cst_15 [2] : vector<16x8x8xf32> to vector<16x8xf32>
    %86 = vector.shape_cast %85 : vector<16x8xf32> to vector<16x8x1xf32>
    %87 = vector.broadcast %86 : vector<16x8x1xf32> to vector<16x8x8xf32>
    %88 = arith.subf %84, %87 : vector<16x8x8xf32>
    %89 = math.exp %88 : vector<16x8x8xf32>
    %cst_16 = arith.constant dense<0.000000e+00> : vector<16x8xf32>
    %90 = vector.multi_reduction <add>, %89, %cst_16 [2] : vector<16x8x8xf32> to vector<16x8xf32>
    %91 = vector.shape_cast %90 : vector<16x8xf32> to vector<16x8x1xf32>
    %92 = tpu.reciprocal %91 {approx = true} : vector<16x8x1xf32> -> vector<16x8x1xf32>
    %93 = vector.broadcast %92 : vector<16x8x1xf32> to vector<16x8x8xf32>
    %94 = arith.mulf %89, %93 : vector<16x8x8xf32>
    %95 = arith.truncf %94 : vector<16x8x8xf32> to vector<16x8x8xbf16>
    "tpu.trace_start"() <{level = 10 : i32, message = "zts,zsd->ztd"}> : () -> ()
    %cst_17 = arith.constant dense<0.000000e+00> : vector<16x8x8xf32>
    %96 = tpu.matmul %95, %75, %cst_17 {dimension_numbers = #tpu.dot_dimension_numbers<[2], [1], [1], [2], [0, 0, 0, 1, 1, 2], [0], [0]>} : vector<16x8x8xbf16>, vector<16x8x8xbf16>, vector<16x8x8xf32> -> vector<16x8x8xf32>
    "tpu.trace_stop"() : () -> ()
    %97 = vector.shape_cast %96 : vector<16x8x8xf32> to vector<4x4x8x8xf32>
    %98 = vector.extract_strided_slice %97 {offsets = [0, 0, 0, 0], sizes = [4, 1, 8, 8], strides = [1, 1, 1, 1]} : vector<4x4x8x8xf32> to vector<4x1x8x8xf32>
    %99 = vector.shape_cast %98 : vector<4x1x8x8xf32> to vector<4x8x8xf32>
    %100 = vector.extract_strided_slice %97 {offsets = [0, 1, 0, 0], sizes = [4, 1, 8, 8], strides = [1, 1, 1, 1]} : vector<4x4x8x8xf32> to vector<4x1x8x8xf32>
    %101 = vector.shape_cast %100 : vector<4x1x8x8xf32> to vector<4x8x8xf32>
    %102 = vector.extract_strided_slice %97 {offsets = [0, 2, 0, 0], sizes = [4, 1, 8, 8], strides = [1, 1, 1, 1]} : vector<4x4x8x8xf32> to vector<4x1x8x8xf32>
    %103 = vector.shape_cast %102 : vector<4x1x8x8xf32> to vector<4x8x8xf32>
    %104 = vector.extract_strided_slice %97 {offsets = [0, 3, 0, 0], sizes = [4, 1, 8, 8], strides = [1, 1, 1, 1]} : vector<4x4x8x8xf32> to vector<4x1x8x8xf32>
    %105 = vector.shape_cast %104 : vector<4x1x8x8xf32> to vector<4x8x8xf32>
    %106 = tpu.concatenate %99, %101, %103, %105 in 2 : vector<4x8x8xf32>, vector<4x8x8xf32>, vector<4x8x8xf32>, vector<4x8x8xf32> -> vector<4x8x32xf32>
    %107 = vector.shape_cast %106 : vector<4x8x32xf32> to vector<32x32xf32>
    %108 = arith.truncf %107 : vector<32x32xf32> to vector<32x32xbf16>
    %c0_18 = arith.constant 0 : index
    %c0_19 = arith.constant 0 : index
    %109 = vector.load %arg3[%c0_18, %c0_19] : memref<32x32xbf16, #tpu.memory_space<vmem>>, vector<32x32xbf16>
    %cst_20 = arith.constant dense<0.000000e+00> : vector<32x32xf32>
    %110 = tpu.matmul %108, %109, %cst_20 {dimension_numbers = #tpu.dot_dimension_numbers<[1], [0], [0], [1], [0, 0, 1, 1], [], []>} : vector<32x32xbf16>, vector<32x32xbf16>, vector<32x32xf32> -> vector<32x32xf32>
    %c0_21 = arith.constant 0 : index
    %c0_22 = arith.constant 0 : index
    %111 = vector.load %arg4[%c0_21, %c0_22] : memref<1x32xf32, #tpu.memory_space<vmem>>, vector<1x32xf32>
    %112 = vector.shape_cast %111 : vector<1x32xf32> to vector<32xf32>
    %113 = vector.shape_cast %112 : vector<32xf32> to vector<1x32xf32>
    %114 = vector.broadcast %113 : vector<1x32xf32> to vector<32x32xf32>
    %115 = arith.addf %110, %114 : vector<32x32xf32>
    %116 = arith.addf %29, %115 : vector<32x32xf32>
    %cst_23 = arith.constant dense<0.000000e+00> : vector<32xf32>
    %117 = vector.multi_reduction <add>, %116, %cst_23 [1] : vector<32x32xf32> to vector<32xf32>
    %118 = vector.shape_cast %117 : vector<32xf32> to vector<32x1xf32>
    %cst_24 = arith.constant 3.200000e+01 : f32
    %119 = vector.broadcast %cst_24 : f32 to vector<32x1xf32>
    %120 = arith.divf %118, %119 : vector<32x1xf32>
    %121 = vector.broadcast %120 : vector<32x1xf32> to vector<32x32xf32>
    %122 = arith.subf %116, %121 : vector<32x32xf32>
    %123 = arith.mulf %122, %122 : vector<32x32xf32>
    %cst_25 = arith.constant dense<0.000000e+00> : vector<32xf32>
    %124 = vector.multi_reduction <add>, %123, %cst_25 [1] : vector<32x32xf32> to vector<32xf32>
    %125 = vector.shape_cast %124 : vector<32xf32> to vector<32x1xf32>
    %cst_26 = arith.constant 3.200000e+01 : f32
    %126 = vector.broadcast %cst_26 : f32 to vector<32x1xf32>
    %127 = arith.divf %125, %126 : vector<32x1xf32>
    %128 = vector.broadcast %120 : vector<32x1xf32> to vector<32x32xf32>
    %129 = arith.subf %116, %128 : vector<32x32xf32>
    %cst_27 = arith.constant 9.99999974E-6 : f32
    %130 = vector.broadcast %cst_27 : f32 to vector<32x1xf32>
    %131 = arith.addf %127, %130 : vector<32x1xf32>
    %132 = math.rsqrt %131 : vector<32x1xf32>
    %133 = vector.broadcast %132 : vector<32x1xf32> to vector<32x32xf32>
    %134 = arith.mulf %129, %133 : vector<32x32xf32>
    %c0_28 = arith.constant 0 : index
    %c0_29 = arith.constant 0 : index
    %135 = vector.load %arg7[%c0_28, %c0_29] : memref<1x32xf32, #tpu.memory_space<vmem>>, vector<1x32xf32>
    %136 = vector.shape_cast %135 : vector<1x32xf32> to vector<32xf32>
    %137 = vector.shape_cast %136 : vector<32xf32> to vector<1x32xf32>
    %138 = vector.broadcast %137 : vector<1x32xf32> to vector<32x32xf32>
    %139 = arith.mulf %134, %138 : vector<32x32xf32>
    %c0_30 = arith.constant 0 : index
    %c0_31 = arith.constant 0 : index
    %140 = vector.load %arg8[%c0_30, %c0_31] : memref<1x32xf32, #tpu.memory_space<vmem>>, vector<1x32xf32>
    %141 = vector.shape_cast %140 : vector<1x32xf32> to vector<32xf32>
    %142 = vector.shape_cast %141 : vector<32xf32> to vector<1x32xf32>
    %143 = vector.broadcast %142 : vector<1x32xf32> to vector<32x32xf32>
    %144 = arith.addf %139, %143 : vector<32x32xf32>
    %145 = arith.truncf %144 : vector<32x32xf32> to vector<32x32xbf16>
    %c0_32 = arith.constant 0 : index
    %c0_33 = arith.constant 0 : index
    %146 = vector.load %arg9[%c0_32, %c0_33] : memref<32x64xbf16, #tpu.memory_space<vmem>>, vector<32x64xbf16>
    %cst_34 = arith.constant dense<0.000000e+00> : vector<32x64xf32>
    %147 = tpu.matmul %145, %146, %cst_34 {dimension_numbers = #tpu.dot_dimension_numbers<[1], [0], [0], [1], [0, 0, 1, 1], [], []>} : vector<32x32xbf16>, vector<32x64xbf16>, vector<32x64xf32> -> vector<32x64xf32>
    %c0_35 = arith.constant 0 : index
    %c0_36 = arith.constant 0 : index
    %148 = vector.load %arg10[%c0_35, %c0_36] : memref<1x64xf32, #tpu.memory_space<vmem>>, vector<1x64xf32>
    %149 = vector.shape_cast %148 : vector<1x64xf32> to vector<64xf32>
    %150 = vector.shape_cast %149 : vector<64xf32> to vector<1x64xf32>
    %151 = vector.broadcast %150 : vector<1x64xf32> to vector<32x64xf32>
    %152 = arith.addf %147, %151 : vector<32x64xf32>
    %cst_37 = arith.constant 0.000000e+00 : f32
    %153 = vector.broadcast %cst_37 : f32 to vector<32x64xf32>
    %154 = arith.maximumf %152, %153 : vector<32x64xf32>
    %155 = arith.truncf %154 : vector<32x64xf32> to vector<32x64xbf16>
    %c0_38 = arith.constant 0 : index
    %c0_39 = arith.constant 0 : index
    %156 = vector.load %arg11[%c0_38, %c0_39] : memref<64x32xbf16, #tpu.memory_space<vmem>>, vector<64x32xbf16>
    %cst_40 = arith.constant dense<0.000000e+00> : vector<32x32xf32>
    %157 = tpu.matmul %155, %156, %cst_40 {dimension_numbers = #tpu.dot_dimension_numbers<[1], [0], [0], [1], [0, 0, 1, 1], [], []>} : vector<32x64xbf16>, vector<64x32xbf16>, vector<32x32xf32> -> vector<32x32xf32>
    %c0_41 = arith.constant 0 : index
    %c0_42 = arith.constant 0 : index
    %158 = vector.load %arg12[%c0_41, %c0_42] : memref<1x32xf32, #tpu.memory_space<vmem>>, vector<1x32xf32>
    %159 = vector.shape_cast %158 : vector<1x32xf32> to vector<32xf32>
    %160 = vector.shape_cast %159 : vector<32xf32> to vector<1x32xf32>
    %161 = vector.broadcast %160 : vector<1x32xf32> to vector<32x32xf32>
    %162 = arith.addf %157, %161 : vector<32x32xf32>
    %163 = arith.addf %144, %162 : vector<32x32xf32>
    %164 = vector.shape_cast %163 : vector<32x32xf32> to vector<4x8x32xf32>
    %c0_43 = arith.constant 0 : index
    %c0_44 = arith.constant 0 : index
    %c0_45 = arith.constant 0 : index
    %165 = vector.load %arg13[%c0_43, %c0_44, %c0_45] : memref<4x8x32xf32, #tpu.memory_space<vmem>>, vector<4x8x32xf32>
    tpu.vector_store %arg13[%c0_43, %c0_44, %c0_45], %164 {strides = array<i32>} : memref<4x8x32xf32, #tpu.memory_space<vmem>>, vector<4x8x32xf32>,
    return
  }
  func.func @transform_0(%arg0: i32) -> (i32, i32, i32) {
    %c0_i32 = arith.constant 0 : i32
    %c0_i32_0 = arith.constant 0 : i32
    %c0_i32_1 = arith.constant 0 : i32
    return %arg0, %c0_i32, %c0_i32_0 : i32, i32, i32
  }
  func.func @transform_1(%arg0: i32) -> (i32, i32) {
    %c0_i32 = arith.constant 0 : i32
    %c0_i32_0 = arith.constant 0 : i32
    %c0_i32_1 = arith.constant 0 : i32
    return %c0_i32, %c0_i32_0 : i32, i32
  }
  func.func @transform_2(%arg0: i32) -> (i32, i32) {
    %c0_i32 = arith.constant 0 : i32
    %c0_i32_0 = arith.constant 0 : i32
    %c0_i32_1 = arith.constant 0 : i32
    return %c0_i32, %c0_i32_0 : i32, i32
  }
  func.func @transform_3(%arg0: i32) -> (i32, i32) {
    %c0_i32 = arith.constant 0 : i32
    %c0_i32_0 = arith.constant 0 : i32
    %c0_i32_1 = arith.constant 0 : i32
    return %c0_i32, %c0_i32_0 : i32, i32
  }
  func.func @transform_4(%arg0: i32) -> (i32, i32) {
    %c0_i32 = arith.constant 0 : i32
    %c0_i32_0 = arith.constant 0 : i32
    %c0_i32_1 = arith.constant 0 : i32
    return %c0_i32, %c0_i32_0 : i32, i32
  }
  func.func @transform_5(%arg0: i32) -> (i32, i32) {
    %c0_i32 = arith.constant 0 : i32
    %c0_i32_0 = arith.constant 0 : i32
    %c0_i32_1 = arith.constant 0 : i32
    return %c0_i32, %c0_i32_0 : i32, i32
  }
  func.func @transform_6(%arg0: i32) -> (i32, i32) {
    %c0_i32 = arith.constant 0 : i32
    %c0_i32_0 = arith.constant 0 : i32
    %c0_i32_1 = arith.constant 0 : i32
    return %c0_i32, %c0_i32_0 : i32, i32
  }
  func.func @transform_7(%arg0: i32) -> (i32, i32) {
    %c0_i32 = arith.constant 0 : i32
    %c0_i32_0 = arith.constant 0 : i32
    %c0_i32_1 = arith.constant 0 : i32
    return %c0_i32, %c0_i32_0 : i32, i32
  }
  func.func @transform_8(%arg0: i32) -> (i32, i32) {
    %c0_i32 = arith.constant 0 : i32
    %c0_i32_0 = arith.constant 0 : i32
    %c0_i32_1 = arith.constant 0 : i32
    return %c0_i32, %c0_i32_0 : i32, i32
  }
  func.func @transform_9(%arg0: i32) -> (i32, i32) {
    %c0_i32 = arith.constant 0 : i32
    %c0_i32_0 = arith.constant 0 : i32
    %c0_i32_1 = arith.constant 0 : i32
    return %c0_i32, %c0_i32_0 : i32, i32
  }
  func.func @transform_10(%arg0: i32) -> (i32, i32) {
    %c0_i32 = arith.constant 0 : i32
    %c0_i32_0 = arith.constant 0 : i32
    %c0_i32_1 = arith.constant 0 : i32
    return %c0_i32, %c0_i32_0 : i32, i32
  }
  func.func @transform_11(%arg0: i32) -> (i32, i32) {
    %c0_i32 = arith.constant 0 : i32
    %c0_i32_0 = arith.constant 0 : i32
    %c0_i32_1 = arith.constant 0 : i32
    return %c0_i32, %c0_i32_0 : i32, i32
  }
  func.func @transform_12(%arg0: i32) -> (i32, i32, i32) {
    %c0_i32 = arith.constant 0 : i32
    %c0_i32_0 = arith.constant 0 : i32
    %c0_i32_1 = arith.constant 0 : i32
    return %arg0, %c0_i32, %c0_i32_0 : i32, i32, i32
  }
}

module attributes {stable_mosaic.version = 11 : i64} {
  func.func @_decoder_layer_kernel(%arg0: i32, %arg1: memref<4x8x32xf32, #tpu.memory_space<vmem>>, %arg2: memref<32x96xbf16, #tpu.memory_space<vmem>>, %arg3: memref<32x32xbf16, #tpu.memory_space<vmem>>, %arg4: memref<1x32xf32, #tpu.memory_space<vmem>>, %arg5: memref<1x32xf32, #tpu.memory_space<vmem>>, %arg6: memref<1x32xf32, #tpu.memory_space<vmem>>, %arg7: memref<1x32xf32, #tpu.memory_space<vmem>>, %arg8: memref<1x32xf32, #tpu.memory_space<vmem>>, %arg9: memref<32x64xbf16, #tpu.memory_space<vmem>>, %arg10: memref<1x64xf32, #tpu.memory_space<vmem>>, %arg11: memref<64x32xbf16, #tpu.memory_space<vmem>>, %arg12: memref<1x32xf32, #tpu.memory_space<vmem>>, %arg13: memref<4x256xf32, #tpu.memory_space<vmem>>) attributes {dimension_semantics = [#tpu.dimension_semantics<parallel>], iteration_bounds = array<i64: 1>, scalar_prefetch = 0 : i64, scratch_operands = 0 : i64, tpu.core_type = #tpu.core_type<tc>, window_params = [{transform_indices = @transform_0, window_bounds = array<i64: 4, 8, 32>}, {pipeline_mode = #tpu.pipeline_mode<synchronous>, transform_indices = @transform_1, window_bounds = array<i64: 32, 96>}, {pipeline_mode = #tpu.pipeline_mode<synchronous>, transform_indices = @transform_2, window_bounds = array<i64: 32, 32>}, {pipeline_mode = #tpu.pipeline_mode<synchronous>, transform_indices = @transform_3, window_bounds = array<i64: 1, 32>}, {pipeline_mode = #tpu.pipeline_mode<synchronous>, transform_indices = @transform_4, window_bounds = array<i64: 1, 32>}, {pipeline_mode = #tpu.pipeline_mode<synchronous>, transform_indices = @transform_5, window_bounds = array<i64: 1, 32>}, {pipeline_mode = #tpu.pipeline_mode<synchronous>, transform_indices = @transform_6, window_bounds = array<i64: 1, 32>}, {pipeline_mode = #tpu.pipeline_mode<synchronous>, transform_indices = @transform_7, window_bounds = array<i64: 1, 32>}, {pipeline_mode = #tpu.pipeline_mode<synchronous>, transform_indices = @transform_8, window_bounds = array<i64: 32, 64>}, {pipeline_mode = #tpu.pipeline_mode<synchronous>, transform_indices = @transform_9, window_bounds = array<i64: 1, 64>}, {pipeline_mode = #tpu.pipeline_mode<synchronous>, transform_indices = @transform_10, window_bounds = array<i64: 64, 32>}, {pipeline_mode = #tpu.pipeline_mode<synchronous>, transform_indices = @transform_11, window_bounds = array<i64: 1, 32>}, {transform_indices = @transform_12, window_bounds = array<i64: 4, 256>}]} {
    %c0 = arith.constant 0 : index
    %c0_0 = arith.constant 0 : index
    %c0_1 = arith.constant 0 : index
    %0 = vector.load %arg1[%c0, %c0_0, %c0_1] : memref<4x8x32xf32, #tpu.memory_space<vmem>>, vector<4x8x32xf32>
    %1 = vector.shape_cast %0 : vector<4x8x32xf32> to vector<32x32xf32>
    %cst = arith.constant dense<0.000000e+00> : vector<32xf32>
    %2 = vector.multi_reduction <add>, %1, %cst [1] : vector<32x32xf32> to vector<32xf32>
    %3 = vector.shape_cast %2 : vector<32xf32> to vector<32x1xf32>
    %cst_2 = arith.constant 3.200000e+01 : f32
    %4 = vector.broadcast %cst_2 : f32 to vector<32x1xf32>
    %5 = arith.divf %3, %4 : vector<32x1xf32>
    %6 = vector.broadcast %5 : vector<32x1xf32> to vector<32x32xf32>
    %7 = arith.subf %1, %6 : vector<32x32xf32>
    %8 = arith.mulf %7, %7 : vector<32x32xf32>
    %cst_3 = arith.constant dense<0.000000e+00> : vector<32xf32>
    %9 = vector.multi_reduction <add>, %8, %cst_3 [1] : vector<32x32xf32> to vector<32xf32>
    %10 = vector.shape_cast %9 : vector<32xf32> to vector<32x1xf32>
    %cst_4 = arith.constant 3.200000e+01 : f32
    %11 = vector.broadcast %cst_4 : f32 to vector<32x1xf32>
    %12 = arith.divf %10, %11 : vector<32x1xf32>
    %13 = vector.broadcast %5 : vector<32x1xf32> to vector<32x32xf32>
    %14 = arith.subf %1, %13 : vector<32x32xf32>
    %cst_5 = arith.constant 9.99999974E-6 : f32
    %15 = vector.broadcast %cst_5 : f32 to vector<32x1xf32>
    %16 = arith.addf %12, %15 : vector<32x1xf32>
    %17 = math.rsqrt %16 : vector<32x1xf32>
    %18 = vector.broadcast %17 : vector<32x1xf32> to vector<32x32xf32>
    %19 = arith.mulf %14, %18 : vector<32x32xf32>
    %c0_6 = arith.constant 0 : index
    %c0_7 = arith.constant 0 : index
    %20 = vector.load %arg5[%c0_6, %c0_7] : memref<1x32xf32, #tpu.memory_space<vmem>>, vector<1x32xf32>
    %21 = vector.shape_cast %20 : vector<1x32xf32> to vector<32xf32>
    %22 = vector.shape_cast %21 : vector<32xf32> to vector<1x32xf32>
    %23 = vector.broadcast %22 : vector<1x32xf32> to vector<32x32xf32>
    %24 = arith.mulf %19, %23 : vector<32x32xf32>
    %c0_8 = arith.constant 0 : index
    %c0_9 = arith.constant 0 : index
    %25 = vector.load %arg6[%c0_8, %c0_9] : memref<1x32xf32, #tpu.memory_space<vmem>>, vector<1x32xf32>
    %26 = vector.shape_cast %25 : vector<1x32xf32> to vector<32xf32>
    %27 = vector.shape_cast %26 : vector<32xf32> to vector<1x32xf32>
    %28 = vector.broadcast %27 : vector<1x32xf32> to vector<32x32xf32>
    %29 = arith.addf %24, %28 : vector<32x32xf32>
    %30 = arith.truncf %29 : vector<32x32xf32> to vector<32x32xbf16>
    %c0_10 = arith.constant 0 : index
    %c0_11 = arith.constant 0 : index
    %31 = vector.load %arg2[%c0_10, %c0_11] : memref<32x96xbf16, #tpu.memory_space<vmem>>, vector<32x96xbf16>
    %cst_12 = arith.constant dense<0.000000e+00> : vector<32x96xf32>
    %32 = tpu.matmul %30, %31, %cst_12 {dimension_numbers = #tpu.dot_dimension_numbers<[1], [0], [0], [1], [0, 0, 1, 1], [], []>} : vector<32x32xbf16>, vector<32x96xbf16>, vector<32x96xf32> -> vector<32x96xf32>
    %33 = arith.truncf %32 : vector<32x96xf32> to vector<32x96xbf16>
    %34 = vector.extract_strided_slice %33 {offsets = [0, 0], sizes = [32, 8], strides = [1, 1]} : vector<32x96xbf16> to vector<32x8xbf16>
    %35 = vector.shape_cast %34 : vector<32x8xbf16> to vector<4x8x8xbf16>
    %36 = vector.extract_strided_slice %33 {offsets = [0, 8], sizes = [32, 8], strides = [1, 1]} : vector<32x96xbf16> to vector<32x8xbf16>
    %37 = vector.shape_cast %36 : vector<32x8xbf16> to vector<4x8x8xbf16>
    %38 = vector.extract_strided_slice %33 {offsets = [0, 16], sizes = [32, 8], strides = [1, 1]} : vector<32x96xbf16> to vector<32x8xbf16>
    %39 = vector.shape_cast %38 : vector<32x8xbf16> to vector<4x8x8xbf16>
    %40 = vector.extract_strided_slice %33 {offsets = [0, 24], sizes = [32, 8], strides = [1, 1]} : vector<32x96xbf16> to vector<32x8xbf16>
    %41 = vector.shape_cast %40 : vector<32x8xbf16> to vector<4x8x8xbf16>
    %42 = vector.shape_cast %35 : vector<4x8x8xbf16> to vector<4x1x8x8xbf16>
    %43 = vector.shape_cast %37 : vector<4x8x8xbf16> to vector<4x1x8x8xbf16>
    %44 = vector.shape_cast %39 : vector<4x8x8xbf16> to vector<4x1x8x8xbf16>
    %45 = vector.shape_cast %41 : vector<4x8x8xbf16> to vector<4x1x8x8xbf16>
    %46 = tpu.concatenate %42, %43, %44, %45 in 1 : vector<4x1x8x8xbf16>, vector<4x1x8x8xbf16>, vector<4x1x8x8xbf16>, vector<4x1x8x8xbf16> -> vector<4x4x8x8xbf16>
    %47 = vector.shape_cast %46 : vector<4x4x8x8xbf16> to vector<16x8x8xbf16>
    %48 = vector.extract_strided_slice %33 {offsets = [0, 32], sizes = [32, 8], strides = [1, 1]} : vector<32x96xbf16> to vector<32x8xbf16>
    %49 = vector.shape_cast %48 : vector<32x8xbf16> to vector<4x8x8xbf16>
    %50 = vector.extract_strided_slice %33 {offsets = [0, 40], sizes = [32, 8], strides = [1, 1]} : vector<32x96xbf16> to vector<32x8xbf16>
    %51 = vector.shape_cast %50 : vector<32x8xbf16> to vector<4x8x8xbf16>
    %52 = vector.extract_strided_slice %33 {offsets = [0, 48], sizes = [32, 8], strides = [1, 1]} : vector<32x96xbf16> to vector<32x8xbf16>
    %53 = vector.shape_cast %52 : vector<32x8xbf16> to vector<4x8x8xbf16>
    %54 = vector.extract_strided_slice %33 {offsets = [0, 56], sizes = [32, 8], strides = [1, 1]} : vector<32x96xbf16> to vector<32x8xbf16>
    %55 = vector.shape_cast %54 : vector<32x8xbf16> to vector<4x8x8xbf16>
    %56 = vector.shape_cast %49 : vector<4x8x8xbf16> to vector<4x1x8x8xbf16>
    %57 = vector.shape_cast %51 : vector<4x8x8xbf16> to vector<4x1x8x8xbf16>
    %58 = vector.shape_cast %53 : vector<4x8x8xbf16> to vector<4x1x8x8xbf16>
    %59 = vector.shape_cast %55 : vector<4x8x8xbf16> to vector<4x1x8x8xbf16>
    %60 = tpu.concatenate %56, %57, %58, %59 in 1 : vector<4x1x8x8xbf16>, vector<4x1x8x8xbf16>, vector<4x1x8x8xbf16>, vector<4x1x8x8xbf16> -> vector<4x4x8x8xbf16>
    %61 = vector.shape_cast %60 : vector<4x4x8x8xbf16> to vector<16x8x8xbf16>
    %62 = vector.extract_strided_slice %33 {offsets = [0, 64], sizes = [32, 8], strides = [1, 1]} : vector<32x96xbf16> to vector<32x8xbf16>
    %63 = vector.shape_cast %62 : vector<32x8xbf16> to vector<4x8x8xbf16>
    %64 = vector.extract_strided_slice %33 {offsets = [0, 72], sizes = [32, 8], strides = [1, 1]} : vector<32x96xbf16> to vector<32x8xbf16>
    %65 = vector.shape_cast %64 : vector<32x8xbf16> to vector<4x8x8xbf16>
    %66 = vector.extract_strided_slice %33 {offsets = [0, 80], sizes = [32, 8], strides = [1, 1]} : vector<32x96xbf16> to vector<32x8xbf16>
    %67 = vector.shape_cast %66 : vector<32x8xbf16> to vector<4x8x8xbf16>
    %68 = vector.extract_strided_slice %33 {offsets = [0, 88], sizes = [32, 8], strides = [1, 1]} : vector<32x96xbf16> to vector<32x8xbf16>
    %69 = vector.shape_cast %68 : vector<32x8xbf16> to vector<4x8x8xbf16>
    %70 = vector.shape_cast %63 : vector<4x8x8xbf16> to vector<4x1x8x8xbf16>
    %71 = vector.shape_cast %65 : vector<4x8x8xbf16> to vector<4x1x8x8xbf16>
    %72 = vector.shape_cast %67 : vector<4x8x8xbf16> to vector<4x1x8x8xbf16>
    %73 = vector.shape_cast %69 : vector<4x8x8xbf16> to vector<4x1x8x8xbf16>
    %74 = tpu.concatenate %70, %71, %72, %73 in 1 : vector<4x1x8x8xbf16>, vector<4x1x8x8xbf16>, vector<4x1x8x8xbf16>, vector<4x1x8x8xbf16> -> vector<4x4x8x8xbf16>
    %75 = vector.shape_cast %74 : vector<4x4x8x8xbf16> to vector<16x8x8xbf16>
    "tpu.trace_start"() <{level = 10 : i32, message = "ztd,zsd->zts"}> : () -> ()
    %cst_13 = arith.constant dense<0.000000e+00> : vector<16x8x8xf32>
    %76 = tpu.matmul %47, %61, %cst_13 {dimension_numbers = #tpu.dot_dimension_numbers<[2], [2], [1], [1], [0, 0, 0, 1, 1, 1], [0], [0]>} : vector<16x8x8xbf16>, vector<16x8x8xbf16>, vector<16x8x8xf32> -> vector<16x8x8xf32>
    "tpu.trace_stop"() : () -> ()
    %77 = tpu.iota {dimensions = array<i32: 0>} : vector<8x8xi32>
    %78 = tpu.iota {dimensions = array<i32: 1>} : vector<8x8xi32>
    %79 = arith.cmpi sge, %77, %78 : vector<8x8xi32>
    %80 = vector.shape_cast %79 : vector<8x8xi1> to vector<1x8x8xi1>
    %cst_14 = arith.constant 0xFF800000 : f32
    %81 = vector.shape_cast %80 : vector<1x8x8xi1> to vector<1x8x8xi1>
    %82 = vector.broadcast %81 : vector<1x8x8xi1> to vector<16x8x8xi1>
    %83 = vector.broadcast %cst_14 : f32 to vector<16x8x8xf32>
    %84 = arith.select %82, %76, %83 : vector<16x8x8xi1>, vector<16x8x8xf32>
    %cst_15 = arith.constant dense<0xFF800000> : vector<16x8xf32>
    %85 = vector.multi_reduction <maximumf>, %84, %cst_15 [2] : vector<16x8x8xf32> to vector<16x8xf32>
    %86 = vector.shape_cast %85 : vector<16x8xf32> to vector<16x8x1xf32>
    %87 = vector.broadcast %86 : vector<16x8x1xf32> to vector<16x8x8xf32>
    %88 = arith.subf %84, %87 : vector<16x8x8xf32>
    %89 = math.exp %88 : vector<16x8x8xf32>
    %cst_16 = arith.constant dense<0.000000e+00> : vector<16x8xf32>
    %90 = vector.multi_reduction <add>, %89, %cst_16 [2] : vector<16x8x8xf32> to vector<16x8xf32>
    %91 = vector.shape_cast %90 : vector<16x8xf32> to vector<16x8x1xf32>
    %92 = tpu.reciprocal %91 {approx = true} : vector<16x8x1xf32> -> vector<16x8x1xf32>
    %93 = vector.broadcast %92 : vector<16x8x1xf32> to vector<16x8x8xf32>
    %94 = arith.mulf %89, %93 : vector<16x8x8xf32>
    %95 = arith.truncf %94 : vector<16x8x8xf32> to vector<16x8x8xbf16>
    "tpu.trace_start"() <{level = 10 : i32, message = "zts,zsd->ztd"}> : () -> ()
    %cst_17 = arith.constant dense<0.000000e+00> : vector<16x8x8xf32>
    %96 = tpu.matmul %95, %75, %cst_17 {dimension_numbers = #tpu.dot_dimension_numbers<[2], [1], [1], [2], [0, 0, 0, 1, 1, 2], [0], [0]>} : vector<16x8x8xbf16>, vector<16x8x8xbf16>, vector<16x8x8xf32> -> vector<16x8x8xf32>
    "tpu.trace_stop"() : () -> ()
    %97 = vector.shape_cast %96 : vector<16x8x8xf32> to vector<4x4x8x8xf32>
    %98 = vector.extract_strided_slice %97 {offsets = [0, 0, 0, 0], sizes = [4, 1, 8, 8], strides = [1, 1, 1, 1]} : vector<4x4x8x8xf32> to vector<4x1x8x8xf32>
    %99 = vector.shape_cast %98 : vector<4x1x8x8xf32> to vector<4x8x8xf32>
    %100 = vector.extract_strided_slice %97 {offsets = [0, 1, 0, 0], sizes = [4, 1, 8, 8], strides = [1, 1, 1, 1]} : vector<4x4x8x8xf32> to vector<4x1x8x8xf32>
    %101 = vector.shape_cast %100 : vector<4x1x8x8xf32> to vector<4x8x8xf32>
    %102 = vector.extract_strided_slice %97 {offsets = [0, 2, 0, 0], sizes = [4, 1, 8, 8], strides = [1, 1, 1, 1]} : vector<4x4x8x8xf32> to vector<4x1x8x8xf32>
    %103 = vector.shape_cast %102 : vector<4x1x8x8xf32> to vector<4x8x8xf32>
    %104 = vector.extract_strided_slice %97 {offsets = [0, 3, 0, 0], sizes = [4, 1, 8, 8], strides = [1, 1, 1, 1]} : vector<4x4x8x8xf32> to vector<4x1x8x8xf32>
    %105 = vector.shape_cast %104 : vector<4x1x8x8xf32> to vector<4x8x8xf32>
    %106 = tpu.concatenate %99, %101, %103, %105 in 2 : vector<4x8x8xf32>, vector<4x8x8xf32>, vector<4x8x8xf32>, vector<4x8x8xf32> -> vector<4x8x32xf32>
    %107 = vector.shape_cast %106 : vector<4x8x32xf32> to vector<32x32xf32>
    %108 = arith.truncf %107 : vector<32x32xf32> to vector<32x32xbf16>
    %c0_18 = arith.constant 0 : index
    %c0_19 = arith.constant 0 : index
    %109 = vector.load %arg3[%c0_18, %c0_19] : memref<32x32xbf16, #tpu.memory_space<vmem>>, vector<32x32xbf16>
    %cst_20 = arith.constant dense<0.000000e+00> : vector<32x32xf32>
    %110 = tpu.matmul %108, %109, %cst_20 {dimension_numbers = #tpu.dot_dimension_numbers<[1], [0], [0], [1], [0, 0, 1, 1], [], []>} : vector<32x32xbf16>, vector<32x32xbf16>, vector<32x32xf32> -> vector<32x32xf32>
    %c0_21 = arith.constant 0 : index
    %c0_22 = arith.constant 0 : index
    %111 = vector.load %arg4[%c0_21, %c0_22] : memref<1x32xf32, #tpu.memory_space<vmem>>, vector<1x32xf32>
    %112 = vector.shape_cast %111 : vector<1x32xf32> to vector<32xf32>
    %113 = vector.shape_cast %112 : vector<32xf32> to vector<1x32xf32>
    %114 = vector.broadcast %113 : vector<1x32xf32> to vector<32x32xf32>
    %115 = arith.addf %110, %114 : vector<32x32xf32>
    %116 = arith.addf %29, %115 : vector<32x32xf32>
    %cst_23 = arith.constant dense<0.000000e+00> : vector<32xf32>
    %117 = vector.multi_reduction <add>, %116, %cst_23 [1] : vector<32x32xf32> to vector<32xf32>
    %118 = vector.shape_cast %117 : vector<32xf32> to vector<32x1xf32>
    %cst_24 = arith.constant 3.200000e+01 : f32
    %119 = vector.broadcast %cst_24 : f32 to vector<32x1xf32>
    %120 = arith.divf %118, %119 : vector<32x1xf32>
    %121 = vector.broadcast %120 : vector<32x1xf32> to vector<32x32xf32>
    %122 = arith.subf %116, %121 : vector<32x32xf32>
    %123 = arith.mulf %122, %122 : vector<32x32xf32>
    %cst_25 = arith.constant dense<0.000000e+00> : vector<32xf32>
    %124 = vector.multi_reduction <add>, %123, %cst_25 [1] : vector<32x32xf32> to vector<32xf32>
    %125 = vector.shape_cast %124 : vector<32xf32> to vector<32x1xf32>
    %cst_26 = arith.constant 3.200000e+01 : f32
    %126 = vector.broadcast %cst_26 : f32 to vector<32x1xf32>
    %127 = arith.divf %125, %126 : vector<32x1xf32>
    %128 = vector.broadcast %120 : vector<32x1xf32> to vector<32x32xf32>
    %129 = arith.subf %116, %128 : vector<32x32xf32>
    %cst_27 = arith.constant 9.99999974E-6 : f32
    %130 = vector.broadcast %cst_27 : f32 to vector<32x1xf32>
    %131 = arith.addf %127, %130 : vector<32x1xf32>
    %132 = math.rsqrt %131 : vector<32x1xf32>
    %133 = vector.broadcast %132 : vector<32x1xf32> to vector<32x32xf32>
    %134 = arith.mulf %129, %133 : vector<32x32xf32>
    %c0_28 = arith.constant 0 : index
    %c0_29 = arith.constant 0 : index
    %135 = vector.load %arg7[%c0_28, %c0_29] : memref<1x32xf32, #tpu.memory_space<vmem>>, vector<1x32xf32>
    %136 = vector.shape_cast %135 : vector<1x32xf32> to vector<32xf32>
    %137 = vector.shape_cast %136 : vector<32xf32> to vector<1x32xf32>
    %138 = vector.broadcast %137 : vector<1x32xf32> to vector<32x32xf32>
    %139 = arith.mulf %134, %138 : vector<32x32xf32>
    %c0_30 = arith.constant 0 : index
    %c0_31 = arith.constant 0 : index
    %140 = vector.load %arg8[%c0_30, %c0_31] : memref<1x32xf32, #tpu.memory_space<vmem>>, vector<1x32xf32>
    %141 = vector.shape_cast %140 : vector<1x32xf32> to vector<32xf32>
    %142 = vector.shape_cast %141 : vector<32xf32> to vector<1x32xf32>
    %143 = vector.broadcast %142 : vector<1x32xf32> to vector<32x32xf32>
    %144 = arith.addf %139, %143 : vector<32x32xf32>
    %145 = arith.truncf %144 : vector<32x32xf32> to vector<32x32xbf16>
    %c0_32 = arith.constant 0 : index
    %c0_33 = arith.constant 0 : index
    %146 = vector.load %arg9[%c0_32, %c0_33] : memref<32x64xbf16, #tpu.memory_space<vmem>>, vector<32x64xbf16>
    %cst_34 = arith.constant dense<0.000000e+00> : vector<32x64xf32>
    %147 = tpu.matmul %145, %146, %cst_34 {dimension_numbers = #tpu.dot_dimension_numbers<[1], [0], [0], [1], [0, 0, 1, 1], [], []>} : vector<32x32xbf16>, vector<32x64xbf16>, vector<32x64xf32> -> vector<32x64xf32>
    %c0_35 = arith.constant 0 : index
    %c0_36 = arith.constant 0 : index
    %148 = vector.load %arg10[%c0_35, %c0_36] : memref<1x64xf32, #tpu.memory_space<vmem>>, vector<1x64xf32>
    %149 = vector.shape_cast %148 : vector<1x64xf32> to vector<64xf32>
    %150 = vector.shape_cast %149 : vector<64xf32> to vector<1x64xf32>
    %151 = vector.broadcast %150 : vector<1x64xf32> to vector<32x64xf32>
    %152 = arith.addf %147, %151 : vector<32x64xf32>
    %cst_37 = arith.constant 0.000000e+00 : f32
    %153 = vector.broadcast %cst_37 : f32 to vector<32x64xf32>
    %154 = arith.maximumf %152, %153 : vector<32x64xf32>
    %155 = arith.truncf %154 : vector<32x64xf32> to vector<32x64xbf16>
    %c0_38 = arith.constant 0 : index
    %c0_39 = arith.constant 0 : index
    %156 = vector.load %arg11[%c0_38, %c0_39] : memref<64x32xbf16, #tpu.memory_space<vmem>>, vector<64x32xbf16>
    %cst_40 = arith.constant dense<0.000000e+00> : vector<32x32xf32>
    %157 = tpu.matmul %155, %156, %cst_40 {dimension_numbers = #tpu.dot_dimension_numbers<[1], [0], [0], [1], [0, 0, 1, 1], [], []>} : vector<32x64xbf16>, vector<64x32xbf16>, vector<32x32xf32> -> vector<32x32xf32>
    %c0_41 = arith.constant 0 : index
    %c0_42 = arith.constant 0 : index
    %158 = vector.load %arg12[%c0_41, %c0_42] : memref<1x32xf32, #tpu.memory_space<vmem>>, vector<1x32xf32>
    %159 = vector.shape_cast %158 : vector<1x32xf32> to vector<32xf32>
    %160 = vector.shape_cast %159 : vector<32xf32> to vector<1x32xf32>
    %161 = vector.broadcast %160 : vector<1x32xf32> to vector<32x32xf32>
    %162 = arith.addf %157, %161 : vector<32x32xf32>
    %163 = arith.addf %144, %162 : vector<32x32xf32>
    %164 = vector.shape_cast %163 : vector<32x32xf32> to vector<4x256xf32>
    %c0_43 = arith.constant 0 : index
    %c0_44 = arith.constant 0 : index
    %165 = vector.load %arg13[%c0_43, %c0_44] : memref<4x256xf32, #tpu.memory_space<vmem>>, vector<4x256xf32>
    tpu.vector_store %arg13[%c0_43, %c0_44], %164 {strides = array<i32>} : memref<4x256xf32, #tpu.memory_space<vmem>>, vector<4x256xf32>,
    return
  }
  func.func @transform_0(%arg0: i32) -> (i32, i32, i32) {
    %c0_i32 = arith.constant 0 : i32
    %c0_i32_0 = arith.constant 0 : i32
    %c0_i32_1 = arith.constant 0 : i32
    return %arg0, %c0_i32, %c0_i32_0 : i32, i32, i32
  }
  func.func @transform_1(%arg0: i32) -> (i32, i32) {
    %c0_i32 = arith.constant 0 : i32
    %c0_i32_0 = arith.constant 0 : i32
    %c0_i32_1 = arith.constant 0 : i32
    return %c0_i32, %c0_i32_0 : i32, i32
  }
  func.func @transform_2(%arg0: i32) -> (i32, i32) {
    %c0_i32 = arith.constant 0 : i32
    %c0_i32_0 = arith.constant 0 : i32
    %c0_i32_1 = arith.constant 0 : i32
    return %c0_i32, %c0_i32_0 : i32, i32
  }
  func.func @transform_3(%arg0: i32) -> (i32, i32) {
    %c0_i32 = arith.constant 0 : i32
    %c0_i32_0 = arith.constant 0 : i32
    %c0_i32_1 = arith.constant 0 : i32
    return %c0_i32, %c0_i32_0 : i32, i32
  }
  func.func @transform_4(%arg0: i32) -> (i32, i32) {
    %c0_i32 = arith.constant 0 : i32
    %c0_i32_0 = arith.constant 0 : i32
    %c0_i32_1 = arith.constant 0 : i32
    return %c0_i32, %c0_i32_0 : i32, i32
  }
  func.func @transform_5(%arg0: i32) -> (i32, i32) {
    %c0_i32 = arith.constant 0 : i32
    %c0_i32_0 = arith.constant 0 : i32
    %c0_i32_1 = arith.constant 0 : i32
    return %c0_i32, %c0_i32_0 : i32, i32
  }
  func.func @transform_6(%arg0: i32) -> (i32, i32) {
    %c0_i32 = arith.constant 0 : i32
    %c0_i32_0 = arith.constant 0 : i32
    %c0_i32_1 = arith.constant 0 : i32
    return %c0_i32, %c0_i32_0 : i32, i32
  }
  func.func @transform_7(%arg0: i32) -> (i32, i32) {
    %c0_i32 = arith.constant 0 : i32
    %c0_i32_0 = arith.constant 0 : i32
    %c0_i32_1 = arith.constant 0 : i32
    return %c0_i32, %c0_i32_0 : i32, i32
  }
  func.func @transform_8(%arg0: i32) -> (i32, i32) {
    %c0_i32 = arith.constant 0 : i32
    %c0_i32_0 = arith.constant 0 : i32
    %c0_i32_1 = arith.constant 0 : i32
    return %c0_i32, %c0_i32_0 : i32, i32
  }
  func.func @transform_9(%arg0: i32) -> (i32, i32) {
    %c0_i32 = arith.constant 0 : i32
    %c0_i32_0 = arith.constant 0 : i32
    %c0_i32_1 = arith.constant 0 : i32
    return %c0_i32, %c0_i32_0 : i32, i32
  }
  func.func @transform_10(%arg0: i32) -> (i32, i32) {
    %c0_i32 = arith.constant 0 : i32
    %c0_i32_0 = arith.constant 0 : i32
    %c0_i32_1 = arith.constant 0 : i32
    return %c0_i32, %c0_i32_0 : i32, i32
  }
  func.func @transform_11(%arg0: i32) -> (i32, i32) {
    %c0_i32 = arith.constant 0 : i32
    %c0_i32_0 = arith.constant 0 : i32
    %c0_i32_1 = arith.constant 0 : i32
    return %c0_i32, %c0_i32_0 : i32, i32
  }
  func.func @transform_12(%arg0: i32) -> (i32, i32) {
    %c0_i32 = arith.constant 0 : i32
    %c0_i32_0 = arith.constant 0 : i32
    return %arg0, %c0_i32 : i32, i32
  }
}

module attributes {stable_mosaic.version = 11 : i64} {
  func.func @_decoder_layer_kernel(%arg0: i32, %arg1: memref<4x8x32xf32, #tpu.memory_space<vmem>>, %arg2: memref<32x96xbf16, #tpu.memory_space<vmem>>, %arg3: memref<32x32xbf16, #tpu.memory_space<vmem>>, %arg4: memref<1x32xf32, #tpu.memory_space<vmem>>, %arg5: memref<1x32xf32, #tpu.memory_space<vmem>>, %arg6: memref<1x32xf32, #tpu.memory_space<vmem>>, %arg7: memref<1x32xf32, #tpu.memory_space<vmem>>, %arg8: memref<1x32xf32, #tpu.memory_space<vmem>>, %arg9: memref<32x64xbf16, #tpu.memory_space<vmem>>, %arg10: memref<1x64xf32, #tpu.memory_space<vmem>>, %arg11: memref<64x32xbf16, #tpu.memory_space<vmem>>, %arg12: memref<1x32xf32, #tpu.memory_space<vmem>>, %arg13: memref<4x8x32xf32, #tpu.memory_space<vmem>>) attributes {dimension_semantics = [#tpu.dimension_semantics<parallel>], iteration_bounds = array<i64: 1>, scalar_prefetch = 0 : i64, scratch_operands = 0 : i64, tpu.core_type = #tpu.core_type<tc>, window_params = [{transform_indices = @transform_0, window_bounds = array<i64: 4, 8, 32>}, {pipeline_mode = #tpu.pipeline_mode<synchronous>, transform_indices = @transform_1, window_bounds = array<i64: 32, 96>}, {pipeline_mode = #tpu.pipeline_mode<synchronous>, transform_indices = @transform_2, window_bounds = array<i64: 32, 32>}, {pipeline_mode = #tpu.pipeline_mode<synchronous>, transform_indices = @transform_3, window_bounds = array<i64: 1, 32>}, {pipeline_mode = #tpu.pipeline_mode<synchronous>, transform_indices = @transform_4, window_bounds = array<i64: 1, 32>}, {pipeline_mode = #tpu.pipeline_mode<synchronous>, transform_indices = @transform_5, window_bounds = array<i64: 1, 32>}, {pipeline_mode = #tpu.pipeline_mode<synchronous>, transform_indices = @transform_6, window_bounds = array<i64: 1, 32>}, {pipeline_mode = #tpu.pipeline_mode<synchronous>, transform_indices = @transform_7, window_bounds = array<i64: 1, 32>}, {pipeline_mode = #tpu.pipeline_mode<synchronous>, transform_indices = @transform_8, window_bounds = array<i64: 32, 64>}, {pipeline_mode = #tpu.pipeline_mode<synchronous>, transform_indices = @transform_9, window_bounds = array<i64: 1, 64>}, {pipeline_mode = #tpu.pipeline_mode<synchronous>, transform_indices = @transform_10, window_bounds = array<i64: 64, 32>}, {pipeline_mode = #tpu.pipeline_mode<synchronous>, transform_indices = @transform_11, window_bounds = array<i64: 1, 32>}, {transform_indices = @transform_12, window_bounds = array<i64: 4, 8, 32>}]} {
    %c0 = arith.constant 0 : index
    %c0_0 = arith.constant 0 : index
    %c0_1 = arith.constant 0 : index
    %0 = vector.load %arg1[%c0, %c0_0, %c0_1] : memref<4x8x32xf32, #tpu.memory_space<vmem>>, vector<4x8x32xf32>
    %1 = vector.shape_cast %0 : vector<4x8x32xf32> to vector<32x32xf32>
    %cst = arith.constant dense<0.000000e+00> : vector<32xf32>
    %2 = vector.multi_reduction <add>, %1, %cst [1] : vector<32x32xf32> to vector<32xf32>
    %3 = vector.shape_cast %2 : vector<32xf32> to vector<32x1xf32>
    %cst_2 = arith.constant 3.200000e+01 : f32
    %4 = vector.broadcast %cst_2 : f32 to vector<32x1xf32>
    %5 = arith.divf %3, %4 : vector<32x1xf32>
    %6 = vector.broadcast %5 : vector<32x1xf32> to vector<32x32xf32>
    %7 = arith.subf %1, %6 : vector<32x32xf32>
    %8 = arith.mulf %7, %7 : vector<32x32xf32>
    %cst_3 = arith.constant dense<0.000000e+00> : vector<32xf32>
    %9 = vector.multi_reduction <add>, %8, %cst_3 [1] : vector<32x32xf32> to vector<32xf32>
    %10 = vector.shape_cast %9 : vector<32xf32> to vector<32x1xf32>
    %cst_4 = arith.constant 3.200000e+01 : f32
    %11 = vector.broadcast %cst_4 : f32 to vector<32x1xf32>
    %12 = arith.divf %10, %11 : vector<32x1xf32>
    %13 = vector.broadcast %5 : vector<32x1xf32> to vector<32x32xf32>
    %14 = arith.subf %1, %13 : vector<32x32xf32>
    %cst_5 = arith.constant 9.99999974E-6 : f32
    %15 = vector.broadcast %cst_5 : f32 to vector<32x1xf32>
    %16 = arith.addf %12, %15 : vector<32x1xf32>
    %17 = math.rsqrt %16 : vector<32x1xf32>
    %18 = vector.broadcast %17 : vector<32x1xf32> to vector<32x32xf32>
    %19 = arith.mulf %14, %18 : vector<32x32xf32>
    %c0_6 = arith.constant 0 : index
    %c0_7 = arith.constant 0 : index
    %20 = vector.load %arg5[%c0_6, %c0_7] : memref<1x32xf32, #tpu.memory_space<vmem>>, vector<1x32xf32>
    %21 = vector.shape_cast %20 : vector<1x32xf32> to vector<32xf32>
    %22 = vector.shape_cast %21 : vector<32xf32> to vector<1x32xf32>
    %23 = vector.broadcast %22 : vector<1x32xf32> to vector<32x32xf32>
    %24 = arith.mulf %19, %23 : vector<32x32xf32>
    %c0_8 = arith.constant 0 : index
    %c0_9 = arith.constant 0 : index
    %25 = vector.load %arg6[%c0_8, %c0_9] : memref<1x32xf32, #tpu.memory_space<vmem>>, vector<1x32xf32>
    %26 = vector.shape_cast %25 : vector<1x32xf32> to vector<32xf32>
    %27 = vector.shape_cast %26 : vector<32xf32> to vector<1x32xf32>
    %28 = vector.broadcast %27 : vector<1x32xf32> to vector<32x32xf32>
    %29 = arith.addf %24, %28 : vector<32x32xf32>
    %30 = arith.truncf %29 : vector<32x32xf32> to vector<32x32xbf16>
    %c0_10 = arith.constant 0 : index
    %c0_11 = arith.constant 0 : index
    %31 = vector.load %arg2[%c0_10, %c0_11] : memref<32x96xbf16, #tpu.memory_space<vmem>>, vector<32x96xbf16>
    %cst_12 = arith.constant dense<0.000000e+00> : vector<32x96xf32>
    %32 = tpu.matmul %30, %31, %cst_12 {dimension_numbers = #tpu.dot_dimension_numbers<[1], [0], [0], [1], [0, 0, 1, 1], [], []>} : vector<32x32xbf16>, vector<32x96xbf16>, vector<32x96xf32> -> vector<32x96xf32>
    %33 = arith.truncf %32 : vector<32x96xf32> to vector<32x96xbf16>
    %34 = vector.extract_strided_slice %33 {offsets = [0, 0], sizes = [32, 8], strides = [1, 1]} : vector<32x96xbf16> to vector<32x8xbf16>
    %35 = vector.shape_cast %34 : vector<32x8xbf16> to vector<4x8x8xbf16>
    %36 = vector.extract_strided_slice %33 {offsets = [0, 8], sizes = [32, 8], strides = [1, 1]} : vector<32x96xbf16> to vector<32x8xbf16>
    %37 = vector.shape_cast %36 : vector<32x8xbf16> to vector<4x8x8xbf16>
    %38 = vector.extract_strided_slice %33 {offsets = [0, 16], sizes = [32, 8], strides = [1, 1]} : vector<32x96xbf16> to vector<32x8xbf16>
    %39 = vector.shape_cast %38 : vector<32x8xbf16> to vector<4x8x8xbf16>
    %40 = vector.extract_strided_slice %33 {offsets = [0, 24], sizes = [32, 8], strides = [1, 1]} : vector<32x96xbf16> to vector<32x8xbf16>
    %41 = vector.shape_cast %40 : vector<32x8xbf16> to vector<4x8x8xbf16>
    %42 = vector.shape_cast %35 : vector<4x8x8xbf16> to vector<4x1x8x8xbf16>
    %43 = vector.shape_cast %37 : vector<4x8x8xbf16> to vector<4x1x8x8xbf16>
    %44 = vector.shape_cast %39 : vector<4x8x8xbf16> to vector<4x1x8x8xbf16>
    %45 = vector.shape_cast %41 : vector<4x8x8xbf16> to vector<4x1x8x8xbf16>
    %46 = tpu.concatenate %42, %43, %44, %45 in 1 : vector<4x1x8x8xbf16>, vector<4x1x8x8xbf16>, vector<4x1x8x8xbf16>, vector<4x1x8x8xbf16> -> vector<4x4x8x8xbf16>
    %47 = vector.shape_cast %46 : vector<4x4x8x8xbf16> to vector<16x8x8xbf16>
    %48 = vector.extract_strided_slice %33 {offsets = [0, 32], sizes = [32, 8], strides = [1, 1]} : vector<32x96xbf16> to vector<32x8xbf16>
    %49 = vector.shape_cast %48 : vector<32x8xbf16> to vector<4x8x8xbf16>
    %50 = vector.extract_strided_slice %33 {offsets = [0, 40], sizes = [32, 8], strides = [1, 1]} : vector<32x96xbf16> to vector<32x8xbf16>
    %51 = vector.shape_cast %50 : vector<32x8xbf16> to vector<4x8x8xbf16>
    %52 = vector.extract_strided_slice %33 {offsets = [0, 48], sizes = [32, 8], strides = [1, 1]} : vector<32x96xbf16> to vector<32x8xbf16>
    %53 = vector.shape_cast %52 : vector<32x8xbf16> to vector<4x8x8xbf16>
    %54 = vector.extract_strided_slice %33 {offsets = [0, 56], sizes = [32, 8], strides = [1, 1]} : vector<32x96xbf16> to vector<32x8xbf16>
    %55 = vector.shape_cast %54 : vector<32x8xbf16> to vector<4x8x8xbf16>
    %56 = vector.shape_cast %49 : vector<4x8x8xbf16> to vector<4x1x8x8xbf16>
    %57 = vector.shape_cast %51 : vector<4x8x8xbf16> to vector<4x1x8x8xbf16>
    %58 = vector.shape_cast %53 : vector<4x8x8xbf16> to vector<4x1x8x8xbf16>
    %59 = vector.shape_cast %55 : vector<4x8x8xbf16> to vector<4x1x8x8xbf16>
    %60 = tpu.concatenate %56, %57, %58, %59 in 1 : vector<4x1x8x8xbf16>, vector<4x1x8x8xbf16>, vector<4x1x8x8xbf16>, vector<4x1x8x8xbf16> -> vector<4x4x8x8xbf16>
    %61 = vector.shape_cast %60 : vector<4x4x8x8xbf16> to vector<16x8x8xbf16>
    %62 = vector.extract_strided_slice %33 {offsets = [0, 64], sizes = [32, 8], strides = [1, 1]} : vector<32x96xbf16> to vector<32x8xbf16>
    %63 = vector.shape_cast %62 : vector<32x8xbf16> to vector<4x8x8xbf16>
    %64 = vector.extract_strided_slice %33 {offsets = [0, 72], sizes = [32, 8], strides = [1, 1]} : vector<32x96xbf16> to vector<32x8xbf16>
    %65 = vector.shape_cast %64 : vector<32x8xbf16> to vector<4x8x8xbf16>
    %66 = vector.extract_strided_slice %33 {offsets = [0, 80], sizes = [32, 8], strides = [1, 1]} : vector<32x96xbf16> to vector<32x8xbf16>
    %67 = vector.shape_cast %66 : vector<32x8xbf16> to vector<4x8x8xbf16>
    %68 = vector.extract_strided_slice %33 {offsets = [0, 88], sizes = [32, 8], strides = [1, 1]} : vector<32x96xbf16> to vector<32x8xbf16>
    %69 = vector.shape_cast %68 : vector<32x8xbf16> to vector<4x8x8xbf16>
    %70 = vector.shape_cast %63 : vector<4x8x8xbf16> to vector<4x1x8x8xbf16>
    %71 = vector.shape_cast %65 : vector<4x8x8xbf16> to vector<4x1x8x8xbf16>
    %72 = vector.shape_cast %67 : vector<4x8x8xbf16> to vector<4x1x8x8xbf16>
    %73 = vector.shape_cast %69 : vector<4x8x8xbf16> to vector<4x1x8x8xbf16>
    %74 = tpu.concatenate %70, %71, %72, %73 in 1 : vector<4x1x8x8xbf16>, vector<4x1x8x8xbf16>, vector<4x1x8x8xbf16>, vector<4x1x8x8xbf16> -> vector<4x4x8x8xbf16>
    %75 = vector.shape_cast %74 : vector<4x4x8x8xbf16> to vector<16x8x8xbf16>
    "tpu.trace_start"() <{level = 10 : i32, message = "ztd,zsd->zts"}> : () -> ()
    %cst_13 = arith.constant dense<0.000000e+00> : vector<16x8x8xf32>
    %76 = tpu.matmul %47, %61, %cst_13 {dimension_numbers = #tpu.dot_dimension_numbers<[2], [2], [1], [1], [0, 0, 0, 1, 1, 1], [0], [0]>} : vector<16x8x8xbf16>, vector<16x8x8xbf16>, vector<16x8x8xf32> -> vector<16x8x8xf32>
    "tpu.trace_stop"() : () -> ()
    %77 = tpu.iota {dimensions = array<i32: 0>} : vector<8x8xi32>
    %78 = tpu.iota {dimensions = array<i32: 1>} : vector<8x8xi32>
    %79 = arith.cmpi sge, %77, %78 : vector<8x8xi32>
    %80 = vector.shape_cast %79 : vector<8x8xi1> to vector<1x8x8xi1>
    %cst_14 = arith.constant 0xFF800000 : f32
    %81 = vector.shape_cast %80 : vector<1x8x8xi1> to vector<1x8x8xi1>
    %82 = vector.broadcast %81 : vector<1x8x8xi1> to vector<16x8x8xi1>
    %83 = vector.broadcast %cst_14 : f32 to vector<16x8x8xf32>
    %84 = arith.select %82, %76, %83 : vector<16x8x8xi1>, vector<16x8x8xf32>
    %cst_15 = arith.constant dense<0xFF800000> : vector<16x8xf32>
    %85 = vector.multi_reduction <maximumf>, %84, %cst_15 [2] : vector<16x8x8xf32> to vector<16x8xf32>
    %86 = vector.shape_cast %85 : vector<16x8xf32> to vector<16x8x1xf32>
    %87 = vector.broadcast %86 : vector<16x8x1xf32> to vector<16x8x8xf32>
    %88 = arith.subf %84, %87 : vector<16x8x8xf32>
    %89 = math.exp %88 : vector<16x8x8xf32>
    %cst_16 = arith.constant dense<0.000000e+00> : vector<16x8xf32>
    %90 = vector.multi_reduction <add>, %89, %cst_16 [2] : vector<16x8x8xf32> to vector<16x8xf32>
    %91 = vector.shape_cast %90 : vector<16x8xf32> to vector<16x8x1xf32>
    %92 = tpu.reciprocal %91 {approx = true} : vector<16x8x1xf32> -> vector<16x8x1xf32>
    %93 = vector.broadcast %92 : vector<16x8x1xf32> to vector<16x8x8xf32>
    %94 = arith.mulf %89, %93 : vector<16x8x8xf32>
    %95 = arith.truncf %94 : vector<16x8x8xf32> to vector<16x8x8xbf16>
    "tpu.trace_start"() <{level = 10 : i32, message = "zts,zsd->ztd"}> : () -> ()
    %cst_17 = arith.constant dense<0.000000e+00> : vector<16x8x8xf32>
    %96 = tpu.matmul %95, %75, %cst_17 {dimension_numbers = #tpu.dot_dimension_numbers<[2], [1], [1], [2], [0, 0, 0, 1, 1, 2], [0], [0]>} : vector<16x8x8xbf16>, vector<16x8x8xbf16>, vector<16x8x8xf32> -> vector<16x8x8xf32>
    "tpu.trace_stop"() : () -> ()
    %97 = vector.shape_cast %96 : vector<16x8x8xf32> to vector<4x4x8x8xf32>
    %98 = vector.extract_strided_slice %97 {offsets = [0, 0, 0, 0], sizes = [4, 1, 8, 8], strides = [1, 1, 1, 1]} : vector<4x4x8x8xf32> to vector<4x1x8x8xf32>
    %99 = vector.shape_cast %98 : vector<4x1x8x8xf32> to vector<4x8x8xf32>
    %100 = vector.extract_strided_slice %97 {offsets = [0, 1, 0, 0], sizes = [4, 1, 8, 8], strides = [1, 1, 1, 1]} : vector<4x4x8x8xf32> to vector<4x1x8x8xf32>
    %101 = vector.shape_cast %100 : vector<4x1x8x8xf32> to vector<4x8x8xf32>
    %102 = vector.extract_strided_slice %97 {offsets = [0, 2, 0, 0], sizes = [4, 1, 8, 8], strides = [1, 1, 1, 1]} : vector<4x4x8x8xf32> to vector<4x1x8x8xf32>
    %103 = vector.shape_cast %102 : vector<4x1x8x8xf32> to vector<4x8x8xf32>
    %104 = vector.extract_strided_slice %97 {offsets = [0, 3, 0, 0], sizes = [4, 1, 8, 8], strides = [1, 1, 1, 1]} : vector<4x4x8x8xf32> to vector<4x1x8x8xf32>
    %105 = vector.shape_cast %104 : vector<4x1x8x8xf32> to vector<4x8x8xf32>
    %106 = tpu.concatenate %99, %101, %103, %105 in 2 : vector<4x8x8xf32>, vector<4x8x8xf32>, vector<4x8x8xf32>, vector<4x8x8xf32> -> vector<4x8x32xf32>
    %107 = vector.shape_cast %106 : vector<4x8x32xf32> to vector<32x32xf32>
    %108 = arith.truncf %107 : vector<32x32xf32> to vector<32x32xbf16>
    %c0_18 = arith.constant 0 : index
    %c0_19 = arith.constant 0 : index
    %109 = vector.load %arg3[%c0_18, %c0_19] : memref<32x32xbf16, #tpu.memory_space<vmem>>, vector<32x32xbf16>
    %cst_20 = arith.constant dense<0.000000e+00> : vector<32x32xf32>
    %110 = tpu.matmul %108, %109, %cst_20 {dimension_numbers = #tpu.dot_dimension_numbers<[1], [0], [0], [1], [0, 0, 1, 1], [], []>} : vector<32x32xbf16>, vector<32x32xbf16>, vector<32x32xf32> -> vector<32x32xf32>
    %c0_21 = arith.constant 0 : index
    %c0_22 = arith.constant 0 : index
    %111 = vector.load %arg4[%c0_21, %c0_22] : memref<1x32xf32, #tpu.memory_space<vmem>>, vector<1x32xf32>
    %112 = vector.shape_cast %111 : vector<1x32xf32> to vector<32xf32>
    %113 = vector.shape_cast %112 : vector<32xf32> to vector<1x32xf32>
    %114 = vector.broadcast %113 : vector<1x32xf32> to vector<32x32xf32>
    %115 = arith.addf %110, %114 : vector<32x32xf32>
    %116 = arith.addf %29, %115 : vector<32x32xf32>
    %cst_23 = arith.constant dense<0.000000e+00> : vector<32xf32>
    %117 = vector.multi_reduction <add>, %116, %cst_23 [1] : vector<32x32xf32> to vector<32xf32>
    %118 = vector.shape_cast %117 : vector<32xf32> to vector<32x1xf32>
    %cst_24 = arith.constant 3.200000e+01 : f32
    %119 = vector.broadcast %cst_24 : f32 to vector<32x1xf32>
    %120 = arith.divf %118, %119 : vector<32x1xf32>
    %121 = vector.broadcast %120 : vector<32x1xf32> to vector<32x32xf32>
    %122 = arith.subf %116, %121 : vector<32x32xf32>
    %123 = arith.mulf %122, %122 : vector<32x32xf32>
    %cst_25 = arith.constant dense<0.000000e+00> : vector<32xf32>
    %124 = vector.multi_reduction <add>, %123, %cst_25 [1] : vector<32x32xf32> to vector<32xf32>
    %125 = vector.shape_cast %124 : vector<32xf32> to vector<32x1xf32>
    %cst_26 = arith.constant 3.200000e+01 : f32
    %126 = vector.broadcast %cst_26 : f32 to vector<32x1xf32>
    %127 = arith.divf %125, %126 : vector<32x1xf32>
    %128 = vector.broadcast %120 : vector<32x1xf32> to vector<32x32xf32>
    %129 = arith.subf %116, %128 : vector<32x32xf32>
    %cst_27 = arith.constant 9.99999974E-6 : f32
    %130 = vector.broadcast %cst_27 : f32 to vector<32x1xf32>
    %131 = arith.addf %127, %130 : vector<32x1xf32>
    %132 = math.rsqrt %131 : vector<32x1xf32>
    %133 = vector.broadcast %132 : vector<32x1xf32> to vector<32x32xf32>
    %134 = arith.mulf %129, %133 : vector<32x32xf32>
    %c0_28 = arith.constant 0 : index
    %c0_29 = arith.constant 0 : index
    %135 = vector.load %arg7[%c0_28, %c0_29] : memref<1x32xf32, #tpu.memory_space<vmem>>, vector<1x32xf32>
    %136 = vector.shape_cast %135 : vector<1x32xf32> to vector<32xf32>
    %137 = vector.shape_cast %136 : vector<32xf32> to vector<1x32xf32>
    %138 = vector.broadcast %137 : vector<1x32xf32> to vector<32x32xf32>
    %139 = arith.mulf %134, %138 : vector<32x32xf32>
    %c0_30 = arith.constant 0 : index
    %c0_31 = arith.constant 0 : index
    %140 = vector.load %arg8[%c0_30, %c0_31] : memref<1x32xf32, #tpu.memory_space<vmem>>, vector<1x32xf32>
    %141 = vector.shape_cast %140 : vector<1x32xf32> to vector<32xf32>
    %142 = vector.shape_cast %141 : vector<32xf32> to vector<1x32xf32>
    %143 = vector.broadcast %142 : vector<1x32xf32> to vector<32x32xf32>
    %144 = arith.addf %139, %143 : vector<32x32xf32>
    %145 = arith.truncf %144 : vector<32x32xf32> to vector<32x32xbf16>
    %c0_32 = arith.constant 0 : index
    %c0_33 = arith.constant 0 : index
    %146 = vector.load %arg9[%c0_32, %c0_33] : memref<32x64xbf16, #tpu.memory_space<vmem>>, vector<32x64xbf16>
    %cst_34 = arith.constant dense<0.000000e+00> : vector<32x64xf32>
    %147 = tpu.matmul %145, %146, %cst_34 {dimension_numbers = #tpu.dot_dimension_numbers<[1], [0], [0], [1], [0, 0, 1, 1], [], []>} : vector<32x32xbf16>, vector<32x64xbf16>, vector<32x64xf32> -> vector<32x64xf32>
    %c0_35 = arith.constant 0 : index
    %c0_36 = arith.constant 0 : index
    %148 = vector.load %arg10[%c0_35, %c0_36] : memref<1x64xf32, #tpu.memory_space<vmem>>, vector<1x64xf32>
    %149 = vector.shape_cast %148 : vector<1x64xf32> to vector<64xf32>
    %150 = vector.shape_cast %149 : vector<64xf32> to vector<1x64xf32>
    %151 = vector.broadcast %150 : vector<1x64xf32> to vector<32x64xf32>
    %152 = arith.addf %147, %151 : vector<32x64xf32>
    %cst_37 = arith.constant 0.000000e+00 : f32
    %153 = vector.broadcast %cst_37 : f32 to vector<32x64xf32>
    %154 = arith.maximumf %152, %153 : vector<32x64xf32>
    %155 = arith.truncf %154 : vector<32x64xf32> to vector<32x64xbf16>
    %c0_38 = arith.constant 0 : index
    %c0_39 = arith.constant 0 : index
    %156 = vector.load %arg11[%c0_38, %c0_39] : memref<64x32xbf16, #tpu.memory_space<vmem>>, vector<64x32xbf16>
    %cst_40 = arith.constant dense<0.000000e+00> : vector<32x32xf32>
    %157 = tpu.matmul %155, %156, %cst_40 {dimension_numbers = #tpu.dot_dimension_numbers<[1], [0], [0], [1], [0, 0, 1, 1], [], []>} : vector<32x64xbf16>, vector<64x32xbf16>, vector<32x32xf32> -> vector<32x32xf32>
    %c0_41 = arith.constant 0 : index
    %c0_42 = arith.constant 0 : index
    %158 = vector.load %arg12[%c0_41, %c0_42] : memref<1x32xf32, #tpu.memory_space<vmem>>, vector<1x32xf32>
    %159 = vector.shape_cast %158 : vector<1x32xf32> to vector<32xf32>
    %160 = vector.shape_cast %159 : vector<32xf32> to vector<1x32xf32>
    %161 = vector.broadcast %160 : vector<1x32xf32> to vector<32x32xf32>
    %162 = arith.addf %157, %161 : vector<32x32xf32>
    %163 = arith.addf %144, %162 : vector<32x32xf32>
    %164 = vector.shape_cast %163 : vector<32x32xf32> to vector<4x8x32xf32>
    %c0_43 = arith.constant 0 : index
    %c0_44 = arith.constant 0 : index
    %c0_45 = arith.constant 0 : index
    %165 = vector.load %arg13[%c0_43, %c0_44, %c0_45] : memref<4x8x32xf32, #tpu.memory_space<vmem>>, vector<4x8x32xf32>
    tpu.vector_store %arg13[%c0_43, %c0_44, %c0_45], %164 {strides = array<i32>} : memref<4x8x32xf32, #tpu.memory_space<vmem>>, vector<4x8x32xf32>,
    return
  }
  func.func @transform_0(%arg0: i32) -> (i32, i32, i32) {
    %c0_i32 = arith.constant 0 : i32
    %c0_i32_0 = arith.constant 0 : i32
    %c0_i32_1 = arith.constant 0 : i32
    return %arg0, %c0_i32, %c0_i32_0 : i32, i32, i32
  }
  func.func @transform_1(%arg0: i32) -> (i32, i32) {
    %c0_i32 = arith.constant 0 : i32
    %c0_i32_0 = arith.constant 0 : i32
    %c0_i32_1 = arith.constant 0 : i32
    return %c0_i32, %c0_i32_0 : i32, i32
  }
  func.func @transform_2(%arg0: i32) -> (i32, i32) {
    %c0_i32 = arith.constant 0 : i32
    %c0_i32_0 = arith.constant 0 : i32
    %c0_i32_1 = arith.constant 0 : i32
    return %c0_i32, %c0_i32_0 : i32, i32
  }
  func.func @transform_3(%arg0: i32) -> (i32, i32) {
    %c0_i32 = arith.constant 0 : i32
    %c0_i32_0 = arith.constant 0 : i32
    %c0_i32_1 = arith.constant 0 : i32
    return %c0_i32, %c0_i32_0 : i32, i32
  }
  func.func @transform_4(%arg0: i32) -> (i32, i32) {
    %c0_i32 = arith.constant 0 : i32
    %c0_i32_0 = arith.constant 0 : i32
    %c0_i32_1 = arith.constant 0 : i32
    return %c0_i32, %c0_i32_0 : i32, i32
  }
  func.func @transform_5(%arg0: i32) -> (i32, i32) {
    %c0_i32 = arith.constant 0 : i32
    %c0_i32_0 = arith.constant 0 : i32
    %c0_i32_1 = arith.constant 0 : i32
    return %c0_i32, %c0_i32_0 : i32, i32
  }
  func.func @transform_6(%arg0: i32) -> (i32, i32) {
    %c0_i32 = arith.constant 0 : i32
    %c0_i32_0 = arith.constant 0 : i32
    %c0_i32_1 = arith.constant 0 : i32
    return %c0_i32, %c0_i32_0 : i32, i32
  }
  func.func @transform_7(%arg0: i32) -> (i32, i32) {
    %c0_i32 = arith.constant 0 : i32
    %c0_i32_0 = arith.constant 0 : i32
    %c0_i32_1 = arith.constant 0 : i32
    return %c0_i32, %c0_i32_0 : i32, i32
  }
  func.func @transform_8(%arg0: i32) -> (i32, i32) {
    %c0_i32 = arith.constant 0 : i32
    %c0_i32_0 = arith.constant 0 : i32
    %c0_i32_1 = arith.constant 0 : i32
    return %c0_i32, %c0_i32_0 : i32, i32
  }
  func.func @transform_9(%arg0: i32) -> (i32, i32) {
    %c0_i32 = arith.constant 0 : i32
    %c0_i32_0 = arith.constant 0 : i32
    %c0_i32_1 = arith.constant 0 : i32
    return %c0_i32, %c0_i32_0 : i32, i32
  }
  func.func @transform_10(%arg0: i32) -> (i32, i32) {
    %c0_i32 = arith.constant 0 : i32
    %c0_i32_0 = arith.constant 0 : i32
    %c0_i32_1 = arith.constant 0 : i32
    return %c0_i32, %c0_i32_0 : i32, i32
  }
  func.func @transform_11(%arg0: i32) -> (i32, i32) {
    %c0_i32 = arith.constant 0 : i32
    %c0_i32_0 = arith.constant 0 : i32
    %c0_i32_1 = arith.constant 0 : i32
    return %c0_i32, %c0_i32_0 : i32, i32
  }
  func.func @transform_12(%arg0: i32) -> (i32, i32, i32) {
    %c0_i32 = arith.constant 0 : i32
    %c0_i32_0 = arith.constant 0 : i32
    %c0_i32_1 = arith.constant 0 : i32
    return %arg0, %c0_i32, %c0_i32_0 : i32, i32, i32
  }
}

</mosaic_0001>

<bundles_post_ra>
// kernel: tpu_custom_call.1
= control target key start
LH: loop header
LB: loop body
LE: loop exit
PB: predicated region body
PF: predicated region fallthrough
CT: control target
= control target key end

     0   :  { %17 = vsyncpa [#allocation3], 0  ;;  %s3940_s0 = inlined_call_operand.vmem [shape: f32[4,8,32], index: 0, kind: input, shape index: {}]   ;;  %s3941_s1 = inlined_call_operand.vmem [shape: bf16[32,96], index: 1, kind: input, shape index: {}]   ;;  %s3942_s2 = inlined_call_operand.hbm [shape: bf16[32,32], index: 2, kind: input, shape index: {}]   ;;  %s3943_s3 = inlined_call_operand.vmem [shape: f32[1,32], index: 3, kind: input, shape index: {}]   ;;  %s3944_s4 = inlined_call_operand.vmem [shape: f32[1,32], index: 4, kind: input, shape index: {}]   ;;  %s3945_s5 = inlined_call_operand.hbm [shape: f32[1,32], index: 5, kind: input, shape index: {}]   ;;  %s3946_s6 = inlined_call_operand.hbm [shape: f32[1,32], index: 6, kind: input, shape index: {}]   ;;  %s3947_s7 = inlined_call_operand.hbm [shape: f32[1,32], index: 7, kind: input, shape index: {}]   ;;  %s3948_s8 = inlined_call_operand.hbm [shape: bf16[32,64], index: 8, kind: input, shape index: {}]   ;;  %s3949_s9 = inlined_call_operand.hbm [shape: f32[1,64], index: 9, kind: input, shape index: {}]   ;;  %s3950_s10 = inlined_call_operand.vmem [shape: bf16[64,32], index: 10, kind: input, shape index: {}]   ;;  %s3951_s11 = inlined_call_operand.vmem [shape: f32[1,32], index: 11, kind: input, shape index: {}]   ;;  %s3952_s12 = inlined_call_operand.hbm [shape: f32[4,8,32], index: 12, kind: output, shape index: {}]  }
   0x1   :  { %18 = vsyncpa [#allocation6], 0 }
   0x2   :  { %19 = vsyncpa [#allocation9], 0 }
   0x3   :  { %20 = vsyncpa [#allocation12], 0 }
   0x4   :  { %21 = vsyncpa [#allocation4], 0  ;;  %s3188_s21 = smov [#allocation5]   ;;  %s3189_s23 = smov [#allocation8]  }
   0x5   :  { %s48_s22 = sshll.u32 %s3188_s21, 4  ;;  %s68_s24 = sshll.u32 %s3189_s23, 4  ;;  %s49_s22 = int_to_ptr.vmem [resolvable:$true] %s48_s22  ;;  %s69_s24 = int_to_ptr.vmem [resolvable:$true] %s68_s24 }
   0x6   :  { %s3046_s25 = scalar_lea.vmem %s49_s22, 16  ;;  %s3050_s26 = scalar_lea.vmem %s49_s22, 32 }
   0x7   :  { %p3047_p0 = scmp.ne.s32.totalorder %s49_s22, %s3046_s25  ;;  %p3051_p1 = scmp.lt.s32.totalorder %s49_s22, %s49_s22 }
   0x8   :  { %p3052_p2 = scmp.lt.s32.totalorder %s3050_s26, %s3046_s25 }
   0xa   :  { %p3053_p3 = por %p3052_p2, %p3051_p1 }
   0xc   :  { %p3054_p4 = pnand %p3053_p3, %p3047_p0 }
   0xe   :  { %3057 = shalt.err (!%p3054_p4)
}
   0xf   :  { %51 = dma.hbm_to_vmem [thread:$0]  %s3945_s5, 16, %s49_s22, [#allocation6]  }
  0x10   :  { %s3066_s29 = scalar_lea.vmem %s69_s24, 16  ;;  %s3070_s30 = scalar_lea.vmem %s69_s24, 32 }
  0x11   :  { %p3067_p5 = scmp.ne.s32.totalorder %s69_s24, %s3066_s29  ;;  %p3071_p6 = scmp.lt.s32.totalorder %s69_s24, %s69_s24 }
  0x12   :  { %p3072_p7 = scmp.lt.s32.totalorder %s3070_s30, %s3066_s29 }
  0x14   :  { %p3073_p8 = por %p3072_p7, %p3071_p6 }
  0x16   :  { %p3074_p9 = pnand %p3073_p8, %p3067_p5 }
  0x18   :  { %3077 = shalt.err (!%p3074_p9)
}
  0x19   :  { %71 = dma.hbm_to_vmem [thread:$0]  %s3947_s7, 16, %s69_s24, [#allocation9]  }
  0x1a   :  { %s3190_s15 = smov [#allocation2]  }
  0x1b   :  { %s31_s16 = sshll.u32 %s3190_s15, 4  ;;  %s32_s16 = int_to_ptr.vmem [resolvable:$true] %s31_s16 }
  0x1c   :  { %s3086_s17 = scalar_lea.vmem %s32_s16, 256  ;;  %p3091_p11 = scmp.lt.s32.totalorder %s32_s16, %s32_s16 }
  0x1d   :  { %p3087_p10 = scmp.ne.s32.totalorder %s32_s16, %s3086_s17  ;;  %p3092_p12 = scmp.lt.s32.totalorder %s3086_s17, %s3086_s17 }
  0x1f   :  { %p3093_p13 = por %p3092_p12, %p3091_p11 }
  0x21   :  { %p3094_p0 = pnand %p3093_p13, %p3087_p10 }
  0x23   :  { %3097 = shalt.err (!%p3094_p0)
}
  0x24   :  { %s3191_s5 = smov 64   ;;  %s3192_s18 = smov 4  }
  0x25   :  { %37 = dma.hbm_to_vmem [thread:$0]  %s3942_s2, 256, %s32_s16, [#allocation3], %s3191_s5, %s3191_s5, %s3192_s18  }
  0x26   :  { %s3193_s21 = smov [#allocation7]   ;;  %s3194_s22 = smov [#allocation10]  }
  0x27   :  { %s58_s7 = sshll.u32 %s3193_s21, 4  ;;  %s77_s23 = sshll.u32 %s3194_s22, 4  ;;  %s59_s7 = int_to_ptr.vmem [resolvable:$true] %s58_s7  ;;  %s78_s23 = int_to_ptr.vmem [resolvable:$true] %s77_s23 }
  0x28   :  { %s3106_s24 = scalar_lea.vmem %s59_s7, 16  ;;  %s3110_s25 = scalar_lea.vmem %s59_s7, 32 }
  0x29   :  { %p3107_p1 = scmp.ne.s32.totalorder %s59_s7, %s3106_s24  ;;  %p3111_p2 = scmp.lt.s32.totalorder %s59_s7, %s59_s7 }
  0x2a   :  { %p3112_p3 = scmp.lt.s32.totalorder %s3110_s25, %s3106_s24 }
  0x2c   :  { %p3113_p4 = por %p3112_p3, %p3111_p2 }
  0x2e   :  { %p3114_p5 = pnand %p3113_p4, %p3107_p1 }
  0x30   :  { %3117 = shalt.err (!%p3114_p5)
}
  0x31   :  { %61 = dma.hbm_to_vmem [thread:$0]  %s3946_s6, 16, %s59_s7, [#allocation6]  }
  0x32   :  { %s3126_s28 = scalar_lea.vmem %s78_s23, 256  ;;  %p3131_p7 = scmp.lt.s32.totalorder %s78_s23, %s78_s23 }
  0x33   :  { %p3127_p6 = scmp.ne.s32.totalorder %s78_s23, %s3126_s28  ;;  %p3132_p8 = scmp.lt.s32.totalorder %s3126_s28, %s3126_s28 }
  0x35   :  { %p3133_p9 = por %p3132_p8, %p3131_p7 }
  0x37   :  { %p3134_p10 = pnand %p3133_p9, %p3127_p6 }
  0x39   :  { %3137 = shalt.err (!%p3134_p10)
}
  0x3a   :  { %83 = dma.hbm_to_vmem [thread:$0]  %s3948_s8, 256, %s78_s23, [#allocation9], %s3191_s5, %s3191_s5, %s3192_s18  }
  0x3b   :  { %s3195_s30 = smov [#allocation11]  }
  0x3c   :  { %s90_s13 = sshll.u32 %s3195_s30, 4  ;;  %s91_s13 = int_to_ptr.vmem [resolvable:$true] %s90_s13 }
  0x3d   :  { %s3146_s14 = scalar_lea.vmem %s91_s13, 16  ;;  %s3150_s6 = scalar_lea.vmem %s91_s13, 32 }
  0x3e   :  { %p3147_p11 = scmp.ne.s32.totalorder %s91_s13, %s3146_s14  ;;  %p3151_p12 = scmp.lt.s32.totalorder %s91_s13, %s91_s13 }
  0x3f   :  { %p3152_p13 = scmp.lt.s32.totalorder %s3150_s6, %s3146_s14 }
  0x41   :  { %p3153_p0 = por %p3152_p13, %p3151_p12 }
  0x43   :  { %p3154_p1 = pnand %p3153_p0, %p3147_p11 }
  0x45   :  { %3157 = shalt.err (!%p3154_p1)
}
  0x46   :  { %93 = dma.hbm_to_vmem [thread:$0]  %s3949_s9, 16, %s91_s13, [#allocation12]  }
  0x47   :  { %3178 = dma.done.wait [#allocation3], 256  }
  0x48   :  { %3179 = vsyncadd [#allocation3], 4294967040 }
  0x49   :  { %3180 = dma.done.wait [#allocation6], 32  }
  0x4a   :  { %3181 = vsyncadd [#allocation6], 4294967264 }
  0x4b   :  { %3182 = dma.done.wait [#allocation9], 272  }
  0x4c   :  { %3183 = vsyncadd [#allocation9], 4294967024 }
  0x4d   :  { %3184 = dma.done.wait [#allocation12], 16  }
  0x4e   :  { %3185 = vsyncadd [#allocation12], 4294967280  ;;  %vm121_vm0 = vcmask 261120   ;;  %v117_v0 = vld [vmem:[%s3940_s0] sm:$0xff]  ;;  %v119_v1 = vld [vmem:[%s3940_s0 + $0x10] sm:$0xff]  ;;  %s3197_s26 = smov 120  }
  0x4f   :  { %v118_v2 = vld [vmem:[%s3940_s0 + $0x8] sm:$0xff]  ;;  %v122_v3 = vsel %vm121_vm0, %v117_v0, 0.0  ;;  %v128_v4 = vsel %vm121_vm0, %v119_v1, 0.0  ;;  %v120_v5 = vld [vmem:[%s3940_s0 + $0x18] sm:$0xff]  ;;  %v2949_v29 = vld [vmem:[%s3941_s1] sm:$0xff]   ;;  %s3198_s27 = smov 104  }
  0x50   :  { %123 = vadd.xlane.f32.xlu0 %v122_v3  ;;  %129 = vadd.xlane.f32.xlu1 %v128_v4  ;;  %v125_v6 = vsel %vm121_vm0, %v118_v2, 0.0  ;;  %v131_v7 = vsel %vm121_vm0, %v120_v5, 0.0  ;;  %v2948_v28 = vld [vmem:[%s3941_s1 + $0x8] sm:$0xff]   ;;  %v2512_v44 = vld [vmem:[%s3944_s4] ss:$0 sm:$0xff]  ;;  %s3196_s4 = smov 112  }
  0x51   :  { %2671 = vmatprep.subr.bf16.mxu0 %v2948_v28  ;;  %v2513_v49 = vld [vmem:[#allocation5] ss:$0 sm:$0xff]  ;;  %vm3200_vm1 = vmmov 0   ;;  %s3201_s28 = smov 96   ;;  %vm308_vm2 = vcmask 64512   ;;  %vm1319_vm3 = vcmask 1043456  }
  0x52   :  { %2672 = vmatpush3.bf16.msra.mxu0 %v2948_v28  ;;  %s3203_s2 = smov 16   ;;  %s3204_s29 = smov 24   ;;  %vm2135_vm5 = vcmask 130048   ;;  %vm2140_vm6 = vcmask 195584   ;;  %vm2428_vm7 = vcmask 523264  }
  0x53   :  { %2673 = vmatprep.subr.bf16.mxu0 %v2949_v29  ;;  %s3205_s20 = smov [#allocation13]  }
  0x54   :  { %126 = vadd.xlane.f32.xlu0 %v125_v6  ;;  %132 = vadd.xlane.f32.xlu1 %v131_v7  ;;  %s2497_s21 = sshll.u32 %s3205_s20, 4  ;;  %s2498_s21 = int_to_ptr.vmem [resolvable:$true] %s2497_s21 }
  0x55   :  { %p3163_p3 = scmp.lt.s32.totalorder %s2498_s21, %s2498_s21 }
  0x56   :  { %2674 = vmatpush3.bf16.msra.mxu0 %v2949_v29 }
  0xd9   :  { %v124_v8 = vpop.xlane.xlu0 %123  ;;  %v130_v9 = vpop.xlane.xlu1 %129 }
  0xda   :  { %v135_v10 = vmul.f32 0.03125, %v124_v8  ;;  %v137_v11 = vmul.f32 0.03125, %v130_v9 }
  0xdc   :  { %v139_v12 = vsub.f32 %v117_v0, %v135_v10  ;;  %v141_v13 = vsub.f32 %v119_v1, %v137_v11 }
  0xdd   :  { %v127_v14 = vpop.xlane.xlu0 %126  ;;  %v133_v15 = vpop.xlane.xlu1 %132 }
  0xde   :  { %v136_v16 = vmul.f32 0.03125, %v127_v14  ;;  %v138_v17 = vmul.f32 0.03125, %v133_v15  ;;  %v143_v18 = vmul.f32 %v139_v12, %v139_v12  ;;  %v145_v19 = vmul.f32 %v141_v13, %v141_v13 }
  0xe0   :  { %v140_v20 = vsub.f32 %v118_v2, %v136_v16  ;;  %v142_v21 = vsub.f32 %v120_v5, %v138_v17  ;;  %v147_v22 = vsel %vm121_vm0, %v143_v18, 0.0  ;;  %v153_v23 = vsel %vm121_vm0, %v145_v19, 0.0 }
  0xe1   :  { %148 = vadd.xlane.f32.xlu0 %v147_v22  ;;  %v3199_v5 = vmov 0.0  }
  0xe2   :  { %v144_v24 = vmul.f32 %v140_v20, %v140_v20  ;;  %v146_v25 = vmul.f32 %v142_v21, %v142_v21  ;;  %2679 = vmatprep.subr.bf16.mxu1 %v3199_v5  ;;  %2685 = vmatprep.subr.bf16.mxu0 %v3199_v5 }
  0xe3   :  { %2681 = vmatprep.mubr.msk.bf16.mxu1 %vm3200_vm1, %v3199_v5 }
  0xe4   :  { %v150_v26 = vsel %vm121_vm0, %v144_v24, 0.0  ;;  %v156_v27 = vsel %vm121_vm0, %v146_v25, 0.0 }
  0xe5   :  { %154 = vadd.xlane.f32.xlu0 %v153_v23  ;;  %151 = vadd.xlane.f32.xlu1 %v150_v26 }
  0xe9   :  { %157 = vadd.xlane.f32.xlu1 %v156_v27 }
 0x16a   :  { %v149_v30 = vpop.xlane.xlu0 %148 }
 0x16b   :  { %v159_v31 = vmul.f32 0.03125, %v149_v30 }
 0x16d   :  { %v163_v32 = vadd.f32 1e-05, %v159_v31 }
 0x16e   :  { %v152_v33 = vpop.xlane.xlu1 %151  ;;  %v155_v34 = vpop.xlane.xlu0 %154 }
 0x16f   :  { %2958 = vrsqrt.f32 %v163_v32  ;;  %v160_v35 = vmul.f32 0.03125, %v152_v33  ;;  %v161_v36 = vmul.f32 0.03125, %v155_v34 }
 0x171   :  { %v164_v37 = vadd.f32 1e-05, %v160_v35  ;;  %v165_v38 = vadd.f32 1e-05, %v161_v36 }
 0x172   :  { %v158_v39 = vpop.xlane.xlu1 %157 }
 0x173   :  { %2960 = vrsqrt.f32 %v164_v37  ;;  %v162_v40 = vmul.f32 0.03125, %v158_v39 }
 0x174   :  { %2962 = vrsqrt.f32 %v165_v38 }
 0x175   :  { %v166_v41 = vadd.f32 1e-05, %v162_v40 }
 0x177   :  { %2964 = vrsqrt.f32 %v166_v41 }
 0x17c   :  { %v2959_v42 = vpop.eup %2958 }
 0x17d   :  { %v171_v43 = vmul.f32 %v2959_v42, %v139_v12 }
 0x17f   :  { %v182_v48 = vmul.f32 %v2512_v44, %v171_v43 }
 0x180   :  { %v2961_v45 = vpop.eup %2960 }
 0x181   :  { %v2963_v46 = vpop.eup %2962  ;;  %v172_v47 = vmul.f32 %v2961_v45, %v140_v20  ;;  %v3323_v53 = vadd.f32 %v2513_v49, %v182_v48 }
 0x182   :  { %v173_v50 = vmul.f32 %v2963_v46, %v141_v13 }
 0x183   :  { %v183_v51 = vmul.f32 %v2512_v44, %v172_v47 }
 0x184   :  { %v2965_v52 = vpop.eup %2964  ;;  %v184_v56 = vmul.f32 %v2512_v44, %v173_v50 }
 0x185   :  { %v3325_v54 = vadd.f32 %v2513_v49, %v183_v51  ;;  %v174_v55 = vmul.f32 %v2965_v52, %v142_v21 }
 0x186   :  { %v3330_v59 = vadd.f32 %v2513_v49, %v184_v56 }
 0x187   :  { %v197_v57 = vpack.c.bf16 %v3325_v54, %v3323_v53  ;;  %v185_v58 = vmul.f32 %v2512_v44, %v174_v55 }
 0x189   :  { %2675 = vmatprep.mubr.msk.bf16.mxu0 %vm121_vm0, %v197_v57  ;;  %v3332_v60 = vadd.f32 %v2513_v49, %v185_v58 }
 0x18b   :  { %v198_v61 = vpack.c.bf16 %v3332_v60, %v3330_v59 }
 0x18d   :  { %2676 = vmatmul.mubr.msk.bf16.vlgmr.msra.gmra.mxu0 %vm121_vm0, %v198_v61 }
 0x18e   :  { %2687 = vmatprep.mubr.msk.bf16.mxu0 %vm3200_vm1, %v3199_v5 }
 0x24d   :  { %v2677_v62 = vpop.f32.mrf.mxu0 }
 0x24e   :  { %v3345_v4 = vpack.c.bf16 %v2677_v62, %v2677_v62 }
 0x24f   :  { %v255_v63 = vpop.f32.mrf.mxu0 }
 0x250   :  { %v3337_v0 = vpack.c.bf16 %v255_v63, %v255_v63 }
 0x251   :  { %v2678_v1 = vpop.f32.mrf.mxu0 }
 0x252   :  { %290 = vrot.lane.b32.xlu1 %v3337_v0, %s3196_s4  ;;  %282 = vrot.lane.b32.xlu0 %v3337_v0, %s3197_s26  ;;  %v3353_v6 = vpack.c.bf16 %v2678_v1, %v2678_v1 }
 0x253   :  { %v258_v2 = vpop.f32.mrf.mxu0 }
 0x254   :  { %v3341_v3 = vpack.c.bf16 %v258_v2, %v258_v2 }
 0x256   :  { %298 = vrot.lane.b32.xlu1 %v3337_v0, %s3198_s27  ;;  %292 = vrot.lane.b32.xlu0 %v3341_v3, %s3196_s4 }
 0x25a   :  { %286 = vrot.lane.b32.xlu0 %v3345_v4, %s3197_s26  ;;  %284 = vrot.lane.b32.xlu1 %v3341_v3, %s3197_s26 }
 0x25e   :  { %302 = vrot.lane.b32.xlu0 %v3345_v4, %s3198_s27  ;;  %300 = vrot.lane.b32.xlu1 %v3341_v3, %s3198_s27 }
 0x262   :  { %296 = vrot.lane.b32.xlu0 %v3353_v6, %s3196_s4  ;;  %294 = vrot.lane.b32.xlu1 %v3345_v4, %s3196_s4 }
 0x266   :  { %306 = vrot.lane.b32.xlu0 %v3337_v0, %s3201_s28  ;;  %288 = vrot.lane.b32.xlu1 %v3353_v6, %s3197_s26 }
 0x26a   :  { %304 = vrot.lane.b32.xlu1 %v3353_v6, %s3198_s27 }
 0x2c4   :  { %v3365_v7 = vpop.permute.xlu1 %290  ;;  %v3367_v8 = vpop.permute.xlu0 %282 }
 0x2c5   :  { %v2525_v9 = vcombine.low %v3365_v7, %v3365_v7  ;;  %v2523_v10 = vcombine.low %v3367_v8, %v3367_v8 }
 0x2c7   :  { %407 = vrot.lane.b32.xlu0 %v2525_v9, %s3201_s28  ;;  %357 = vrot.lane.b32.xlu1 %v2523_v10, %s3201_s28 }
 0x2c8   :  { %v3375_v11 = vpop.permute.xlu1 %298  ;;  %v3377_v12 = vpop.permute.xlu0 %292 }
 0x2c9   :  { %v2527_v13 = vcombine.low %v3375_v11, %v3375_v11  ;;  %v2532_v16 = vcombine.low %v3377_v12, %v3377_v12 }
 0x2cb   :  { %505 = vrot.lane.b32.xlu0 %v3341_v3, %s3201_s28  ;;  %457 = vrot.lane.b32.xlu1 %v2527_v13, %s3201_s28 }
 0x2cc   :  { %v3384_v14 = vpop.permute.xlu0 %286  ;;  %v3386_v15 = vpop.permute.xlu1 %284 }
 0x2cd   :  { %v2530_v17 = vcombine.low %v3386_v15, %v3386_v15  ;;  %v3409_v23 = vcombine.low %v3384_v14, %v3384_v14 }
 0x2cf   :  { %605 = vrot.lane.b32.xlu0 %v2532_v16, %s3201_s28  ;;  %555 = vrot.lane.b32.xlu1 %v2530_v17, %s3201_s28 }
 0x2d0   :  { %v3394_v18 = vpop.permute.xlu0 %302  ;;  %v3396_v19 = vpop.permute.xlu1 %300 }
 0x2d1   :  { %v2534_v20 = vcombine.low %v3396_v19, %v3396_v19  ;;  %v3423_v27 = vcombine.low %v3394_v18, %v3394_v18 }
 0x2d3   :  { %703 = vrot.lane.b32.xlu0 %v3345_v4, %s3201_s28  ;;  %655 = vrot.lane.b32.xlu1 %v2534_v20, %s3201_s28 }
 0x2d4   :  { %v3403_v21 = vpop.permute.xlu0 %296  ;;  %v3405_v22 = vpop.permute.xlu1 %294 }
 0x2d5   :  { %v3413_v24 = vcombine.low %v3405_v22, %v3405_v22  ;;  %v3433_v29 = vcombine.low %v3403_v21, %v3403_v21 }
 0x2d7   :  { %753 = vrot.lane.b32.xlu1 %v3409_v23, %s3201_s28  ;;  %803 = vrot.lane.b32.xlu0 %v3413_v24, %s3201_s28 }
 0x2d8   :  { %v307_v25 = vpop.permute.xlu0 %306  ;;  %v3419_v26 = vpop.permute.xlu1 %288 }
 0x2d9   :  { %v313_v28 = vsel %vm308_vm2, %v307_v25, 0  ;;  %v3437_v30 = vcombine.low %v3419_v26, %v3419_v26 }
 0x2da   :  { %2680 = vmatpush3.bf16.xpose.msra.mxu1 %v313_v28 }
 0x2db   :  { %853 = vrot.lane.b32.xlu1 %v3423_v27, %s3201_s28  ;;  %901 = vrot.lane.b32.xlu0 %v3353_v6, %s3201_s28 }
 0x2dc   :  { %2691 = vmatprep.subr.bf16.mxu1 %v3199_v5  ;;  %v3439_v31 = vpop.permute.xlu1 %304 }
 0x2dd   :  { %v3447_v32 = vcombine.low %v3439_v31, %v3439_v31 }
 0x2df   :  { %1001 = vrot.lane.b32.xlu0 %v3433_v29, %s3201_s28  ;;  %951 = vrot.lane.b32.xlu1 %v3437_v30, %s3201_s28 }
 0x2e1   :  { %2682 = vmatmul.mubr.msk.bf16.vlgmr.msra.gmra.mxu1 %vm308_vm2, %v3337_v0 }
 0x2e2   :  { %2693 = vmatprep.mubr.msk.bf16.mxu1 %vm3200_vm1, %v3199_v5 }
 0x2e3   :  { %1314 = vrot.lane.b32.xlu0 %v3337_v0, %s3191_s5  ;;  %1051 = vrot.lane.b32.xlu1 %v3447_v32, %s3201_s28 }
 0x2e7   :  { %1411 = vrot.lane.b32.xlu0 %v2525_v9, %s3191_s5  ;;  %1363 = vrot.lane.b32.xlu1 %v2523_v10, %s3191_s5  ;;  %v1099_v10 = vlaneseq }
 0x2eb   :  { %1507 = vrot.lane.b32.xlu0 %v3341_v3, %s3191_s5  ;;  %1459 = vrot.lane.b32.xlu1 %v2527_v13, %s3191_s5 }
 0x2ef   :  { %1603 = vrot.lane.b32.xlu0 %v2532_v16, %s3191_s5  ;;  %1555 = vrot.lane.b32.xlu1 %v2530_v17, %s3191_s5 }
 0x2f3   :  { %1651 = vrot.lane.b32.xlu1 %v2534_v20, %s3191_s5 }
 0x339   :  { %v408_v33 = vpop.permute.xlu0 %407  ;;  %v358_v34 = vpop.permute.xlu1 %357 }
 0x33a   :  { %v413_v35 = vsel %vm308_vm2, %v408_v33, 0  ;;  %v363_v36 = vsel %vm308_vm2, %v358_v34, 0 }
 0x33b   :  { %2686 = vmatpush3.bf16.xpose.msra.mxu0 %v363_v36  ;;  %2692 = vmatpush3.bf16.xpose.msra.mxu1 %v413_v35 }
 0x33c   :  { %2697 = vmatprep.subr.bf16.mxu0 %v3199_v5  ;;  %2703 = vmatprep.subr.bf16.mxu1 %v3199_v5 }
 0x33d   :  { %v506_v37 = vpop.permute.xlu0 %505  ;;  %v458_v38 = vpop.permute.xlu1 %457 }
 0x33e   :  { %v511_v39 = vsel %vm308_vm2, %v506_v37, 0  ;;  %v463_v40 = vsel %vm308_vm2, %v458_v38, 0 }
 0x341   :  { %v606_v41 = vpop.permute.xlu0 %605  ;;  %v556_v42 = vpop.permute.xlu1 %555 }
 0x342   :  { %2688 = vmatmul.mubr.msk.bf16.vlgmr.msra.gmra.mxu0 %vm308_vm2, %v3367_v8  ;;  %2694 = vmatmul.mubr.msk.bf16.vlgmr.msra.gmra.mxu1 %vm308_vm2, %v3365_v7  ;;  %v611_v43 = vsel %vm308_vm2, %v606_v41, 0  ;;  %v561_v44 = vsel %vm308_vm2, %v556_v42, 0 }
 0x343   :  { %2698 = vmatpush3.bf16.xpose.msra.mxu0 %v463_v40  ;;  %2704 = vmatpush3.bf16.xpose.msra.mxu1 %v511_v39 }
 0x344   :  { %2705 = vmatprep.mubr.msk.bf16.mxu1 %vm3200_vm1, %v3199_v5  ;;  %2699 = vmatprep.mubr.msk.bf16.mxu0 %vm3200_vm1, %v3199_v5 }
 0x345   :  { %2709 = vmatprep.subr.bf16.mxu0 %v3199_v5  ;;  %2715 = vmatprep.subr.bf16.mxu1 %v3199_v5  ;;  %v704_v45 = vpop.permute.xlu0 %703  ;;  %v656_v46 = vpop.permute.xlu1 %655 }
 0x346   :  { %v709_v47 = vsel %vm308_vm2, %v704_v45, 0  ;;  %v661_v48 = vsel %vm308_vm2, %v656_v46, 0 }
 0x349   :  { %v804_v49 = vpop.permute.xlu0 %803  ;;  %v754_v50 = vpop.permute.xlu1 %753 }
 0x34a   :  { %2700 = vmatmul.mubr.msk.bf16.vlgmr.msra.gmra.mxu0 %vm308_vm2, %v3375_v11  ;;  %2706 = vmatmul.mubr.msk.bf16.vlgmr.msra.gmra.mxu1 %vm308_vm2, %v3341_v3  ;;  %v809_v51 = vsel %vm308_vm2, %v804_v49, 0  ;;  %v759_v52 = vsel %vm308_vm2, %v754_v50, 0  ;;  %v1100_v11 = vshrl.u32 %v1099_v10, 7 }
 0x34b   :  { %2710 = vmatpush3.bf16.xpose.msra.mxu0 %v561_v44  ;;  %2716 = vmatpush3.bf16.xpose.msra.mxu1 %v611_v43 }
 0x34c   :  { %2717 = vmatprep.mubr.msk.bf16.mxu1 %vm3200_vm1, %v3199_v5  ;;  %2711 = vmatprep.mubr.msk.bf16.mxu0 %vm3200_vm1, %v3199_v5 }
 0x34d   :  { %2721 = vmatprep.subr.bf16.mxu0 %v3199_v5  ;;  %2727 = vmatprep.subr.bf16.mxu1 %v3199_v5  ;;  %v902_v55 = vpop.permute.xlu0 %901  ;;  %v854_v56 = vpop.permute.xlu1 %853 }
 0x34e   :  { %v907_v57 = vsel %vm308_vm2, %v902_v55, 0  ;;  %v859_v58 = vsel %vm308_vm2, %v854_v56, 0 }
 0x351   :  { %v1002_v61 = vpop.permute.xlu0 %1001  ;;  %v952_v62 = vpop.permute.xlu1 %951 }
 0x352   :  { %2712 = vmatmul.mubr.msk.bf16.vlgmr.msra.gmra.mxu0 %vm308_vm2, %v3386_v15  ;;  %2718 = vmatmul.mubr.msk.bf16.vlgmr.msra.gmra.mxu1 %vm308_vm2, %v3377_v12  ;;  %v1007_v63 = vsel %vm308_vm2, %v1002_v61, 0  ;;  %v957_v0 = vsel %vm308_vm2, %v952_v62, 0  ;;  %v1102_v12 = vand.u32 127, %v1099_v10 }
 0x353   :  { %2722 = vmatpush3.bf16.xpose.msra.mxu0 %v661_v48  ;;  %2728 = vmatpush3.bf16.xpose.msra.mxu1 %v709_v47 }
 0x354   :  { %2729 = vmatprep.mubr.msk.bf16.mxu1 %vm3200_vm1, %v3199_v5  ;;  %2723 = vmatprep.mubr.msk.bf16.mxu0 %vm3200_vm1, %v3199_v5  ;;  %vm3559_vm4 = vcmp.ge.s32.totalorder %v1100_v11, %v1102_v12 }
 0x355   :  { %2733 = vmatprep.subr.bf16.mxu0 %v3199_v5  ;;  %2739 = vmatprep.subr.bf16.mxu1 %v3199_v5  ;;  %v1315_v1 = vpop.permute.xlu0 %1314  ;;  %v1052_v2 = vpop.permute.xlu1 %1051 }
 0x356   :  { %v1321_v3 = vsel %vm1319_vm3, %v1315_v1, 0  ;;  %v1057_v7 = vsel %vm308_vm2, %v1052_v2, 0 }
 0x359   :  { %v1364_v8 = vpop.permute.xlu1 %1363 }
 0x35a   :  { %2724 = vmatmul.mubr.msk.bf16.vlgmr.msra.gmra.mxu0 %vm308_vm2, %v3396_v19  ;;  %2730 = vmatmul.mubr.msk.bf16.vlgmr.msra.gmra.mxu1 %vm308_vm2, %v3345_v4  ;;  %v1369_v9 = vsel %vm1319_vm3, %v1364_v8, 0 }
 0x35b   :  { %2734 = vmatpush3.bf16.xpose.msra.mxu0 %v759_v52  ;;  %2740 = vmatpush3.bf16.xpose.msra.mxu1 %v809_v51 }
 0x35c   :  { %2741 = vmatprep.mubr.msk.bf16.mxu1 %vm3200_vm1, %v3199_v5  ;;  %2735 = vmatprep.mubr.msk.bf16.mxu0 %vm3200_vm1, %v3199_v5 }
 0x35d   :  { %2745 = vmatprep.subr.bf16.mxu0 %v3199_v5  ;;  %2751 = vmatprep.subr.bf16.mxu1 %v3199_v5 }
 0x362   :  { %2736 = vmatmul.mubr.msk.bf16.vlgmr.msra.gmra.mxu0 %vm308_vm2, %v3384_v14  ;;  %2742 = vmatmul.mubr.msk.bf16.vlgmr.msra.gmra.mxu1 %vm308_vm2, %v3405_v22 }
 0x363   :  { %2746 = vmatpush3.bf16.xpose.msra.mxu0 %v859_v58  ;;  %2752 = vmatpush3.bf16.xpose.msra.mxu1 %v907_v57 }
 0x364   :  { %2747 = vmatprep.mubr.msk.bf16.mxu0 %vm3200_vm1, %v3199_v5  ;;  %2753 = vmatprep.mubr.msk.bf16.mxu1 %vm3200_vm1, %v3199_v5 }
 0x365   :  { %2757 = vmatprep.subr.bf16.mxu0 %v3199_v5  ;;  %2763 = vmatprep.subr.bf16.mxu1 %v3199_v5 }
 0x36a   :  { %2748 = vmatmul.mubr.msk.bf16.vlgmr.msra.gmra.mxu0 %vm308_vm2, %v3394_v18  ;;  %2754 = vmatmul.mubr.msk.bf16.vlgmr.msra.gmra.mxu1 %vm308_vm2, %v3353_v6 }
 0x36b   :  { %2758 = vmatpush3.bf16.xpose.msra.mxu0 %v957_v0  ;;  %2764 = vmatpush3.bf16.xpose.msra.mxu1 %v1007_v63 }
 0x36c   :  { %2759 = vmatprep.mubr.msk.bf16.mxu0 %vm3200_vm1, %v3199_v5  ;;  %2765 = vmatprep.mubr.msk.bf16.mxu1 %vm3200_vm1, %v3199_v5 }
 0x36d   :  { %2769 = vmatprep.subr.bf16.mxu0 %v3199_v5  ;;  %2775 = vmatprep.subr.bf16.mxu1 %v3199_v5 }
 0x372   :  { %2760 = vmatmul.mubr.msk.bf16.vlgmr.msra.gmra.mxu0 %vm308_vm2, %v3419_v26  ;;  %2766 = vmatmul.mubr.msk.bf16.vlgmr.msra.gmra.mxu1 %vm308_vm2, %v3403_v21 }
 0x373   :  { %2770 = vmatpush3.bf16.xpose.msra.mxu0 %v1057_v7  ;;  %2776 = vmatpush3.bf16.msra.mxu1 %v1321_v3 }
 0x374   :  { %2771 = vmatprep.mubr.msk.bf16.mxu0 %vm3200_vm1, %v3199_v5  ;;  %2781 = vmatprep.subr.bf16.mxu0 %v3199_v5 }
 0x375   :  { %2777 = vmatprep.mubr.msk.bf16.mxu1 %vm3200_vm1, %v3199_v5  ;;  %2787 = vmatprep.subr.bf16.mxu1 %v3199_v5 }
 0x37a   :  { %2772 = vmatmul.mubr.msk.bf16.vlgmr.msra.gmra.mxu0 %vm308_vm2, %v3439_v31 }
 0x37b   :  { %2782 = vmatpush3.bf16.msra.mxu0 %v1369_v9  ;;  %2783 = vmatprep.mubr.msk.bf16.mxu0 %vm3200_vm1, %v3199_v5 }
 0x37c   :  { %2793 = vmatprep.subr.bf16.mxu0 %v3199_v5 }
 0x3a1   :  { %v349_v14 = vpop.f32.mrf.mxu1 }
 0x3a2   :  { %v3565_v15 = vsel %vm3559_vm4, %v349_v14, -inf  ;;  %v3617_v14 = vpop.permute.xlu0 %1411 }
 0x3a3   :  { %v2683_v16 = vpop.f32.mrf.mxu1  ;;  %v1122_v17 = vsel %vm308_vm2, %v3565_v15, -inf }
 0x3a4   :  { %1123 = vmax.xlane.f32.xlu0 %v1122_v17 }
 0x3a5   :  { %v352_v18 = vpop.f32.mrf.mxu1 }
 0x3a7   :  { %v2684_v19 = vpop.f32.mrf.mxu1 }
 0x402   :  { %v399_v20 = vpop.f32.mrf.mxu0  ;;  %v449_v21 = vpop.f32.mrf.mxu1 }
 0x403   :  { %v3571_v22 = vsel %vm3559_vm4, %v399_v20, -inf  ;;  %v3575_v25 = vsel %vm3559_vm4, %v449_v21, -inf }
 0x404   :  { %v2689_v26 = vpop.f32.mrf.mxu0  ;;  %v2695_v28 = vpop.f32.mrf.mxu1  ;;  %v1128_v31 = vsel %vm308_vm2, %v3575_v25, -inf  ;;  %v1125_v33 = vsel %vm308_vm2, %v3571_v22, -inf }
 0x405   :  { %1129 = vmax.xlane.f32.xlu0 %v1128_v31  ;;  %1126 = vmax.xlane.f32.xlu1 %v1125_v33  ;;  %v3619_v26 = vpop.permute.xlu0 %1507 }
 0x406   :  { %v402_v34 = vpop.f32.mrf.mxu0  ;;  %v452_v35 = vpop.f32.mrf.mxu1 }
 0x408   :  { %v2690_v36 = vpop.f32.mrf.mxu0  ;;  %v2696_v37 = vpop.f32.mrf.mxu1 }
 0x40a   :  { %v499_v38 = vpop.f32.mrf.mxu0  ;;  %v547_v39 = vpop.f32.mrf.mxu1 }
 0x40b   :  { %v3583_v40 = vsel %vm3559_vm4, %v499_v38, -inf  ;;  %v3589_v44 = vsel %vm3559_vm4, %v547_v39, -inf }
 0x40c   :  { %v2701_v41 = vpop.f32.mrf.mxu0  ;;  %v2707_v42 = vpop.f32.mrf.mxu1  ;;  %v1131_v43 = vsel %vm308_vm2, %v3583_v40, -inf  ;;  %v1134_v49 = vsel %vm308_vm2, %v3589_v44, -inf }
 0x40d   :  { %1132 = vmax.xlane.f32.xlu0 %v1131_v43  ;;  %v3633_v42 = vpop.permute.xlu0 %1603 }
 0x40e   :  { %v502_v45 = vpop.f32.mrf.mxu0  ;;  %v550_v46 = vpop.f32.mrf.mxu1 }
 0x410   :  { %v2702_v47 = vpop.f32.mrf.mxu0  ;;  %v2708_v48 = vpop.f32.mrf.mxu1 }
 0x411   :  { %1135 = vmax.xlane.f32.xlu0 %v1134_v49 }
 0x412   :  { %v597_v50 = vpop.f32.mrf.mxu0  ;;  %v647_v51 = vpop.f32.mrf.mxu1 }
 0x413   :  { %v3595_v52 = vsel %vm3559_vm4, %v597_v50, -inf  ;;  %v3599_v55 = vsel %vm3559_vm4, %v647_v51, -inf }
 0x414   :  { %v2713_v56 = vpop.f32.mrf.mxu0  ;;  %v2719_v57 = vpop.f32.mrf.mxu1  ;;  %v1140_v58 = vsel %vm308_vm2, %v3599_v55, -inf  ;;  %v1137_v61 = vsel %vm308_vm2, %v3595_v52, -inf }
 0x415   :  { %1141 = vmax.xlane.f32.xlu0 %v1140_v58  ;;  %1138 = vmax.xlane.f32.xlu1 %v1137_v61 }
 0x416   :  { %v600_v62 = vpop.f32.mrf.mxu0  ;;  %v650_v63 = vpop.f32.mrf.mxu1 }
 0x418   :  { %v2714_v0 = vpop.f32.mrf.mxu0  ;;  %v2720_v1 = vpop.f32.mrf.mxu1 }
 0x41a   :  { %v697_v2 = vpop.f32.mrf.mxu0  ;;  %v745_v3 = vpop.f32.mrf.mxu1 }
 0x41b   :  { %v3607_v7 = vsel %vm3559_vm4, %v697_v2, -inf  ;;  %v3611_v8 = vsel %vm3559_vm4, %v745_v3, -inf }
 0x41c   :  { %v2725_v9 = vpop.f32.mrf.mxu0  ;;  %v2731_v10 = vpop.f32.mrf.mxu1  ;;  %v1146_v11 = vsel %vm308_vm2, %v3611_v8, -inf  ;;  %v1143_v12 = vsel %vm308_vm2, %v3607_v7, -inf }
 0x41d   :  { %1147 = vmax.xlane.f32.xlu0 %v1146_v11  ;;  %1144 = vmax.xlane.f32.xlu1 %v1143_v12 }
 0x41e   :  { %v700_v16 = vpop.f32.mrf.mxu0  ;;  %v748_v17 = vpop.f32.mrf.mxu1 }
 0x420   :  { %v2726_v18 = vpop.f32.mrf.mxu0  ;;  %v2732_v19 = vpop.f32.mrf.mxu1 }
 0x422   :  { %v795_v20 = vpop.f32.mrf.mxu0  ;;  %v845_v21 = vpop.f32.mrf.mxu1 }
 0x423   :  { %v3623_v28 = vsel %vm3559_vm4, %v795_v20, -inf  ;;  %v3627_v31 = vsel %vm3559_vm4, %v845_v21, -inf }
 0x424   :  { %v2737_v33 = vpop.f32.mrf.mxu0  ;;  %v2743_v34 = vpop.f32.mrf.mxu1  ;;  %v1152_v35 = vsel %vm308_vm2, %v3627_v31, -inf  ;;  %v1149_v36 = vsel %vm308_vm2, %v3623_v28, -inf }
 0x425   :  { %1153 = vmax.xlane.f32.xlu0 %v1152_v35  ;;  %1150 = vmax.xlane.f32.xlu1 %v1149_v36 }
 0x426   :  { %v798_v37 = vpop.f32.mrf.mxu0  ;;  %v848_v38 = vpop.f32.mrf.mxu1 }
 0x428   :  { %v2738_v39 = vpop.f32.mrf.mxu0  ;;  %v2744_v41 = vpop.f32.mrf.mxu1 }
 0x429   :  { %v3678_v39 = vpop.permute.xlu1 %1459 }
 0x42a   :  { %v895_v43 = vpop.f32.mrf.mxu0  ;;  %v943_v45 = vpop.f32.mrf.mxu1 }
 0x42b   :  { %v3637_v46 = vsel %vm3559_vm4, %v895_v43, -inf  ;;  %v3641_v47 = vsel %vm3559_vm4, %v943_v45, -inf }
 0x42c   :  { %v2749_v48 = vpop.f32.mrf.mxu0  ;;  %v2755_v49 = vpop.f32.mrf.mxu1  ;;  %v1158_v50 = vsel %vm308_vm2, %v3641_v47, -inf  ;;  %v1155_v51 = vsel %vm308_vm2, %v3637_v46, -inf }
 0x42d   :  { %v1124_v56 = vpop.xlane.xlu0 %1123  ;;  %1159 = vmax.xlane.f32.xlu0 %v1158_v50  ;;  %1156 = vmax.xlane.f32.xlu1 %v1155_v51 }
 0x42e   :  { %v1170_v57 = vsub.f32 %v3565_v15, %v1124_v56  ;;  %v898_v58 = vpop.f32.mrf.mxu0  ;;  %v946_v61 = vpop.f32.mrf.mxu1 }
 0x430   :  { %v1186_v62 = vmul.f32 1.442695, %v1170_v57  ;;  %v2750_v63 = vpop.f32.mrf.mxu0  ;;  %v2756_v0 = vpop.f32.mrf.mxu1 }
 0x432   :  { %2966 = vpow2.f32 %v1186_v62  ;;  %v993_v1 = vpop.f32.mrf.mxu0  ;;  %v1043_v2 = vpop.f32.mrf.mxu1 }
 0x433   :  { %v3650_v3 = vsel %vm3559_vm4, %v993_v1, -inf  ;;  %v3660_v35 = vsel %vm3559_vm4, %v1043_v2, -inf }
 0x434   :  { %v2761_v9 = vpop.f32.mrf.mxu0  ;;  %v2767_v10 = vpop.f32.mrf.mxu1  ;;  %v1161_v11 = vsel %vm308_vm2, %v3650_v3, -inf  ;;  %v1164_v36 = vsel %vm308_vm2, %v3660_v35, -inf }
 0x435   :  { %1162 = vmax.xlane.f32.xlu1 %v1161_v11 }
 0x436   :  { %v996_v12 = vpop.f32.mrf.mxu0  ;;  %v1046_v15 = vpop.f32.mrf.mxu1 }
 0x438   :  { %v2762_v16 = vpop.f32.mrf.mxu0  ;;  %v2768_v17 = vpop.f32.mrf.mxu1 }
 0x43a   :  { %v1093_v18 = vpop.f32.mrf.mxu0 }
 0x43b   :  { %v3674_v37 = vsel %vm3559_vm4, %v1093_v18, -inf }
 0x43c   :  { %v2773_v19 = vpop.f32.mrf.mxu0  ;;  %v1167_v38 = vsel %vm308_vm2, %v3674_v37, -inf }
 0x43e   :  { %v1096_v20 = vpop.f32.mrf.mxu0 }
 0x43f   :  { %v3654_v21 = vpop.eup %2966 }
 0x440   :  { %v2774_v33 = vpop.f32.mrf.mxu0  ;;  %v1218_v34 = vsel %vm308_vm2, %v3654_v21, 0.0 }
 0x441   :  { %1219 = vadd.xlane.f32.xlu0 %v1218_v34 }
 0x445   :  { %1165 = vmax.xlane.f32.xlu0 %v1164_v36 }
 0x446   :  { %1747 = vrot.lane.b32.xlu1 %v3409_v23, %s3191_s5  ;;  %v3680_v23 = vpop.permute.xlu1 %1555 }
 0x44a   :  { %1795 = vrot.lane.b32.xlu1 %v3413_v24, %s3191_s5  ;;  %v3682_v41 = vpop.permute.xlu1 %1651 }
 0x44e   :  { %1843 = vrot.lane.b32.xlu1 %v3423_v27, %s3191_s5 }
 0x45b   :  { %1699 = vrot.lane.b32.xlu0 %v3345_v4, %s3191_s5 }
 0x472   :  { %1168 = vmax.xlane.f32.xlu1 %v1167_v38 }
 0x48e   :  { %v1130_v24 = vpop.xlane.xlu0 %1129  ;;  %v1127_v43 = vpop.xlane.xlu1 %1126 }
 0x48f   :  { %v1172_v27 = vsub.f32 %v3575_v25, %v1130_v24  ;;  %v1171_v4 = vsub.f32 %v3571_v22, %v1127_v43 }
 0x491   :  { %v1190_v45 = vmul.f32 1.442695, %v1172_v27  ;;  %v1188_v13 = vmul.f32 1.442695, %v1171_v4 }
 0x493   :  { %2968 = vpow2.f32 %v1190_v45 }
 0x494   :  { %2970 = vpow2.f32 %v1188_v13 }
 0x496   :  { %v1133_v48 = vpop.xlane.xlu0 %1132 }
 0x497   :  { %v1173_v49 = vsub.f32 %v3583_v40, %v1133_v48 }
 0x499   :  { %v1192_v50 = vmul.f32 1.442695, %v1173_v49 }
 0x49a   :  { %v1136_v51 = vpop.xlane.xlu0 %1135 }
 0x49b   :  { %2972 = vpow2.f32 %v1192_v50  ;;  %v1174_v56 = vsub.f32 %v3589_v44, %v1136_v51 }
 0x49d   :  { %v1194_v57 = vmul.f32 1.442695, %v1174_v56 }
 0x49e   :  { %v1142_v58 = vpop.xlane.xlu0 %1141  ;;  %v1139_v61 = vpop.xlane.xlu1 %1138 }
 0x49f   :  { %2974 = vpow2.f32 %v1194_v57  ;;  %v1176_v25 = vsub.f32 %v3599_v55, %v1142_v58  ;;  %v1175_v22 = vsub.f32 %v3595_v52, %v1139_v61 }
 0x4a0   :  { %v3690_v62 = vpop.eup %2968 }
 0x4a1   :  { %v3692_v63 = vpop.eup %2970  ;;  %v1198_v0 = vmul.f32 1.442695, %v1176_v25  ;;  %v1196_v1 = vmul.f32 1.442695, %v1175_v22  ;;  %v1224_v40 = vsel %vm308_vm2, %v3690_v62, 0.0 }
 0x4a2   :  { %1225 = vadd.xlane.f32.xlu0 %v1224_v40  ;;  %v1221_v44 = vsel %vm308_vm2, %v3692_v63, 0.0 }
 0x4a3   :  { %2976 = vpow2.f32 %v1198_v0  ;;  %1222 = vadd.xlane.f32.xlu1 %v1221_v44  ;;  %v1417_v0 = vsel %vm1319_vm3, %v3617_v14, 0 }
 0x4a4   :  { %2978 = vpow2.f32 %v1196_v1 }
 0x4a6   :  { %v1148_v2 = vpop.xlane.xlu0 %1147  ;;  %v1145_v55 = vpop.xlane.xlu1 %1144 }
 0x4a7   :  { %v1178_v52 = vsub.f32 %v3611_v8, %v1148_v2  ;;  %v1177_v9 = vsub.f32 %v3607_v7, %v1145_v55 }
 0x4a8   :  { %v3700_v10 = vpop.eup %2972 }
 0x4a9   :  { %v1200_v11 = vmul.f32 1.442695, %v1177_v9  ;;  %v1227_v12 = vsel %vm308_vm2, %v3700_v10, 0.0  ;;  %v1202_v15 = vmul.f32 1.442695, %v1178_v52 }
 0x4aa   :  { %1228 = vadd.xlane.f32.xlu1 %v1227_v12 }
 0x4ab   :  { %2980 = vpow2.f32 %v1200_v11 }
 0x4ac   :  { %v3704_v16 = vpop.eup %2974  ;;  %2982 = vpow2.f32 %v1202_v15 }
 0x4ad   :  { %v1230_v17 = vsel %vm308_vm2, %v3704_v16, 0.0 }
 0x4ae   :  { %1231 = vadd.xlane.f32.xlu0 %v1230_v17  ;;  %v1154_v18 = vpop.xlane.xlu0 %1153  ;;  %v1151_v8 = vpop.xlane.xlu1 %1150 }
 0x4af   :  { %v1180_v7 = vsub.f32 %v3627_v31, %v1154_v18  ;;  %v1179_v19 = vsub.f32 %v3623_v28, %v1151_v8 }
 0x4b0   :  { %v3710_v20 = vpop.eup %2976 }
 0x4b1   :  { %v3712_v33 = vpop.eup %2978  ;;  %v1206_v34 = vmul.f32 1.442695, %v1180_v7  ;;  %v1204_v36 = vmul.f32 1.442695, %v1179_v19  ;;  %v1236_v38 = vsel %vm308_vm2, %v3710_v20, 0.0 }
 0x4b2   :  { %1237 = vadd.xlane.f32.xlu0 %v1236_v38  ;;  %v1233_v24 = vsel %vm308_vm2, %v3712_v33, 0.0 }
 0x4b3   :  { %2984 = vpow2.f32 %v1206_v34  ;;  %1234 = vadd.xlane.f32.xlu1 %v1233_v24 }
 0x4b4   :  { %2986 = vpow2.f32 %v1204_v36 }
 0x4b6   :  { %v1157_v43 = vpop.xlane.xlu1 %1156  ;;  %v1160_v51 = vpop.xlane.xlu0 %1159 }
 0x4b7   :  { %v1181_v31 = vsub.f32 %v3637_v46, %v1157_v43  ;;  %v1182_v1 = vsub.f32 %v3641_v47, %v1160_v51  ;;  %v1465_v51 = vsel %vm1319_vm3, %v3678_v39, 0 }
 0x4b8   :  { %v3719_v28 = vpop.eup %2980 }
 0x4b9   :  { %v1208_v27 = vmul.f32 1.442695, %v1181_v31  ;;  %v1239_v4 = vsel %vm308_vm2, %v3719_v28, 0.0  ;;  %v3723_v45 = vpop.eup %2982 }
 0x4ba   :  { %1240 = vadd.xlane.f32.xlu1 %v1239_v4  ;;  %v1242_v13 = vsel %vm308_vm2, %v3723_v45, 0.0 }
 0x4bb   :  { %2988 = vpow2.f32 %v1208_v27 }
 0x4be   :  { %1243 = vadd.xlane.f32.xlu1 %v1242_v13  ;;  %v1163_v44 = vpop.xlane.xlu1 %1162 }
 0x4bf   :  { %v1183_v14 = vsub.f32 %v3650_v3, %v1163_v44 }
 0x4c0   :  { %v3727_v48 = vpop.eup %2984 }
 0x4c1   :  { %v3729_v49 = vpop.eup %2986  ;;  %v1248_v46 = vsel %vm308_vm2, %v3727_v48, 0.0  ;;  %v1212_v55 = vmul.f32 1.442695, %v1183_v14 }
 0x4c2   :  { %v1245_v50 = vsel %vm308_vm2, %v3729_v49, 0.0  ;;  %1249 = vadd.xlane.f32.xlu1 %v1248_v46  ;;  %v3753_v52 = vpop.permute.xlu1 %1747 }
 0x4c3   :  { %1246 = vadd.xlane.f32.xlu0 %v1245_v50  ;;  %v1513_v50 = vsel %vm1319_vm3, %v3619_v26, 0 }
 0x4c6   :  { %v3755_v47 = vpop.permute.xlu1 %1795 }
 0x4c8   :  { %v3735_v56 = vpop.eup %2988 }
 0x4c9   :  { %v1251_v58 = vsel %vm308_vm2, %v3735_v56, 0.0 }
 0x4ca   :  { %v1220_v57 = vpop.xlane.xlu0 %1219  ;;  %1252 = vadd.xlane.f32.xlu0 %v1251_v58  ;;  %v3759_v11 = vpop.permute.xlu1 %1843 }
 0x4cb   :  { %2990 = vrcp.f32 %v1220_v57 }
 0x4ce   :  { %v1166_v40 = vpop.xlane.xlu0 %1165 }
 0x4d2   :  { %v3780_v34 = vpop.permute.xlu0 %1699 }
 0x4d3   :  { %1939 = vrot.lane.b32.xlu1 %v3437_v30, %s3191_s5  ;;  %v1210_v30 = vmul.f32 1.442695, %v1182_v1  ;;  %v1609_v1 = vsel %vm1319_vm3, %v3633_v42, 0  ;;  %v1657_v42 = vsel %vm1319_vm3, %v3682_v41, 0  ;;  %v1705_v14 = vsel %vm1319_vm3, %v3780_v34, 0 }
 0x4d5   :  { %2992 = vpow2.f32 %v1210_v30 }
 0x4d8   :  { %v2991_v61 = vpop.eup %2990 }
 0x4d9   :  { %v1282_v25 = vmul.f32 %v2991_v61, %v3654_v21  ;;  %v1184_v21 = vsub.f32 %v3660_v35, %v1166_v40  ;;  %v1561_v61 = vsel %vm1319_vm3, %v3680_v23, 0 }
 0x4db   :  { %v1298_v22 = vpack.c.bf16 %v1282_v25, %v1282_v25  ;;  %v1214_v2 = vmul.f32 1.442695, %v1184_v21 }
 0x4dd   :  { %2778 = vmatmul.mubr.msk.bf16.vlgmr.msra.gmra.mxu1 %vm308_vm2, %v1298_v22  ;;  %2994 = vpow2.f32 %v1214_v2 }
 0x4de   :  { %2788 = vmatpush3.bf16.msra.mxu1 %v1417_v0  ;;  %2789 = vmatprep.mubr.msk.bf16.mxu1 %vm3200_vm1, %v3199_v5  ;;  %2996 = vpow2.f32 %v1212_v55 }
 0x4df   :  { %2799 = vmatprep.subr.bf16.mxu1 %v3199_v5 }
 0x4e0   :  { %1891 = vrot.lane.b32.xlu0 %v3353_v6, %s3191_s5 }
 0x4e2   :  { %v3757_v9 = vpop.eup %2992 }
 0x4e3   :  { %v1254_v6 = vsel %vm308_vm2, %v3757_v9, 0.0 }
 0x4ea   :  { %v3763_v35 = vpop.eup %2994 }
 0x4eb   :  { %v1260_v3 = vsel %vm308_vm2, %v3763_v35, 0.0  ;;  %v3767_v15 = vpop.eup %2996 }
 0x4ec   :  { %v1257_v8 = vsel %vm308_vm2, %v3767_v15, 0.0 }
 0x4f7   :  { %1255 = vadd.xlane.f32.xlu1 %v1254_v6  ;;  %v1753_v6 = vsel %vm1319_vm3, %v3753_v52, 0 }
 0x4fb   :  { %v1169_v12 = vpop.xlane.xlu1 %1168  ;;  %1261 = vadd.xlane.f32.xlu1 %v1260_v3 }
 0x4fc   :  { %v1185_v17 = vsub.f32 %v3674_v37, %v1169_v12 }
 0x4fe   :  { %v1216_v18 = vmul.f32 1.442695, %v1185_v17 }
 0x4ff   :  { %1258 = vadd.xlane.f32.xlu0 %v1257_v8 }
 0x500   :  { %2998 = vpow2.f32 %v1216_v18  ;;  %v1801_v18 = vsel %vm1319_vm3, %v3755_v47, 0 }
 0x50c   :  { %2035 = vrot.lane.b32.xlu1 %v3447_v32, %s3191_s5 }
 0x50d   :  { %v3772_v7 = vpop.eup %2998 }
 0x50e   :  { %v1263_v19 = vsel %vm308_vm2, %v3772_v7, 0.0 }
 0x50f   :  { %1264 = vadd.xlane.f32.xlu0 %v1263_v19  ;;  %v1849_v19 = vsel %vm1319_vm3, %v3759_v11, 0 }
 0x525   :  { %1987 = vrot.lane.b32.xlu0 %v3433_v29, %s3191_s5  ;;  %s3202_s5 = smov 8  }
 0x52b   :  { %v1226_v37 = vpop.xlane.xlu0 %1225 }
 0x52c   :  { %3000 = vrcp.f32 %v1226_v37  ;;  %v1223_v36 = vpop.xlane.xlu1 %1222 }
 0x52d   :  { %3002 = vrcp.f32 %v1223_v36 }
 0x533   :  { %v1229_v38 = vpop.xlane.xlu1 %1228 }
 0x534   :  { %3004 = vrcp.f32 %v1229_v38 }
 0x537   :  { %v1232_v24 = vpop.xlane.xlu0 %1231 }
 0x538   :  { %3006 = vrcp.f32 %v1232_v24 }
 0x539   :  { %v3001_v43 = vpop.eup %3000 }
 0x53a   :  { %v3003_v31 = vpop.eup %3002  ;;  %v1284_v32 = vmul.f32 %v3001_v43, %v3690_v62 }
 0x53b   :  { %v1238_v27 = vpop.xlane.xlu0 %1237  ;;  %v1283_v4 = vmul.f32 %v3003_v31, %v3692_v63 }
 0x53c   :  { %3008 = vrcp.f32 %v1238_v27  ;;  %v1235_v13 = vpop.xlane.xlu1 %1234  ;;  %v1300_v29 = vpack.c.bf16 %v1284_v32, %v1284_v32 }
 0x53d   :  { %3010 = vrcp.f32 %v1235_v13  ;;  %v1299_v46 = vpack.c.bf16 %v1283_v4, %v1283_v4 }
 0x53e   :  { %2790 = vmatmul.mubr.msk.bf16.vlgmr.msra.gmra.mxu1 %vm308_vm2, %v1300_v29 }
 0x53f   :  { %2784 = vmatmul.mubr.msk.bf16.vlgmr.msra.gmra.mxu0 %vm308_vm2, %v1299_v46  ;;  %2800 = vmatpush3.bf16.msra.mxu1 %v1513_v50 }
 0x540   :  { %2794 = vmatpush3.bf16.msra.mxu0 %v1465_v51  ;;  %2795 = vmatprep.mubr.msk.bf16.mxu0 %vm3200_vm1, %v3199_v5 }
 0x541   :  { %v3005_v62 = vpop.eup %3004  ;;  %2805 = vmatprep.subr.bf16.mxu0 %v3199_v5  ;;  %2801 = vmatprep.mubr.msk.bf16.mxu1 %vm3200_vm1, %v3199_v5 }
 0x542   :  { %v1285_v26 = vmul.f32 %v3005_v62, %v3700_v10  ;;  %2811 = vmatprep.subr.bf16.mxu1 %v3199_v5 }
 0x543   :  { %v1241_v63 = vpop.xlane.xlu1 %1240 }
 0x544   :  { %v1301_v57 = vpack.c.bf16 %v1285_v26, %v1285_v26  ;;  %3012 = vrcp.f32 %v1241_v63 }
 0x545   :  { %v3007_v39 = vpop.eup %3006 }
 0x546   :  { %v1286_v58 = vmul.f32 %v3007_v39, %v3704_v16 }
 0x547   :  { %2796 = vmatmul.mubr.msk.bf16.vlgmr.msra.gmra.mxu0 %vm308_vm2, %v1301_v57  ;;  %v1244_v25 = vpop.xlane.xlu1 %1243 }
 0x548   :  { %2806 = vmatpush3.bf16.msra.mxu0 %v1561_v61  ;;  %v1302_v22 = vpack.c.bf16 %v1286_v58, %v1286_v58  ;;  %2807 = vmatprep.mubr.msk.bf16.mxu0 %vm3200_vm1, %v3199_v5  ;;  %3014 = vrcp.f32 %v1244_v25 }
 0x549   :  { %v3009_v10 = vpop.eup %3008  ;;  %2817 = vmatprep.subr.bf16.mxu0 %v3199_v5 }
 0x54a   :  { %v3011_v0 = vpop.eup %3010  ;;  %2802 = vmatmul.mubr.msk.bf16.vlgmr.msra.gmra.mxu1 %vm308_vm2, %v1302_v22  ;;  %v1288_v30 = vmul.f32 %v3009_v10, %v3710_v20 }
 0x54b   :  { %2812 = vmatpush3.bf16.msra.mxu1 %v1609_v1  ;;  %v1287_v23 = vmul.f32 %v3011_v0, %v3712_v33  ;;  %2813 = vmatprep.mubr.msk.bf16.mxu1 %vm3200_vm1, %v3199_v5  ;;  %v1250_v40 = vpop.xlane.xlu1 %1249 }
 0x54c   :  { %v1247_v16 = vpop.xlane.xlu0 %1246  ;;  %2823 = vmatprep.subr.bf16.mxu1 %v3199_v5  ;;  %v1304_v44 = vpack.c.bf16 %v1288_v30, %v1288_v30 }
 0x54d   :  { %3016 = vrcp.f32 %v1247_v16  ;;  %v1303_v21 = vpack.c.bf16 %v1287_v23, %v1287_v23 }
 0x54e   :  { %3018 = vrcp.f32 %v1250_v40 }
 0x54f   :  { %2808 = vmatmul.mubr.msk.bf16.vlgmr.msra.gmra.mxu0 %vm308_vm2, %v1303_v21  ;;  %v1940_v36 = vpop.permute.xlu1 %1939 }
 0x550   :  { %2818 = vmatpush3.bf16.msra.mxu0 %v1657_v42  ;;  %2819 = vmatprep.mubr.msk.bf16.mxu0 %vm3200_vm1, %v3199_v5  ;;  %v1945_v38 = vsel %vm1319_vm3, %v1940_v36, 0 }
 0x551   :  { %2829 = vmatprep.subr.bf16.mxu0 %v3199_v5  ;;  %v3013_v33 = vpop.eup %3012 }
 0x552   :  { %2814 = vmatmul.mubr.msk.bf16.vlgmr.msra.gmra.mxu1 %vm308_vm2, %v1304_v44  ;;  %v1289_v20 = vmul.f32 %v3013_v33, %v3719_v28 }
 0x553   :  { %2824 = vmatpush3.bf16.msra.mxu1 %v1705_v14  ;;  %2825 = vmatprep.mubr.msk.bf16.mxu1 %vm3200_vm1, %v3199_v5  ;;  %v1253_v41 = vpop.xlane.xlu0 %1252 }
 0x554   :  { %2835 = vmatprep.subr.bf16.mxu1 %v3199_v5  ;;  %3020 = vrcp.f32 %v1253_v41  ;;  %v1305_v2 = vpack.c.bf16 %v1289_v20, %v1289_v20 }
 0x555   :  { %v3015_v55 = vpop.eup %3014 }
 0x556   :  { %v1290_v3 = vmul.f32 %v3015_v55, %v3723_v45 }
 0x557   :  { %2820 = vmatmul.mubr.msk.bf16.vlgmr.msra.gmra.mxu0 %vm308_vm2, %v1305_v2  ;;  %v1892_v34 = vpop.permute.xlu0 %1891 }
 0x558   :  { %2830 = vmatpush3.bf16.msra.mxu0 %v1753_v6  ;;  %2831 = vmatprep.mubr.msk.bf16.mxu0 %vm3200_vm1, %v3199_v5  ;;  %v1306_v28 = vpack.c.bf16 %v1290_v3, %v1290_v3  ;;  %v1897_v37 = vsel %vm1319_vm3, %v1892_v34, 0 }
 0x559   :  { %2841 = vmatprep.subr.bf16.mxu0 %v3199_v5 }
 0x55a   :  { %v3017_v12 = vpop.eup %3016  ;;  %2826 = vmatmul.mubr.msk.bf16.vlgmr.msra.gmra.mxu1 %vm308_vm2, %v1306_v28 }
 0x55b   :  { %v3019_v17 = vpop.eup %3018  ;;  %v1291_v52 = vmul.f32 %v3017_v12, %v3729_v49  ;;  %2836 = vmatpush3.bf16.msra.mxu1 %v1801_v18  ;;  %2837 = vmatprep.mubr.msk.bf16.mxu1 %vm3200_vm1, %v3199_v5 }
 0x55c   :  { %2847 = vmatprep.subr.bf16.mxu1 %v3199_v5  ;;  %v1292_v8 = vmul.f32 %v3019_v17, %v3727_v48 }
 0x55d   :  { %v1307_v45 = vpack.c.bf16 %v1291_v52, %v1291_v52 }
 0x55e   :  { %v1308_v49 = vpack.c.bf16 %v1292_v8, %v1292_v8 }
 0x55f   :  { %2832 = vmatmul.mubr.msk.bf16.vlgmr.msra.gmra.mxu0 %vm308_vm2, %v1307_v45 }
 0x560   :  { %2842 = vmatpush3.bf16.msra.mxu0 %v1849_v19  ;;  %2843 = vmatprep.mubr.msk.bf16.mxu0 %vm3200_vm1, %v3199_v5 }
 0x561   :  { %2853 = vmatprep.subr.bf16.mxu0 %v3199_v5  ;;  %v3021_v47 = vpop.eup %3020 }
 0x562   :  { %2838 = vmatmul.mubr.msk.bf16.vlgmr.msra.gmra.mxu1 %vm308_vm2, %v1308_v49  ;;  %v1293_v48 = vmul.f32 %v3021_v47, %v3735_v56 }
 0x563   :  { %2848 = vmatpush3.bf16.msra.mxu1 %v1897_v37  ;;  %2849 = vmatprep.mubr.msk.bf16.mxu1 %vm3200_vm1, %v3199_v5 }
 0x564   :  { %v1309_v11 = vpack.c.bf16 %v1293_v48, %v1293_v48  ;;  %2859 = vmatprep.subr.bf16.mxu1 %v3199_v5 }
 0x567   :  { %2844 = vmatmul.mubr.msk.bf16.vlgmr.msra.gmra.mxu0 %vm308_vm2, %v1309_v11 }
 0x568   :  { %2854 = vmatpush3.bf16.msra.mxu0 %v1945_v38  ;;  %2855 = vmatprep.mubr.msk.bf16.mxu0 %vm3200_vm1, %v3199_v5 }
 0x569   :  { %2865 = vmatprep.subr.bf16.mxu0 %v3199_v5 }
 0x580   :  { %v1256_v24 = vpop.xlane.xlu1 %1255 }
 0x581   :  { %3022 = vrcp.f32 %v1256_v24 }
 0x584   :  { %v1262_v56 = vpop.xlane.xlu1 %1261 }
 0x588   :  { %v1259_v43 = vpop.xlane.xlu0 %1258  ;;  %v2036_v50 = vpop.permute.xlu1 %2035 }
 0x589   :  { %3024 = vrcp.f32 %v1259_v43  ;;  %v2041_v26 = vsel %vm1319_vm3, %v2036_v50, 0 }
 0x58a   :  { %3026 = vrcp.f32 %v1262_v56 }
 0x58e   :  { %v3023_v31 = vpop.eup %3022 }
 0x58f   :  { %v1294_v32 = vmul.f32 %v3023_v31, %v3757_v9 }
 0x591   :  { %v1310_v27 = vpack.c.bf16 %v1294_v32, %v1294_v32 }
 0x593   :  { %2850 = vmatmul.mubr.msk.bf16.vlgmr.msra.gmra.mxu1 %vm308_vm2, %v1310_v27 }
 0x594   :  { %2861 = vmatprep.mubr.msk.bf16.mxu1 %vm3200_vm1, %v3199_v5 }
 0x596   :  { %v3025_v4 = vpop.eup %3024 }
 0x597   :  { %v3027_v13 = vpop.eup %3026  ;;  %v1295_v46 = vmul.f32 %v3025_v4, %v3767_v15 }
 0x598   :  { %v1265_v29 = vpop.xlane.xlu0 %1264  ;;  %v1296_v62 = vmul.f32 %v3027_v13, %v3763_v35 }
 0x599   :  { %3028 = vrcp.f32 %v1265_v29  ;;  %v1311_v51 = vpack.c.bf16 %v1295_v46, %v1295_v46 }
 0x59a   :  { %v1312_v39 = vpack.c.bf16 %v1296_v62, %v1296_v62 }
 0x59b   :  { %2856 = vmatmul.mubr.msk.bf16.vlgmr.msra.gmra.mxu0 %vm308_vm2, %v1311_v51 }
 0x59c   :  { %v1988_v9 = vpop.permute.xlu0 %1987  ;;  %2866 = vmatpush3.bf16.msra.mxu0 %v2041_v26  ;;  %2867 = vmatprep.mubr.msk.bf16.mxu0 %vm3200_vm1, %v3199_v5 }
 0x59d   :  { %v1993_v63 = vsel %vm1319_vm3, %v1988_v9, 0  ;;  %v3866_v57 = vpop.f32.mrf.mxu1  ;;  %v2950_v9 = vld [vmem:[#allocation2 + $0x8] sm:$0xff]  }
 0x59e   :  { %2860 = vmatpush3.bf16.msra.mxu1 %v1993_v63 }
 0x59f   :  { %v2779_v15 = vpop.f32.mrf.mxu1  ;;  %2871 = vmatprep.subr.bf16.mxu1 %v2950_v9 }
 0x5a1   :  { %v1360_v58 = vpop.f32.mrf.mxu1  ;;  %2862 = vmatmul.mubr.msk.bf16.vlgmr.msra.gmra.mxu1 %vm308_vm2, %v1312_v39 }
 0x5a2   :  { %2872 = vmatpush3.bf16.msra.mxu1 %v2950_v9 }
 0x5a3   :  { %v2780_v35 = vpop.f32.mrf.mxu1 }
 0x5a6   :  { %v3029_v61 = vpop.eup %3028 }
 0x5a7   :  { %v1297_v25 = vmul.f32 %v3029_v61, %v3772_v7 }
 0x5a9   :  { %v1313_v22 = vpack.c.bf16 %v1297_v25, %v1297_v25 }
 0x5ab   :  { %2868 = vmatmul.mubr.msk.bf16.vlgmr.msra.gmra.mxu0 %vm308_vm2, %v1313_v22 }
 0x5fe   :  { %v1453_v10 = vpop.f32.mrf.mxu1 }
 0x5ff   :  { %v1405_v0 = vpop.f32.mrf.mxu0 }
 0x600   :  { %v2791_v1 = vpop.f32.mrf.mxu1 }
 0x601   :  { %v2785_v23 = vpop.f32.mrf.mxu0 }
 0x602   :  { %v1456_v16 = vpop.f32.mrf.mxu1 }
 0x603   :  { %v1408_v40 = vpop.f32.mrf.mxu0 }
 0x604   :  { %v2792_v5 = vpop.f32.mrf.mxu1 }
 0x605   :  { %v2786_v30 = vpop.f32.mrf.mxu0 }
 0x607   :  { %v1501_v21 = vpop.f32.mrf.mxu0 }
 0x609   :  { %v2797_v42 = vpop.f32.mrf.mxu0 }
 0x60a   :  { %v3873_v44 = vpop.f32.mrf.mxu1 }
 0x60b   :  { %v1504_v33 = vpop.f32.mrf.mxu0 }
 0x60c   :  { %v2803_v14 = vpop.f32.mrf.mxu1 }
 0x60d   :  { %v2798_v20 = vpop.f32.mrf.mxu0 }
 0x60e   :  { %v1552_v41 = vpop.f32.mrf.mxu1 }
 0x60f   :  { %v1597_v7 = vpop.f32.mrf.mxu0 }
 0x610   :  { %v2918_v2 = vpack.i.bf16 %v1597_v7, %v1405_v0  ;;  %v2804_v55 = vpop.f32.mrf.mxu1 }
 0x611   :  { %v2809_v6 = vpop.f32.mrf.mxu0 }
 0x612   :  { %2919 = vrot.lane.b32.xlu0 %v2918_v2, %s3202_s5  ;;  %v1645_v3 = vpop.f32.mrf.mxu1 }
 0x613   :  { %v1600_v28 = vpop.f32.mrf.mxu0  ;;  %v2923_v12 = vpack.i.bf16 %v1645_v3, %v1453_v10  ;;  %v2951_v10 = vld [vmem:[#allocation2] sm:$0xff]  }
 0x614   :  { %v2815_v17 = vpop.f32.mrf.mxu1  ;;  %2873 = vmatprep.subr.bf16.mxu1 %v2951_v10 }
 0x615   :  { %v2810_v18 = vpop.f32.mrf.mxu0  ;;  %2874 = vmatpush3.bf16.msra.mxu1 %v2951_v10 }
 0x616   :  { %2924 = vrot.lane.b32.xlu0 %v2923_v12, %s3203_s2  ;;  %v1648_v52 = vpop.f32.mrf.mxu1 }
 0x617   :  { %v1693_v45 = vpop.f32.mrf.mxu0 }
 0x618   :  { %v2928_v8 = vpack.i.bf16 %v1693_v45, %v1501_v21  ;;  %v2816_v19 = vpop.f32.mrf.mxu1 }
 0x619   :  { %v2821_v34 = vpop.f32.mrf.mxu0 }
 0x61a   :  { %2929 = vrot.lane.b32.xlu0 %v2928_v8, %s3204_s29  ;;  %v3878_v47 = vpop.f32.mrf.mxu1 }
 0x61b   :  { %v1696_v49 = vpop.f32.mrf.mxu0 }
 0x61c   :  { %v2827_v48 = vpop.f32.mrf.mxu1 }
 0x61d   :  { %v2822_v37 = vpop.f32.mrf.mxu0 }
 0x61e   :  { %v1744_v36 = vpop.f32.mrf.mxu1 }
 0x61f   :  { %v1789_v11 = vpop.f32.mrf.mxu0 }
 0x620   :  { %v2828_v38 = vpop.f32.mrf.mxu1 }
 0x621   :  { %v2833_v24 = vpop.f32.mrf.mxu0 }
 0x622   :  { %v1837_v43 = vpop.f32.mrf.mxu1 }
 0x623   :  { %v1792_v56 = vpop.f32.mrf.mxu0 }
 0x624   :  { %v2839_v32 = vpop.f32.mrf.mxu1 }
 0x625   :  { %v2834_v31 = vpop.f32.mrf.mxu0 }
 0x626   :  { %v1840_v27 = vpop.f32.mrf.mxu1 }
 0x627   :  { %v1885_v4 = vpop.f32.mrf.mxu0 }
 0x628   :  { %v2840_v13 = vpop.f32.mrf.mxu1 }
 0x629   :  { %v2845_v29 = vpop.f32.mrf.mxu0 }
 0x62b   :  { %v1888_v46 = vpop.f32.mrf.mxu0 }
 0x62d   :  { %v2846_v50 = vpop.f32.mrf.mxu0 }
 0x653   :  { %v1933_v51 = vpop.f32.mrf.mxu1 }
 0x655   :  { %v2851_v62 = vpop.f32.mrf.mxu1 }
 0x657   :  { %v1936_v26 = vpop.f32.mrf.mxu1 }
 0x659   :  { %v2852_v63 = vpop.f32.mrf.mxu1 }
 0x65b   :  { %v1981_v15 = vpop.f32.mrf.mxu0 }
 0x65c   :  { %v2933_v39 = vpack.i.bf16 %v1981_v15, %v1789_v11 }
 0x65d   :  { %v2857_v58 = vpop.f32.mrf.mxu0 }
 0x65e   :  { %2934 = vrot.lane.b32.xlu1 %v2933_v39, %s3202_s5 }
 0x65f   :  { %v1984_v35 = vpop.f32.mrf.mxu0 }
 0x661   :  { %v2029_v61 = vpop.f32.mrf.mxu1  ;;  %v2858_v25 = vpop.f32.mrf.mxu0 }
 0x662   :  { %v2938_v22 = vpack.i.bf16 %v2029_v61, %v1837_v43 }
 0x663   :  { %v2863_v0 = vpop.f32.mrf.mxu1 }
 0x664   :  { %2939 = vrot.lane.b32.xlu1 %v2938_v22, %s3203_s2 }
 0x665   :  { %v2032_v1 = vpop.f32.mrf.mxu1 }
 0x667   :  { %v2864_v23 = vpop.f32.mrf.mxu1 }
 0x66b   :  { %v2077_v16 = vpop.f32.mrf.mxu0 }
 0x66c   :  { %v2943_v40 = vpack.i.bf16 %v2077_v16, %v1885_v4  ;;  %v2566_v4 = vld [vmem:[%s3943_s3] ss:$0 sm:$0xff] }
 0x66d   :  { %v2869_v5 = vpop.f32.mrf.mxu0 }
 0x66e   :  { %2944 = vrot.lane.b32.xlu1 %v2943_v40, %s3204_s29 }
 0x66f   :  { %v2080_v30 = vpop.f32.mrf.mxu0 }
 0x671   :  { %v2870_v21 = vpop.f32.mrf.mxu0 }
 0x684   :  { %v2920_v42 = vpop.permute.xlu0 %2919 }
 0x685   :  { %v2922_v14 = vunpack.i.h.bf16 %v2920_v42  ;;  %v2921_v20 = vunpack.i.l.bf16 %v2920_v42 }
 0x687   :  { %v2132_v55 = vsel %vm308_vm2, %v3873_v44, %v2922_v14  ;;  %v2131_v6 = vsel %vm308_vm2, %v3866_v57, %v2921_v20 }
 0x688   :  { %v2925_v33 = vpop.permute.xlu0 %2924 }
 0x689   :  { %v2927_v41 = vunpack.i.h.bf16 %v2925_v33  ;;  %v2926_v7 = vunpack.i.l.bf16 %v2925_v33 }
 0x68b   :  { %v2136_v12 = vsel %vm2135_vm5, %v2131_v6, %v2926_v7  ;;  %v2137_v17 = vsel %vm2135_vm5, %v2132_v55, %v2927_v41  ;;  %v2952_v7 = vld [vmem:[#allocation10 + $0x8] sm:$0xff]  }
 0x68c   :  { %v2930_v2 = vpop.permute.xlu0 %2929  ;;  %2879 = vmatprep.subr.bf16.mxu0 %v2952_v7  ;;  %v2954_v55 = vld [vmem:[%s3950_s10 + $0x18] sm:$0xff]  }
 0x68d   :  { %v2932_v3 = vunpack.i.h.bf16 %v2930_v2  ;;  %v2931_v28 = vunpack.i.l.bf16 %v2930_v2  ;;  %v2953_v2 = vld [vmem:[#allocation10] sm:$0xff]   ;;  %2880 = vmatpush3.bf16.msra.mxu0 %v2952_v7  ;;  %2887 = vmatprep.subr.bf16.mxu1 %v2954_v55 }
 0x68e   :  { %2881 = vmatprep.subr.bf16.mxu0 %v2953_v2 }
 0x68f   :  { %v2142_v18 = vsel %vm2140_vm6, %v2137_v17, %v2932_v3  ;;  %v2141_v52 = vsel %vm2140_vm6, %v2136_v12, %v2931_v28 }
 0x690   :  { %v2145_v45 = vpack.c.bf16 %v2142_v18, %v2141_v52 }
 0x691   :  { %2882 = vmatpush3.bf16.msra.mxu0 %v2953_v2 }
 0x692   :  { %2875 = vmatprep.mubr.msk.bf16.mxu1 %vm121_vm0, %v2145_v45 }
 0x6d0   :  { %v2935_v8 = vpop.permute.xlu1 %2934 }
 0x6d1   :  { %v2937_v34 = vunpack.i.h.bf16 %v2935_v8  ;;  %v2936_v44 = vunpack.i.l.bf16 %v2935_v8 }
 0x6d3   :  { %v2134_v48 = vsel %vm308_vm2, %v1933_v51, %v2937_v34  ;;  %v2133_v36 = vsel %vm308_vm2, %v3878_v47, %v2936_v44 }
 0x6d6   :  { %v2940_v19 = vpop.permute.xlu1 %2939 }
 0x6d7   :  { %v2942_v49 = vunpack.i.h.bf16 %v2940_v19  ;;  %v2941_v37 = vunpack.i.l.bf16 %v2940_v19 }
 0x6d9   :  { %v2138_v24 = vsel %vm2135_vm5, %v2133_v36, %v2941_v37  ;;  %v2139_v56 = vsel %vm2135_vm5, %v2134_v48, %v2942_v49 }
 0x6e0   :  { %v2945_v57 = vpop.permute.xlu1 %2944 }
 0x6e1   :  { %v2947_v11 = vunpack.i.h.bf16 %v2945_v57  ;;  %v2946_v38 = vunpack.i.l.bf16 %v2945_v57  ;;  %v2571_v57 = vld [vmem:[#allocation7] ss:$0 sm:$0xff] }
 0x6e3   :  { %v2143_v43 = vsel %vm2140_vm6, %v2138_v24, %v2946_v38  ;;  %v2144_v31 = vsel %vm2140_vm6, %v2139_v56, %v2947_v11  ;;  %v2572_v56 = vld [vmem:[#allocation8] ss:$0 sm:$0xff] }
 0x6e4   :  { %v2146_v32 = vpack.c.bf16 %v2144_v31, %v2143_v43 }
 0x6e6   :  { %2876 = vmatmul.mubr.msk.bf16.vlgmr.msra.gmra.mxu1 %vm121_vm0, %v2146_v32 }
 0x6e7   :  { %2888 = vmatpush3.bf16.msra.mxu1 %v2954_v55 }
 0x7a6   :  { %v2877_v27 = vpop.f32.mrf.mxu1 }
 0x7a7   :  { %v2219_v47 = vadd.f32 %v2877_v27, %v2566_v4 }
 0x7a8   :  { %v2210_v13 = vpop.f32.mrf.mxu1 }
 0x7a9   :  { %v2211_v29 = vadd.f32 %v2566_v4, %v2210_v13  ;;  %v2227_v63 = vadd.f32 %v2219_v47, %v3330_v59 }
 0x7aa   :  { %v2878_v46 = vpop.f32.mrf.mxu1 }
 0x7ab   :  { %v2225_v50 = vadd.f32 %v2211_v29, %v3323_v53  ;;  %v2222_v62 = vadd.f32 %v2878_v46, %v2566_v4  ;;  %v2235_v58 = vsel %vm121_vm0, %v2227_v63, 0.0 }
 0x7ac   :  { %v2213_v51 = vpop.f32.mrf.mxu1 }
 0x7ad   :  { %v2214_v26 = vadd.f32 %v2566_v4, %v2213_v51  ;;  %v2229_v9 = vsel %vm121_vm0, %v2225_v50, 0.0  ;;  %v2228_v35 = vadd.f32 %v2222_v62, %v3332_v60  ;;  %v2955_v62 = vld [vmem:[%s3950_s10 + $0x10] sm:$0xff]  }
 0x7ae   :  { %2230 = vadd.xlane.f32.xlu0 %v2229_v9  ;;  %2889 = vmatprep.subr.bf16.mxu1 %v2955_v62  ;;  %v2957_v9 = vld [vmem:[%s3950_s10] sm:$0xff]  }
 0x7af   :  { %v2226_v15 = vadd.f32 %v2214_v26, %v3325_v54  ;;  %v2238_v53 = vsel %vm121_vm0, %v2228_v35, 0.0  ;;  %2890 = vmatpush3.bf16.msra.mxu1 %v2955_v62  ;;  %v2956_v26 = vld [vmem:[%s3950_s10 + $0x8] sm:$0xff]  }
 0x7b0   :  { %2891 = vmatprep.subr.bf16.mxu1 %v2956_v26 }
 0x7b1   :  { %v2232_v39 = vsel %vm121_vm0, %v2226_v15, 0.0 }
 0x7b2   :  { %2233 = vadd.xlane.f32.xlu1 %v2232_v39  ;;  %2236 = vadd.xlane.f32.xlu0 %v2235_v58  ;;  %v2573_v39 = vld [vmem:[#allocation11] ss:$0 sm:$0xff] }
 0x7b3   :  { %2892 = vmatpush3.bf16.msra.mxu1 %v2956_v26 }
 0x7b4   :  { %2893 = vmatprep.subr.bf16.mxu1 %v2957_v9 }
 0x7b6   :  { %2239 = vadd.xlane.f32.xlu0 %v2238_v53 }
 0x7b7   :  { %2894 = vmatpush3.bf16.msra.mxu1 %v2957_v9 }
 0x837   :  { %v2231_v61 = vpop.xlane.xlu0 %2230 }
 0x838   :  { %v2241_v25 = vmul.f32 0.03125, %v2231_v61 }
 0x83a   :  { %v2245_v22 = vsub.f32 %v2225_v50, %v2241_v25 }
 0x83b   :  { %v2234_v10 = vpop.xlane.xlu1 %2233  ;;  %v2237_v0 = vpop.xlane.xlu0 %2236 }
 0x83c   :  { %v2242_v59 = vmul.f32 0.03125, %v2234_v10  ;;  %v2243_v1 = vmul.f32 0.03125, %v2237_v0  ;;  %v2249_v23 = vmul.f32 %v2245_v22, %v2245_v22 }
 0x83e   :  { %v2246_v54 = vsub.f32 %v2226_v15, %v2242_v59  ;;  %v2247_v16 = vsub.f32 %v2227_v63, %v2243_v1  ;;  %v2253_v40 = vsel %vm121_vm0, %v2249_v23, 0.0 }
 0x83f   :  { %2254 = vadd.xlane.f32.xlu0 %v2253_v40  ;;  %v2240_v5 = vpop.xlane.xlu0 %2239 }
 0x840   :  { %v2244_v60 = vmul.f32 0.03125, %v2240_v5  ;;  %v2250_v30 = vmul.f32 %v2246_v54, %v2246_v54  ;;  %v2251_v21 = vmul.f32 %v2247_v16, %v2247_v16 }
 0x842   :  { %v2248_v42 = vsub.f32 %v2228_v35, %v2244_v60  ;;  %v2256_v33 = vsel %vm121_vm0, %v2250_v30, 0.0  ;;  %v2259_v14 = vsel %vm121_vm0, %v2251_v21, 0.0 }
 0x843   :  { %2257 = vadd.xlane.f32.xlu1 %v2256_v33  ;;  %2260 = vadd.xlane.f32.xlu0 %v2259_v14 }
 0x844   :  { %v2252_v20 = vmul.f32 %v2248_v42, %v2248_v42 }
 0x846   :  { %v2262_v41 = vsel %vm121_vm0, %v2252_v20, 0.0 }
 0x847   :  { %2263 = vadd.xlane.f32.xlu1 %v2262_v41 }
 0x8c8   :  { %v2255_v6 = vpop.xlane.xlu0 %2254 }
 0x8c9   :  { %v2265_v3 = vmul.f32 0.03125, %v2255_v6 }
 0x8cb   :  { %v2269_v28 = vadd.f32 1e-05, %v2265_v3 }
 0x8cc   :  { %v2258_v12 = vpop.xlane.xlu1 %2257  ;;  %v2261_v17 = vpop.xlane.xlu0 %2260 }
 0x8cd   :  { %3030 = vrsqrt.f32 %v2269_v28  ;;  %v2266_v18 = vmul.f32 0.03125, %v2258_v12  ;;  %v2267_v52 = vmul.f32 0.03125, %v2261_v17 }
 0x8cf   :  { %v2270_v45 = vadd.f32 1e-05, %v2266_v18  ;;  %v2271_v8 = vadd.f32 1e-05, %v2267_v52 }
 0x8d0   :  { %v2264_v19 = vpop.xlane.xlu1 %2263 }
 0x8d1   :  { %3032 = vrsqrt.f32 %v2270_v45  ;;  %v2268_v34 = vmul.f32 0.03125, %v2264_v19 }
 0x8d2   :  { %3034 = vrsqrt.f32 %v2271_v8 }
 0x8d3   :  { %v2272_v44 = vadd.f32 1e-05, %v2268_v34 }
 0x8d5   :  { %3036 = vrsqrt.f32 %v2272_v44 }
 0x8da   :  { %v3031_v49 = vpop.eup %3030 }
 0x8db   :  { %v2277_v37 = vmul.f32 %v3031_v49, %v2245_v22 }
 0x8dd   :  { %v2288_v38 = vmul.f32 %v2571_v57, %v2277_v37 }
 0x8de   :  { %v3033_v48 = vpop.eup %3032 }
 0x8df   :  { %v3035_v36 = vpop.eup %3034  ;;  %v2278_v11 = vmul.f32 %v3033_v48, %v2246_v54  ;;  %v2299_v27 = vadd.f32 %v2572_v56, %v2288_v38 }
 0x8e0   :  { %v2279_v24 = vmul.f32 %v3035_v36, %v2247_v16  ;;  %v2578_v16 = vld [vmem:[%s3951_s11] ss:$0 sm:$0xff]  ;;  %s3158_s11 = scalar_lea.vmem %s2498_s21, 512 }
 0x8e1   :  { %v2289_v43 = vmul.f32 %v2571_v57, %v2278_v11  ;;  %p3159_p2 = scmp.ne.s32.totalorder %s2498_s21, %s3158_s11  ;;  %p3164_p4 = scmp.lt.s32.totalorder %s3158_s11, %s3158_s11 }
 0x8e2   :  { %v3037_v31 = vpop.eup %3036  ;;  %v2290_v13 = vmul.f32 %v2571_v57, %v2279_v24 }
 0x8e3   :  { %v2280_v32 = vmul.f32 %v3037_v31, %v2248_v42  ;;  %v2300_v4 = vadd.f32 %v2572_v56, %v2289_v43  ;;  %p3165_p5 = por %p3164_p4, %p3163_p3 }
 0x8e4   :  { %v2301_v46 = vadd.f32 %v2572_v56, %v2290_v13 }
 0x8e5   :  { %v2303_v47 = vpack.c.bf16 %v2300_v4, %v2299_v27  ;;  %v2291_v29 = vmul.f32 %v2571_v57, %v2280_v32  ;;  %p3166_p6 = pnand %p3165_p5, %p3159_p2 }
 0x8e7   :  { %2883 = vmatprep.mubr.msk.bf16.mxu0 %vm121_vm0, %v2303_v47  ;;  %v2302_v50 = vadd.f32 %v2572_v56, %v2291_v29 }
 0x8e9   :  { %v2304_v51 = vpack.c.bf16 %v2302_v50, %v2301_v46 }
 0x8eb   :  { %2884 = vmatmul.mubr.msk.bf16.vlgmr.msra.gmra.mxu0 %vm121_vm0, %v2304_v51 }
 0x9ab   :  { %v2885_v63 = vpop.f32.mrf.mxu0 }
 0x9ac   :  { %v2377_v61 = vadd.f32 %v2885_v63, %v2573_v39 }
 0x9ad   :  { %v2368_v15 = vpop.f32.mrf.mxu0 }
 0x9ae   :  { %v2369_v35 = vadd.f32 %v2573_v39, %v2368_v15  ;;  %v2385_v1 = vmax.f32 %v2377_v61, 0.0 }
 0x9af   :  { %v2886_v58 = vpop.f32.mrf.mxu0 }
 0x9b0   :  { %v2380_v53 = vadd.f32 %v2886_v58, %v2573_v39  ;;  %v2383_v0 = vmax.f32 %v2369_v35, 0.0 }
 0x9b1   :  { %v2371_v25 = vpop.f32.mrf.mxu0 }
 0x9b2   :  { %v2372_v22 = vadd.f32 %v2573_v39, %v2371_v25  ;;  %v2386_v10 = vmax.f32 %v2380_v53, 0.0 }
 0x9b4   :  { %v2384_v59 = vmax.f32 %v2372_v22, 0.0  ;;  %v2388_v54 = vpack.c.bf16 %v2386_v10, %v2385_v1 }
 0x9b6   :  { %v2387_v23 = vpack.c.bf16 %v2384_v59, %v2383_v0 }
 0x9b8   :  { %2895 = vmatprep.mubr.msk.bf16.mxu1 %vm2428_vm7, %v2387_v23 }
 0x9b9   :  { %2896 = vmatmul.mubr.msk.bf16.vlgmr.msra.gmra.mxu1 %vm2428_vm7, %v2388_v54 }
 0xa79   :  { %v2897_v40 = vpop.f32.mrf.mxu1 }
 0xa7a   :  { %v2478_v5 = vadd.f32 %v2897_v40, %v2578_v16 }
 0xa7b   :  { %v2469_v60 = vpop.f32.mrf.mxu1 }
 0xa7c   :  { %v2486_v30 = vadd.f32 %v2478_v5, %v2301_v46  ;;  %v2470_v21 = vadd.f32 %v2578_v16, %v2469_v60 }
 0xa7d   :  { %v2898_v42 = vpop.f32.mrf.mxu1 }
 0xa7e   :  { %2490 = vst.msk [vmem:[#allocation13 + $0x10] sm:$0xff] %vm121_vm0, %v2486_v30  ;;  %v2484_v33 = vadd.f32 %v2470_v21, %v2299_v27  ;;  %v2481_v14 = vadd.f32 %v2898_v42, %v2578_v16 }
 0xa7f   :  { %v2472_v20 = vpop.f32.mrf.mxu1 }
 0xa80   :  { %2488 = vst.msk [vmem:[#allocation13] sm:$0xff] %vm121_vm0, %v2484_v33  ;;  %v2487_v41 = vadd.f32 %v2481_v14, %v2302_v50  ;;  %v2473_v7 = vadd.f32 %v2578_v16, %v2472_v20 }
 0xa82   :  { %2491 = vst.msk [vmem:[#allocation13 + $0x18] sm:$0xff] %vm121_vm0, %v2487_v41  ;;  %v2485_v2 = vadd.f32 %v2473_v7, %v2300_v4 }
 0xa84   :  { %2489 = vst.msk [vmem:[#allocation13 + $0x8] sm:$0xff] %vm121_vm0, %v2485_v2 }
 0xa85   :  { %3169 = shalt.err (!%p3166_p6)
}
 0xa86   :  { %s3206_s9 = smov 128  }
 0xa87   :  { %2503 = dma.vmem_to_hbm [thread:$0]  %s2498_s21, 512, %s3952_s12, [#allocation4], %s3206_s9, %s3206_s9, %s3202_s5  }
 0xa88   :  { %3186 = dma.done.wait [#allocation4], 512  }
 0xa89   :  { %3187 = vsyncadd [#allocation4], 4294966784 }
 0xa8a   :  { %2507 = vsyncpa [#allocation3], 1 }
 0xa8b   :  { %2508 = vsyncpa [#allocation6], 1 }
 0xa8c   :  { %2509 = vsyncpa [#allocation9], 1 }
 0xa8d   :  { %2510 = vsyncpa [#allocation12], 1 }
 0xa8e   :  { %2511 = vsyncpa [#allocation4], 1 }

// kernel: tpu_custom_call.1
= control target key start
LH: loop header
LB: loop body
LE: loop exit
PB: predicated region body
PF: predicated region fallthrough
CT: control target
= control target key end

     0   :  { %17 = vsyncpa [#allocation3], 0  ;;  %s3940_s0 = inlined_call_operand.vmem [shape: f32[4,8,32], index: 0, kind: input, shape index: {}]   ;;  %s3941_s1 = inlined_call_operand.vmem [shape: bf16[32,96], index: 1, kind: input, shape index: {}]   ;;  %s3942_s2 = inlined_call_operand.hbm [shape: bf16[32,32], index: 2, kind: input, shape index: {}]   ;;  %s3943_s3 = inlined_call_operand.vmem [shape: f32[1,32], index: 3, kind: input, shape index: {}]   ;;  %s3944_s4 = inlined_call_operand.vmem [shape: f32[1,32], index: 4, kind: input, shape index: {}]   ;;  %s3945_s5 = inlined_call_operand.hbm [shape: f32[1,32], index: 5, kind: input, shape index: {}]   ;;  %s3946_s6 = inlined_call_operand.hbm [shape: f32[1,32], index: 6, kind: input, shape index: {}]   ;;  %s3947_s7 = inlined_call_operand.hbm [shape: f32[1,32], index: 7, kind: input, shape index: {}]   ;;  %s3948_s8 = inlined_call_operand.hbm [shape: bf16[32,64], index: 8, kind: input, shape index: {}]   ;;  %s3949_s9 = inlined_call_operand.hbm [shape: f32[1,64], index: 9, kind: input, shape index: {}]   ;;  %s3950_s10 = inlined_call_operand.vmem [shape: bf16[64,32], index: 10, kind: input, shape index: {}]   ;;  %s3951_s11 = inlined_call_operand.vmem [shape: f32[1,32], index: 11, kind: input, shape index: {}]   ;;  %s3952_s12 = inlined_call_operand.hbm [shape: f32[4,8,32], index: 12, kind: output, shape index: {}]  }
   0x1   :  { %18 = vsyncpa [#allocation6], 0 }
   0x2   :  { %19 = vsyncpa [#allocation9], 0 }
   0x3   :  { %20 = vsyncpa [#allocation12], 0 }
   0x4   :  { %21 = vsyncpa [#allocation4], 0  ;;  %s3188_s21 = smov [#allocation5]   ;;  %s3189_s23 = smov [#allocation8]  }
   0x5   :  { %s48_s22 = sshll.u32 %s3188_s21, 4  ;;  %s68_s24 = sshll.u32 %s3189_s23, 4  ;;  %s49_s22 = int_to_ptr.vmem [resolvable:$true] %s48_s22  ;;  %s69_s24 = int_to_ptr.vmem [resolvable:$true] %s68_s24 }
   0x6   :  { %s3046_s25 = scalar_lea.vmem %s49_s22, 16  ;;  %s3050_s26 = scalar_lea.vmem %s49_s22, 32 }
   0x7   :  { %p3047_p0 = scmp.ne.s32.totalorder %s49_s22, %s3046_s25  ;;  %p3051_p1 = scmp.lt.s32.totalorder %s49_s22, %s49_s22 }
   0x8   :  { %p3052_p2 = scmp.lt.s32.totalorder %s3050_s26, %s3046_s25 }
   0xa   :  { %p3053_p3 = por %p3052_p2, %p3051_p1 }
   0xc   :  { %p3054_p4 = pnand %p3053_p3, %p3047_p0 }
   0xe   :  { %3057 = shalt.err (!%p3054_p4)
}
   0xf   :  { %51 = dma.hbm_to_vmem [thread:$0]  %s3945_s5, 16, %s49_s22, [#allocation6]  }
  0x10   :  { %s3066_s29 = scalar_lea.vmem %s69_s24, 16  ;;  %s3070_s30 = scalar_lea.vmem %s69_s24, 32 }
  0x11   :  { %p3067_p5 = scmp.ne.s32.totalorder %s69_s24, %s3066_s29  ;;  %p3071_p6 = scmp.lt.s32.totalorder %s69_s24, %s69_s24 }
  0x12   :  { %p3072_p7 = scmp.lt.s32.totalorder %s3070_s30, %s3066_s29 }
  0x14   :  { %p3073_p8 = por %p3072_p7, %p3071_p6 }
  0x16   :  { %p3074_p9 = pnand %p3073_p8, %p3067_p5 }
  0x18   :  { %3077 = shalt.err (!%p3074_p9)
}
  0x19   :  { %71 = dma.hbm_to_vmem [thread:$0]  %s3947_s7, 16, %s69_s24, [#allocation9]  }
  0x1a   :  { %s3190_s15 = smov [#allocation2]  }
  0x1b   :  { %s31_s16 = sshll.u32 %s3190_s15, 4  ;;  %s32_s16 = int_to_ptr.vmem [resolvable:$true] %s31_s16 }
  0x1c   :  { %s3086_s17 = scalar_lea.vmem %s32_s16, 256  ;;  %p3091_p11 = scmp.lt.s32.totalorder %s32_s16, %s32_s16 }
  0x1d   :  { %p3087_p10 = scmp.ne.s32.totalorder %s32_s16, %s3086_s17  ;;  %p3092_p12 = scmp.lt.s32.totalorder %s3086_s17, %s3086_s17 }
  0x1f   :  { %p3093_p13 = por %p3092_p12, %p3091_p11 }
  0x21   :  { %p3094_p0 = pnand %p3093_p13, %p3087_p10 }
  0x23   :  { %3097 = shalt.err (!%p3094_p0)
}
  0x24   :  { %s3191_s5 = smov 64   ;;  %s3192_s18 = smov 4  }
  0x25   :  { %37 = dma.hbm_to_vmem [thread:$0]  %s3942_s2, 256, %s32_s16, [#allocation3], %s3191_s5, %s3191_s5, %s3192_s18  }
  0x26   :  { %s3193_s21 = smov [#allocation7]   ;;  %s3194_s22 = smov [#allocation10]  }
  0x27   :  { %s58_s7 = sshll.u32 %s3193_s21, 4  ;;  %s77_s23 = sshll.u32 %s3194_s22, 4  ;;  %s59_s7 = int_to_ptr.vmem [resolvable:$true] %s58_s7  ;;  %s78_s23 = int_to_ptr.vmem [resolvable:$true] %s77_s23 }
  0x28   :  { %s3106_s24 = scalar_lea.vmem %s59_s7, 16  ;;  %s3110_s25 = scalar_lea.vmem %s59_s7, 32 }
  0x29   :  { %p3107_p1 = scmp.ne.s32.totalorder %s59_s7, %s3106_s24  ;;  %p3111_p2 = scmp.lt.s32.totalorder %s59_s7, %s59_s7 }
  0x2a   :  { %p3112_p3 = scmp.lt.s32.totalorder %s3110_s25, %s3106_s24 }
  0x2c   :  { %p3113_p4 = por %p3112_p3, %p3111_p2 }
  0x2e   :  { %p3114_p5 = pnand %p3113_p4, %p3107_p1 }
  0x30   :  { %3117 = shalt.err (!%p3114_p5)
}
  0x31   :  { %61 = dma.hbm_to_vmem [thread:$0]  %s3946_s6, 16, %s59_s7, [#allocation6]  }
  0x32   :  { %s3126_s28 = scalar_lea.vmem %s78_s23, 256  ;;  %p3131_p7 = scmp.lt.s32.totalorder %s78_s23, %s78_s23 }
  0x33   :  { %p3127_p6 = scmp.ne.s32.totalorder %s78_s23, %s3126_s28  ;;  %p3132_p8 = scmp.lt.s32.totalorder %s3126_s28, %s3126_s28 }
  0x35   :  { %p3133_p9 = por %p3132_p8, %p3131_p7 }
  0x37   :  { %p3134_p10 = pnand %p3133_p9, %p3127_p6 }
  0x39   :  { %3137 = shalt.err (!%p3134_p10)
}
  0x3a   :  { %83 = dma.hbm_to_vmem [thread:$0]  %s3948_s8, 256, %s78_s23, [#allocation9], %s3191_s5, %s3191_s5, %s3192_s18  }
  0x3b   :  { %s3195_s30 = smov [#allocation11]  }
  0x3c   :  { %s90_s13 = sshll.u32 %s3195_s30, 4  ;;  %s91_s13 = int_to_ptr.vmem [resolvable:$true] %s90_s13 }
  0x3d   :  { %s3146_s14 = scalar_lea.vmem %s91_s13, 16  ;;  %s3150_s6 = scalar_lea.vmem %s91_s13, 32 }
  0x3e   :  { %p3147_p11 = scmp.ne.s32.totalorder %s91_s13, %s3146_s14  ;;  %p3151_p12 = scmp.lt.s32.totalorder %s91_s13, %s91_s13 }
  0x3f   :  { %p3152_p13 = scmp.lt.s32.totalorder %s3150_s6, %s3146_s14 }
  0x41   :  { %p3153_p0 = por %p3152_p13, %p3151_p12 }
  0x43   :  { %p3154_p1 = pnand %p3153_p0, %p3147_p11 }
  0x45   :  { %3157 = shalt.err (!%p3154_p1)
}
  0x46   :  { %93 = dma.hbm_to_vmem [thread:$0]  %s3949_s9, 16, %s91_s13, [#allocation12]  }
  0x47   :  { %3178 = dma.done.wait [#allocation3], 256  }
  0x48   :  { %3179 = vsyncadd [#allocation3], 4294967040 }
  0x49   :  { %3180 = dma.done.wait [#allocation6], 32  }
  0x4a   :  { %3181 = vsyncadd [#allocation6], 4294967264 }
  0x4b   :  { %3182 = dma.done.wait [#allocation9], 272  }
  0x4c   :  { %3183 = vsyncadd [#allocation9], 4294967024 }
  0x4d   :  { %3184 = dma.done.wait [#allocation12], 16  }
  0x4e   :  { %3185 = vsyncadd [#allocation12], 4294967280  ;;  %vm121_vm0 = vcmask 261120   ;;  %v117_v0 = vld [vmem:[%s3940_s0] sm:$0xff]  ;;  %v119_v1 = vld [vmem:[%s3940_s0 + $0x10] sm:$0xff]  ;;  %s3197_s26 = smov 120  }
  0x4f   :  { %v118_v2 = vld [vmem:[%s3940_s0 + $0x8] sm:$0xff]  ;;  %v122_v3 = vsel %vm121_vm0, %v117_v0, 0.0  ;;  %v128_v4 = vsel %vm121_vm0, %v119_v1, 0.0  ;;  %v120_v5 = vld [vmem:[%s3940_s0 + $0x18] sm:$0xff]  ;;  %v2949_v29 = vld [vmem:[%s3941_s1] sm:$0xff]   ;;  %s3198_s27 = smov 104  }
  0x50   :  { %123 = vadd.xlane.f32.xlu0 %v122_v3  ;;  %129 = vadd.xlane.f32.xlu1 %v128_v4  ;;  %v125_v6 = vsel %vm121_vm0, %v118_v2, 0.0  ;;  %v131_v7 = vsel %vm121_vm0, %v120_v5, 0.0  ;;  %v2948_v28 = vld [vmem:[%s3941_s1 + $0x8] sm:$0xff]   ;;  %v2512_v44 = vld [vmem:[%s3944_s4] ss:$0 sm:$0xff]  ;;  %s3196_s4 = smov 112  }
  0x51   :  { %2671 = vmatprep.subr.bf16.mxu0 %v2948_v28  ;;  %v2513_v49 = vld [vmem:[#allocation5] ss:$0 sm:$0xff]  ;;  %vm3200_vm1 = vmmov 0   ;;  %s3201_s28 = smov 96   ;;  %vm308_vm2 = vcmask 64512   ;;  %vm1319_vm3 = vcmask 1043456  }
  0x52   :  { %2672 = vmatpush3.bf16.msra.mxu0 %v2948_v28  ;;  %s3203_s2 = smov 16   ;;  %s3204_s29 = smov 24   ;;  %vm2135_vm5 = vcmask 130048   ;;  %vm2140_vm6 = vcmask 195584   ;;  %vm2428_vm7 = vcmask 523264  }
  0x53   :  { %2673 = vmatprep.subr.bf16.mxu0 %v2949_v29  ;;  %s3205_s20 = smov [#allocation13]  }
  0x54   :  { %126 = vadd.xlane.f32.xlu0 %v125_v6  ;;  %132 = vadd.xlane.f32.xlu1 %v131_v7  ;;  %s2497_s21 = sshll.u32 %s3205_s20, 4  ;;  %s2498_s21 = int_to_ptr.vmem [resolvable:$true] %s2497_s21 }
  0x55   :  { %p3163_p3 = scmp.lt.s32.totalorder %s2498_s21, %s2498_s21 }
  0x56   :  { %2674 = vmatpush3.bf16.msra.mxu0 %v2949_v29 }
  0xd9   :  { %v124_v8 = vpop.xlane.xlu0 %123  ;;  %v130_v9 = vpop.xlane.xlu1 %129 }
  0xda   :  { %v135_v10 = vmul.f32 0.03125, %v124_v8  ;;  %v137_v11 = vmul.f32 0.03125, %v130_v9 }
  0xdc   :  { %v139_v12 = vsub.f32 %v117_v0, %v135_v10  ;;  %v141_v13 = vsub.f32 %v119_v1, %v137_v11 }
  0xdd   :  { %v127_v14 = vpop.xlane.xlu0 %126  ;;  %v133_v15 = vpop.xlane.xlu1 %132 }
  0xde   :  { %v136_v16 = vmul.f32 0.03125, %v127_v14  ;;  %v138_v17 = vmul.f32 0.03125, %v133_v15  ;;  %v143_v18 = vmul.f32 %v139_v12, %v139_v12  ;;  %v145_v19 = vmul.f32 %v141_v13, %v141_v13 }
  0xe0   :  { %v140_v20 = vsub.f32 %v118_v2, %v136_v16  ;;  %v142_v21 = vsub.f32 %v120_v5, %v138_v17  ;;  %v147_v22 = vsel %vm121_vm0, %v143_v18, 0.0  ;;  %v153_v23 = vsel %vm121_vm0, %v145_v19, 0.0 }
  0xe1   :  { %148 = vadd.xlane.f32.xlu0 %v147_v22  ;;  %v3199_v5 = vmov 0.0  }
  0xe2   :  { %v144_v24 = vmul.f32 %v140_v20, %v140_v20  ;;  %v146_v25 = vmul.f32 %v142_v21, %v142_v21  ;;  %2679 = vmatprep.subr.bf16.mxu1 %v3199_v5  ;;  %2685 = vmatprep.subr.bf16.mxu0 %v3199_v5 }
  0xe3   :  { %2681 = vmatprep.mubr.msk.bf16.mxu1 %vm3200_vm1, %v3199_v5 }
  0xe4   :  { %v150_v26 = vsel %vm121_vm0, %v144_v24, 0.0  ;;  %v156_v27 = vsel %vm121_vm0, %v146_v25, 0.0 }
  0xe5   :  { %154 = vadd.xlane.f32.xlu0 %v153_v23  ;;  %151 = vadd.xlane.f32.xlu1 %v150_v26 }
  0xe9   :  { %157 = vadd.xlane.f32.xlu1 %v156_v27 }
 0x16a   :  { %v149_v30 = vpop.xlane.xlu0 %148 }
 0x16b   :  { %v159_v31 = vmul.f32 0.03125, %v149_v30 }
 0x16d   :  { %v163_v32 = vadd.f32 1e-05, %v159_v31 }
 0x16e   :  { %v152_v33 = vpop.xlane.xlu1 %151  ;;  %v155_v34 = vpop.xlane.xlu0 %154 }
 0x16f   :  { %2958 = vrsqrt.f32 %v163_v32  ;;  %v160_v35 = vmul.f32 0.03125, %v152_v33  ;;  %v161_v36 = vmul.f32 0.03125, %v155_v34 }
 0x171   :  { %v164_v37 = vadd.f32 1e-05, %v160_v35  ;;  %v165_v38 = vadd.f32 1e-05, %v161_v36 }
 0x172   :  { %v158_v39 = vpop.xlane.xlu1 %157 }
 0x173   :  { %2960 = vrsqrt.f32 %v164_v37  ;;  %v162_v40 = vmul.f32 0.03125, %v158_v39 }
 0x174   :  { %2962 = vrsqrt.f32 %v165_v38 }
 0x175   :  { %v166_v41 = vadd.f32 1e-05, %v162_v40 }
 0x177   :  { %2964 = vrsqrt.f32 %v166_v41 }
 0x17c   :  { %v2959_v42 = vpop.eup %2958 }
 0x17d   :  { %v171_v43 = vmul.f32 %v2959_v42, %v139_v12 }
 0x17f   :  { %v182_v48 = vmul.f32 %v2512_v44, %v171_v43 }
 0x180   :  { %v2961_v45 = vpop.eup %2960 }
 0x181   :  { %v2963_v46 = vpop.eup %2962  ;;  %v172_v47 = vmul.f32 %v2961_v45, %v140_v20  ;;  %v3323_v53 = vadd.f32 %v2513_v49, %v182_v48 }
 0x182   :  { %v173_v50 = vmul.f32 %v2963_v46, %v141_v13 }
 0x183   :  { %v183_v51 = vmul.f32 %v2512_v44, %v172_v47 }
 0x184   :  { %v2965_v52 = vpop.eup %2964  ;;  %v184_v56 = vmul.f32 %v2512_v44, %v173_v50 }
 0x185   :  { %v3325_v54 = vadd.f32 %v2513_v49, %v183_v51  ;;  %v174_v55 = vmul.f32 %v2965_v52, %v142_v21 }
 0x186   :  { %v3330_v59 = vadd.f32 %v2513_v49, %v184_v56 }
 0x187   :  { %v197_v57 = vpack.c.bf16 %v3325_v54, %v3323_v53  ;;  %v185_v58 = vmul.f32 %v2512_v44, %v174_v55 }
 0x189   :  { %2675 = vmatprep.mubr.msk.bf16.mxu0 %vm121_vm0, %v197_v57  ;;  %v3332_v60 = vadd.f32 %v2513_v49, %v185_v58 }
 0x18b   :  { %v198_v61 = vpack.c.bf16 %v3332_v60, %v3330_v59 }
 0x18d   :  { %2676 = vmatmul.mubr.msk.bf16.vlgmr.msra.gmra.mxu0 %vm121_vm0, %v198_v61 }
 0x18e   :  { %2687 = vmatprep.mubr.msk.bf16.mxu0 %vm3200_vm1, %v3199_v5 }
 0x24d   :  { %v2677_v62 = vpop.f32.mrf.mxu0 }
 0x24e   :  { %v3345_v4 = vpack.c.bf16 %v2677_v62, %v2677_v62 }
 0x24f   :  { %v255_v63 = vpop.f32.mrf.mxu0 }
 0x250   :  { %v3337_v0 = vpack.c.bf16 %v255_v63, %v255_v63 }
 0x251   :  { %v2678_v1 = vpop.f32.mrf.mxu0 }
 0x252   :  { %290 = vrot.lane.b32.xlu1 %v3337_v0, %s3196_s4  ;;  %282 = vrot.lane.b32.xlu0 %v3337_v0, %s3197_s26  ;;  %v3353_v6 = vpack.c.bf16 %v2678_v1, %v2678_v1 }
 0x253   :  { %v258_v2 = vpop.f32.mrf.mxu0 }
 0x254   :  { %v3341_v3 = vpack.c.bf16 %v258_v2, %v258_v2 }
 0x256   :  { %298 = vrot.lane.b32.xlu1 %v3337_v0, %s3198_s27  ;;  %292 = vrot.lane.b32.xlu0 %v3341_v3, %s3196_s4 }
 0x25a   :  { %286 = vrot.lane.b32.xlu0 %v3345_v4, %s3197_s26  ;;  %284 = vrot.lane.b32.xlu1 %v3341_v3, %s3197_s26 }
 0x25e   :  { %302 = vrot.lane.b32.xlu0 %v3345_v4, %s3198_s27  ;;  %300 = vrot.lane.b32.xlu1 %v3341_v3, %s3198_s27 }
 0x262   :  { %296 = vrot.lane.b32.xlu0 %v3353_v6, %s3196_s4  ;;  %294 = vrot.lane.b32.xlu1 %v3345_v4, %s3196_s4 }
 0x266   :  { %306 = vrot.lane.b32.xlu0 %v3337_v0, %s3201_s28  ;;  %288 = vrot.lane.b32.xlu1 %v3353_v6, %s3197_s26 }
 0x26a   :  { %304 = vrot.lane.b32.xlu1 %v3353_v6, %s3198_s27 }
 0x2c4   :  { %v3365_v7 = vpop.permute.xlu1 %290  ;;  %v3367_v8 = vpop.permute.xlu0 %282 }
 0x2c5   :  { %v2525_v9 = vcombine.low %v3365_v7, %v3365_v7  ;;  %v2523_v10 = vcombine.low %v3367_v8, %v3367_v8 }
 0x2c7   :  { %407 = vrot.lane.b32.xlu0 %v2525_v9, %s3201_s28  ;;  %357 = vrot.lane.b32.xlu1 %v2523_v10, %s3201_s28 }
 0x2c8   :  { %v3375_v11 = vpop.permute.xlu1 %298  ;;  %v3377_v12 = vpop.permute.xlu0 %292 }
 0x2c9   :  { %v2527_v13 = vcombine.low %v3375_v11, %v3375_v11  ;;  %v2532_v16 = vcombine.low %v3377_v12, %v3377_v12 }
 0x2cb   :  { %505 = vrot.lane.b32.xlu0 %v3341_v3, %s3201_s28  ;;  %457 = vrot.lane.b32.xlu1 %v2527_v13, %s3201_s28 }
 0x2cc   :  { %v3384_v14 = vpop.permute.xlu0 %286  ;;  %v3386_v15 = vpop.permute.xlu1 %284 }
 0x2cd   :  { %v2530_v17 = vcombine.low %v3386_v15, %v3386_v15  ;;  %v3409_v23 = vcombine.low %v3384_v14, %v3384_v14 }
 0x2cf   :  { %605 = vrot.lane.b32.xlu0 %v2532_v16, %s3201_s28  ;;  %555 = vrot.lane.b32.xlu1 %v2530_v17, %s3201_s28 }
 0x2d0   :  { %v3394_v18 = vpop.permute.xlu0 %302  ;;  %v3396_v19 = vpop.permute.xlu1 %300 }
 0x2d1   :  { %v2534_v20 = vcombine.low %v3396_v19, %v3396_v19  ;;  %v3423_v27 = vcombine.low %v3394_v18, %v3394_v18 }
 0x2d3   :  { %703 = vrot.lane.b32.xlu0 %v3345_v4, %s3201_s28  ;;  %655 = vrot.lane.b32.xlu1 %v2534_v20, %s3201_s28 }
 0x2d4   :  { %v3403_v21 = vpop.permute.xlu0 %296  ;;  %v3405_v22 = vpop.permute.xlu1 %294 }
 0x2d5   :  { %v3413_v24 = vcombine.low %v3405_v22, %v3405_v22  ;;  %v3433_v29 = vcombine.low %v3403_v21, %v3403_v21 }
 0x2d7   :  { %753 = vrot.lane.b32.xlu1 %v3409_v23, %s3201_s28  ;;  %803 = vrot.lane.b32.xlu0 %v3413_v24, %s3201_s28 }
 0x2d8   :  { %v307_v25 = vpop.permute.xlu0 %306  ;;  %v3419_v26 = vpop.permute.xlu1 %288 }
 0x2d9   :  { %v313_v28 = vsel %vm308_vm2, %v307_v25, 0  ;;  %v3437_v30 = vcombine.low %v3419_v26, %v3419_v26 }
 0x2da   :  { %2680 = vmatpush3.bf16.xpose.msra.mxu1 %v313_v28 }
 0x2db   :  { %853 = vrot.lane.b32.xlu1 %v3423_v27, %s3201_s28  ;;  %901 = vrot.lane.b32.xlu0 %v3353_v6, %s3201_s28 }
 0x2dc   :  { %2691 = vmatprep.subr.bf16.mxu1 %v3199_v5  ;;  %v3439_v31 = vpop.permute.xlu1 %304 }
 0x2dd   :  { %v3447_v32 = vcombine.low %v3439_v31, %v3439_v31 }
 0x2df   :  { %1001 = vrot.lane.b32.xlu0 %v3433_v29, %s3201_s28  ;;  %951 = vrot.lane.b32.xlu1 %v3437_v30, %s3201_s28 }
 0x2e1   :  { %2682 = vmatmul.mubr.msk.bf16.vlgmr.msra.gmra.mxu1 %vm308_vm2, %v3337_v0 }
 0x2e2   :  { %2693 = vmatprep.mubr.msk.bf16.mxu1 %vm3200_vm1, %v3199_v5 }
 0x2e3   :  { %1314 = vrot.lane.b32.xlu0 %v3337_v0, %s3191_s5  ;;  %1051 = vrot.lane.b32.xlu1 %v3447_v32, %s3201_s28 }
 0x2e7   :  { %1411 = vrot.lane.b32.xlu0 %v2525_v9, %s3191_s5  ;;  %1363 = vrot.lane.b32.xlu1 %v2523_v10, %s3191_s5  ;;  %v1099_v10 = vlaneseq }
 0x2eb   :  { %1507 = vrot.lane.b32.xlu0 %v3341_v3, %s3191_s5  ;;  %1459 = vrot.lane.b32.xlu1 %v2527_v13, %s3191_s5 }
 0x2ef   :  { %1603 = vrot.lane.b32.xlu0 %v2532_v16, %s3191_s5  ;;  %1555 = vrot.lane.b32.xlu1 %v2530_v17, %s3191_s5 }
 0x2f3   :  { %1651 = vrot.lane.b32.xlu1 %v2534_v20, %s3191_s5 }
 0x339   :  { %v408_v33 = vpop.permute.xlu0 %407  ;;  %v358_v34 = vpop.permute.xlu1 %357 }
 0x33a   :  { %v413_v35 = vsel %vm308_vm2, %v408_v33, 0  ;;  %v363_v36 = vsel %vm308_vm2, %v358_v34, 0 }
 0x33b   :  { %2686 = vmatpush3.bf16.xpose.msra.mxu0 %v363_v36  ;;  %2692 = vmatpush3.bf16.xpose.msra.mxu1 %v413_v35 }
 0x33c   :  { %2697 = vmatprep.subr.bf16.mxu0 %v3199_v5  ;;  %2703 = vmatprep.subr.bf16.mxu1 %v3199_v5 }
 0x33d   :  { %v506_v37 = vpop.permute.xlu0 %505  ;;  %v458_v38 = vpop.permute.xlu1 %457 }
 0x33e   :  { %v511_v39 = vsel %vm308_vm2, %v506_v37, 0  ;;  %v463_v40 = vsel %vm308_vm2, %v458_v38, 0 }
 0x341   :  { %v606_v41 = vpop.permute.xlu0 %605  ;;  %v556_v42 = vpop.permute.xlu1 %555 }
 0x342   :  { %2688 = vmatmul.mubr.msk.bf16.vlgmr.msra.gmra.mxu0 %vm308_vm2, %v3367_v8  ;;  %2694 = vmatmul.mubr.msk.bf16.vlgmr.msra.gmra.mxu1 %vm308_vm2, %v3365_v7  ;;  %v611_v43 = vsel %vm308_vm2, %v606_v41, 0  ;;  %v561_v44 = vsel %vm308_vm2, %v556_v42, 0 }
 0x343   :  { %2698 = vmatpush3.bf16.xpose.msra.mxu0 %v463_v40  ;;  %2704 = vmatpush3.bf16.xpose.msra.mxu1 %v511_v39 }
 0x344   :  { %2705 = vmatprep.mubr.msk.bf16.mxu1 %vm3200_vm1, %v3199_v5  ;;  %2699 = vmatprep.mubr.msk.bf16.mxu0 %vm3200_vm1, %v3199_v5 }
 0x345   :  { %2709 = vmatprep.subr.bf16.mxu0 %v3199_v5  ;;  %2715 = vmatprep.subr.bf16.mxu1 %v3199_v5  ;;  %v704_v45 = vpop.permute.xlu0 %703  ;;  %v656_v46 = vpop.permute.xlu1 %655 }
 0x346   :  { %v709_v47 = vsel %vm308_vm2, %v704_v45, 0  ;;  %v661_v48 = vsel %vm308_vm2, %v656_v46, 0 }
 0x349   :  { %v804_v49 = vpop.permute.xlu0 %803  ;;  %v754_v50 = vpop.permute.xlu1 %753 }
 0x34a   :  { %2700 = vmatmul.mubr.msk.bf16.vlgmr.msra.gmra.mxu0 %vm308_vm2, %v3375_v11  ;;  %2706 = vmatmul.mubr.msk.bf16.vlgmr.msra.gmra.mxu1 %vm308_vm2, %v3341_v3  ;;  %v809_v51 = vsel %vm308_vm2, %v804_v49, 0  ;;  %v759_v52 = vsel %vm308_vm2, %v754_v50, 0  ;;  %v1100_v11 = vshrl.u32 %v1099_v10, 7 }
 0x34b   :  { %2710 = vmatpush3.bf16.xpose.msra.mxu0 %v561_v44  ;;  %2716 = vmatpush3.bf16.xpose.msra.mxu1 %v611_v43 }
 0x34c   :  { %2717 = vmatprep.mubr.msk.bf16.mxu1 %vm3200_vm1, %v3199_v5  ;;  %2711 = vmatprep.mubr.msk.bf16.mxu0 %vm3200_vm1, %v3199_v5 }
 0x34d   :  { %2721 = vmatprep.subr.bf16.mxu0 %v3199_v5  ;;  %2727 = vmatprep.subr.bf16.mxu1 %v3199_v5  ;;  %v902_v55 = vpop.permute.xlu0 %901  ;;  %v854_v56 = vpop.permute.xlu1 %853 }
 0x34e   :  { %v907_v57 = vsel %vm308_vm2, %v902_v55, 0  ;;  %v859_v58 = vsel %vm308_vm2, %v854_v56, 0 }
 0x351   :  { %v1002_v61 = vpop.permute.xlu0 %1001  ;;  %v952_v62 = vpop.permute.xlu1 %951 }
 0x352   :  { %2712 = vmatmul.mubr.msk.bf16.vlgmr.msra.gmra.mxu0 %vm308_vm2, %v3386_v15  ;;  %2718 = vmatmul.mubr.msk.bf16.vlgmr.msra.gmra.mxu1 %vm308_vm2, %v3377_v12  ;;  %v1007_v63 = vsel %vm308_vm2, %v1002_v61, 0  ;;  %v957_v0 = vsel %vm308_vm2, %v952_v62, 0  ;;  %v1102_v12 = vand.u32 127, %v1099_v10 }
 0x353   :  { %2722 = vmatpush3.bf16.xpose.msra.mxu0 %v661_v48  ;;  %2728 = vmatpush3.bf16.xpose.msra.mxu1 %v709_v47 }
 0x354   :  { %2729 = vmatprep.mubr.msk.bf16.mxu1 %vm3200_vm1, %v3199_v5  ;;  %2723 = vmatprep.mubr.msk.bf16.mxu0 %vm3200_vm1, %v3199_v5  ;;  %vm3559_vm4 = vcmp.ge.s32.totalorder %v1100_v11, %v1102_v12 }
 0x355   :  { %2733 = vmatprep.subr.bf16.mxu0 %v3199_v5  ;;  %2739 = vmatprep.subr.bf16.mxu1 %v3199_v5  ;;  %v1315_v1 = vpop.permute.xlu0 %1314  ;;  %v1052_v2 = vpop.permute.xlu1 %1051 }
 0x356   :  { %v1321_v3 = vsel %vm1319_vm3, %v1315_v1, 0  ;;  %v1057_v7 = vsel %vm308_vm2, %v1052_v2, 0 }
 0x359   :  { %v1364_v8 = vpop.permute.xlu1 %1363 }
 0x35a   :  { %2724 = vmatmul.mubr.msk.bf16.vlgmr.msra.gmra.mxu0 %vm308_vm2, %v3396_v19  ;;  %2730 = vmatmul.mubr.msk.bf16.vlgmr.msra.gmra.mxu1 %vm308_vm2, %v3345_v4  ;;  %v1369_v9 = vsel %vm1319_vm3, %v1364_v8, 0 }
 0x35b   :  { %2734 = vmatpush3.bf16.xpose.msra.mxu0 %v759_v52  ;;  %2740 = vmatpush3.bf16.xpose.msra.mxu1 %v809_v51 }
 0x35c   :  { %2741 = vmatprep.mubr.msk.bf16.mxu1 %vm3200_vm1, %v3199_v5  ;;  %2735 = vmatprep.mubr.msk.bf16.mxu0 %vm3200_vm1, %v3199_v5 }
 0x35d   :  { %2745 = vmatprep.subr.bf16.mxu0 %v3199_v5  ;;  %2751 = vmatprep.subr.bf16.mxu1 %v3199_v5 }
 0x362   :  { %2736 = vmatmul.mubr.msk.bf16.vlgmr.msra.gmra.mxu0 %vm308_vm2, %v3384_v14  ;;  %2742 = vmatmul.mubr.msk.bf16.vlgmr.msra.gmra.mxu1 %vm308_vm2, %v3405_v22 }
 0x363   :  { %2746 = vmatpush3.bf16.xpose.msra.mxu0 %v859_v58  ;;  %2752 = vmatpush3.bf16.xpose.msra.mxu1 %v907_v57 }
 0x364   :  { %2747 = vmatprep.mubr.msk.bf16.mxu0 %vm3200_vm1, %v3199_v5  ;;  %2753 = vmatprep.mubr.msk.bf16.mxu1 %vm3200_vm1, %v3199_v5 }
 0x365   :  { %2757 = vmatprep.subr.bf16.mxu0 %v3199_v5  ;;  %2763 = vmatprep.subr.bf16.mxu1 %v3199_v5 }
 0x36a   :  { %2748 = vmatmul.mubr.msk.bf16.vlgmr.msra.gmra.mxu0 %vm308_vm2, %v3394_v18  ;;  %2754 = vmatmul.mubr.msk.bf16.vlgmr.msra.gmra.mxu1 %vm308_vm2, %v3353_v6 }
 0x36b   :  { %2758 = vmatpush3.bf16.xpose.msra.mxu0 %v957_v0  ;;  %2764 = vmatpush3.bf16.xpose.msra.mxu1 %v1007_v63 }
 0x36c   :  { %2759 = vmatprep.mubr.msk.bf16.mxu0 %vm3200_vm1, %v3199_v5  ;;  %2765 = vmatprep.mubr.msk.bf16.mxu1 %vm3200_vm1, %v3199_v5 }
 0x36d   :  { %2769 = vmatprep.subr.bf16.mxu0 %v3199_v5  ;;  %2775 = vmatprep.subr.bf16.mxu1 %v3199_v5 }
 0x372   :  { %2760 = vmatmul.mubr.msk.bf16.vlgmr.msra.gmra.mxu0 %vm308_vm2, %v3419_v26  ;;  %2766 = vmatmul.mubr.msk.bf16.vlgmr.msra.gmra.mxu1 %vm308_vm2, %v3403_v21 }
 0x373   :  { %2770 = vmatpush3.bf16.xpose.msra.mxu0 %v1057_v7  ;;  %2776 = vmatpush3.bf16.msra.mxu1 %v1321_v3 }
 0x374   :  { %2771 = vmatprep.mubr.msk.bf16.mxu0 %vm3200_vm1, %v3199_v5  ;;  %2781 = vmatprep.subr.bf16.mxu0 %v3199_v5 }
 0x375   :  { %2777 = vmatprep.mubr.msk.bf16.mxu1 %vm3200_vm1, %v3199_v5  ;;  %2787 = vmatprep.subr.bf16.mxu1 %v3199_v5 }
 0x37a   :  { %2772 = vmatmul.mubr.msk.bf16.vlgmr.msra.gmra.mxu0 %vm308_vm2, %v3439_v31 }
 0x37b   :  { %2782 = vmatpush3.bf16.msra.mxu0 %v1369_v9  ;;  %2783 = vmatprep.mubr.msk.bf16.mxu0 %vm3200_vm1, %v3199_v5 }
 0x37c   :  { %2793 = vmatprep.subr.bf16.mxu0 %v3199_v5 }
 0x3a1   :  { %v349_v14 = vpop.f32.mrf.mxu1 }
 0x3a2   :  { %v3565_v15 = vsel %vm3559_vm4, %v349_v14, -inf  ;;  %v3617_v14 = vpop.permute.xlu0 %1411 }
 0x3a3   :  { %v2683_v16 = vpop.f32.mrf.mxu1  ;;  %v1122_v17 = vsel %vm308_vm2, %v3565_v15, -inf }
 0x3a4   :  { %1123 = vmax.xlane.f32.xlu0 %v1122_v17 }
 0x3a5   :  { %v352_v18 = vpop.f32.mrf.mxu1 }
 0x3a7   :  { %v2684_v19 = vpop.f32.mrf.mxu1 }
 0x402   :  { %v399_v20 = vpop.f32.mrf.mxu0  ;;  %v449_v21 = vpop.f32.mrf.mxu1 }
 0x403   :  { %v3571_v22 = vsel %vm3559_vm4, %v399_v20, -inf  ;;  %v3575_v25 = vsel %vm3559_vm4, %v449_v21, -inf }
 0x404   :  { %v2689_v26 = vpop.f32.mrf.mxu0  ;;  %v2695_v28 = vpop.f32.mrf.mxu1  ;;  %v1128_v31 = vsel %vm308_vm2, %v3575_v25, -inf  ;;  %v1125_v33 = vsel %vm308_vm2, %v3571_v22, -inf }
 0x405   :  { %1129 = vmax.xlane.f32.xlu0 %v1128_v31  ;;  %1126 = vmax.xlane.f32.xlu1 %v1125_v33  ;;  %v3619_v26 = vpop.permute.xlu0 %1507 }
 0x406   :  { %v402_v34 = vpop.f32.mrf.mxu0  ;;  %v452_v35 = vpop.f32.mrf.mxu1 }
 0x408   :  { %v2690_v36 = vpop.f32.mrf.mxu0  ;;  %v2696_v37 = vpop.f32.mrf.mxu1 }
 0x40a   :  { %v499_v38 = vpop.f32.mrf.mxu0  ;;  %v547_v39 = vpop.f32.mrf.mxu1 }
 0x40b   :  { %v3583_v40 = vsel %vm3559_vm4, %v499_v38, -inf  ;;  %v3589_v44 = vsel %vm3559_vm4, %v547_v39, -inf }
 0x40c   :  { %v2701_v41 = vpop.f32.mrf.mxu0  ;;  %v2707_v42 = vpop.f32.mrf.mxu1  ;;  %v1131_v43 = vsel %vm308_vm2, %v3583_v40, -inf  ;;  %v1134_v49 = vsel %vm308_vm2, %v3589_v44, -inf }
 0x40d   :  { %1132 = vmax.xlane.f32.xlu0 %v1131_v43  ;;  %v3633_v42 = vpop.permute.xlu0 %1603 }
 0x40e   :  { %v502_v45 = vpop.f32.mrf.mxu0  ;;  %v550_v46 = vpop.f32.mrf.mxu1 }
 0x410   :  { %v2702_v47 = vpop.f32.mrf.mxu0  ;;  %v2708_v48 = vpop.f32.mrf.mxu1 }
 0x411   :  { %1135 = vmax.xlane.f32.xlu0 %v1134_v49 }
 0x412   :  { %v597_v50 = vpop.f32.mrf.mxu0  ;;  %v647_v51 = vpop.f32.mrf.mxu1 }
 0x413   :  { %v3595_v52 = vsel %vm3559_vm4, %v597_v50, -inf  ;;  %v3599_v55 = vsel %vm3559_vm4, %v647_v51, -inf }
 0x414   :  { %v2713_v56 = vpop.f32.mrf.mxu0  ;;  %v2719_v57 = vpop.f32.mrf.mxu1  ;;  %v1140_v58 = vsel %vm308_vm2, %v3599_v55, -inf  ;;  %v1137_v61 = vsel %vm308_vm2, %v3595_v52, -inf }
 0x415   :  { %1141 = vmax.xlane.f32.xlu0 %v1140_v58  ;;  %1138 = vmax.xlane.f32.xlu1 %v1137_v61 }
 0x416   :  { %v600_v62 = vpop.f32.mrf.mxu0  ;;  %v650_v63 = vpop.f32.mrf.mxu1 }
 0x418   :  { %v2714_v0 = vpop.f32.mrf.mxu0  ;;  %v2720_v1 = vpop.f32.mrf.mxu1 }
 0x41a   :  { %v697_v2 = vpop.f32.mrf.mxu0  ;;  %v745_v3 = vpop.f32.mrf.mxu1 }
 0x41b   :  { %v3607_v7 = vsel %vm3559_vm4, %v697_v2, -inf  ;;  %v3611_v8 = vsel %vm3559_vm4, %v745_v3, -inf }
 0x41c   :  { %v2725_v9 = vpop.f32.mrf.mxu0  ;;  %v2731_v10 = vpop.f32.mrf.mxu1  ;;  %v1146_v11 = vsel %vm308_vm2, %v3611_v8, -inf  ;;  %v1143_v12 = vsel %vm308_vm2, %v3607_v7, -inf }
 0x41d   :  { %1147 = vmax.xlane.f32.xlu0 %v1146_v11  ;;  %1144 = vmax.xlane.f32.xlu1 %v1143_v12 }
 0x41e   :  { %v700_v16 = vpop.f32.mrf.mxu0  ;;  %v748_v17 = vpop.f32.mrf.mxu1 }
 0x420   :  { %v2726_v18 = vpop.f32.mrf.mxu0  ;;  %v2732_v19 = vpop.f32.mrf.mxu1 }
 0x422   :  { %v795_v20 = vpop.f32.mrf.mxu0  ;;  %v845_v21 = vpop.f32.mrf.mxu1 }
 0x423   :  { %v3623_v28 = vsel %vm3559_vm4, %v795_v20, -inf  ;;  %v3627_v31 = vsel %vm3559_vm4, %v845_v21, -inf }
 0x424   :  { %v2737_v33 = vpop.f32.mrf.mxu0  ;;  %v2743_v34 = vpop.f32.mrf.mxu1  ;;  %v1152_v35 = vsel %vm308_vm2, %v3627_v31, -inf  ;;  %v1149_v36 = vsel %vm308_vm2, %v3623_v28, -inf }
 0x425   :  { %1153 = vmax.xlane.f32.xlu0 %v1152_v35  ;;  %1150 = vmax.xlane.f32.xlu1 %v1149_v36 }
 0x426   :  { %v798_v37 = vpop.f32.mrf.mxu0  ;;  %v848_v38 = vpop.f32.mrf.mxu1 }
 0x428   :  { %v2738_v39 = vpop.f32.mrf.mxu0  ;;  %v2744_v41 = vpop.f32.mrf.mxu1 }
 0x429   :  { %v3678_v39 = vpop.permute.xlu1 %1459 }
 0x42a   :  { %v895_v43 = vpop.f32.mrf.mxu0  ;;  %v943_v45 = vpop.f32.mrf.mxu1 }
 0x42b   :  { %v3637_v46 = vsel %vm3559_vm4, %v895_v43, -inf  ;;  %v3641_v47 = vsel %vm3559_vm4, %v943_v45, -inf }
 0x42c   :  { %v2749_v48 = vpop.f32.mrf.mxu0  ;;  %v2755_v49 = vpop.f32.mrf.mxu1  ;;  %v1158_v50 = vsel %vm308_vm2, %v3641_v47, -inf  ;;  %v1155_v51 = vsel %vm308_vm2, %v3637_v46, -inf }
 0x42d   :  { %v1124_v56 = vpop.xlane.xlu0 %1123  ;;  %1159 = vmax.xlane.f32.xlu0 %v1158_v50  ;;  %1156 = vmax.xlane.f32.xlu1 %v1155_v51 }
 0x42e   :  { %v1170_v57 = vsub.f32 %v3565_v15, %v1124_v56  ;;  %v898_v58 = vpop.f32.mrf.mxu0  ;;  %v946_v61 = vpop.f32.mrf.mxu1 }
 0x430   :  { %v1186_v62 = vmul.f32 1.442695, %v1170_v57  ;;  %v2750_v63 = vpop.f32.mrf.mxu0  ;;  %v2756_v0 = vpop.f32.mrf.mxu1 }
 0x432   :  { %2966 = vpow2.f32 %v1186_v62  ;;  %v993_v1 = vpop.f32.mrf.mxu0  ;;  %v1043_v2 = vpop.f32.mrf.mxu1 }
 0x433   :  { %v3650_v3 = vsel %vm3559_vm4, %v993_v1, -inf  ;;  %v3660_v35 = vsel %vm3559_vm4, %v1043_v2, -inf }
 0x434   :  { %v2761_v9 = vpop.f32.mrf.mxu0  ;;  %v2767_v10 = vpop.f32.mrf.mxu1  ;;  %v1161_v11 = vsel %vm308_vm2, %v3650_v3, -inf  ;;  %v1164_v36 = vsel %vm308_vm2, %v3660_v35, -inf }
 0x435   :  { %1162 = vmax.xlane.f32.xlu1 %v1161_v11 }
 0x436   :  { %v996_v12 = vpop.f32.mrf.mxu0  ;;  %v1046_v15 = vpop.f32.mrf.mxu1 }
 0x438   :  { %v2762_v16 = vpop.f32.mrf.mxu0  ;;  %v2768_v17 = vpop.f32.mrf.mxu1 }
 0x43a   :  { %v1093_v18 = vpop.f32.mrf.mxu0 }
 0x43b   :  { %v3674_v37 = vsel %vm3559_vm4, %v1093_v18, -inf }
 0x43c   :  { %v2773_v19 = vpop.f32.mrf.mxu0  ;;  %v1167_v38 = vsel %vm308_vm2, %v3674_v37, -inf }
 0x43e   :  { %v1096_v20 = vpop.f32.mrf.mxu0 }
 0x43f   :  { %v3654_v21 = vpop.eup %2966 }
 0x440   :  { %v2774_v33 = vpop.f32.mrf.mxu0  ;;  %v1218_v34 = vsel %vm308_vm2, %v3654_v21, 0.0 }
 0x441   :  { %1219 = vadd.xlane.f32.xlu0 %v1218_v34 }
 0x445   :  { %1165 = vmax.xlane.f32.xlu0 %v1164_v36 }
 0x446   :  { %1747 = vrot.lane.b32.xlu1 %v3409_v23, %s3191_s5  ;;  %v3680_v23 = vpop.permute.xlu1 %1555 }
 0x44a   :  { %1795 = vrot.lane.b32.xlu1 %v3413_v24, %s3191_s5  ;;  %v3682_v41 = vpop.permute.xlu1 %1651 }
 0x44e   :  { %1843 = vrot.lane.b32.xlu1 %v3423_v27, %s3191_s5 }
 0x45b   :  { %1699 = vrot.lane.b32.xlu0 %v3345_v4, %s3191_s5 }
 0x472   :  { %1168 = vmax.xlane.f32.xlu1 %v1167_v38 }
 0x48e   :  { %v1130_v24 = vpop.xlane.xlu0 %1129  ;;  %v1127_v43 = vpop.xlane.xlu1 %1126 }
 0x48f   :  { %v1172_v27 = vsub.f32 %v3575_v25, %v1130_v24  ;;  %v1171_v4 = vsub.f32 %v3571_v22, %v1127_v43 }
 0x491   :  { %v1190_v45 = vmul.f32 1.442695, %v1172_v27  ;;  %v1188_v13 = vmul.f32 1.442695, %v1171_v4 }
 0x493   :  { %2968 = vpow2.f32 %v1190_v45 }
 0x494   :  { %2970 = vpow2.f32 %v1188_v13 }
 0x496   :  { %v1133_v48 = vpop.xlane.xlu0 %1132 }
 0x497   :  { %v1173_v49 = vsub.f32 %v3583_v40, %v1133_v48 }
 0x499   :  { %v1192_v50 = vmul.f32 1.442695, %v1173_v49 }
 0x49a   :  { %v1136_v51 = vpop.xlane.xlu0 %1135 }
 0x49b   :  { %2972 = vpow2.f32 %v1192_v50  ;;  %v1174_v56 = vsub.f32 %v3589_v44, %v1136_v51 }
 0x49d   :  { %v1194_v57 = vmul.f32 1.442695, %v1174_v56 }
 0x49e   :  { %v1142_v58 = vpop.xlane.xlu0 %1141  ;;  %v1139_v61 = vpop.xlane.xlu1 %1138 }
 0x49f   :  { %2974 = vpow2.f32 %v1194_v57  ;;  %v1176_v25 = vsub.f32 %v3599_v55, %v1142_v58  ;;  %v1175_v22 = vsub.f32 %v3595_v52, %v1139_v61 }
 0x4a0   :  { %v3690_v62 = vpop.eup %2968 }
 0x4a1   :  { %v3692_v63 = vpop.eup %2970  ;;  %v1198_v0 = vmul.f32 1.442695, %v1176_v25  ;;  %v1196_v1 = vmul.f32 1.442695, %v1175_v22  ;;  %v1224_v40 = vsel %vm308_vm2, %v3690_v62, 0.0 }
 0x4a2   :  { %1225 = vadd.xlane.f32.xlu0 %v1224_v40  ;;  %v1221_v44 = vsel %vm308_vm2, %v3692_v63, 0.0 }
 0x4a3   :  { %2976 = vpow2.f32 %v1198_v0  ;;  %1222 = vadd.xlane.f32.xlu1 %v1221_v44  ;;  %v1417_v0 = vsel %vm1319_vm3, %v3617_v14, 0 }
 0x4a4   :  { %2978 = vpow2.f32 %v1196_v1 }
 0x4a6   :  { %v1148_v2 = vpop.xlane.xlu0 %1147  ;;  %v1145_v55 = vpop.xlane.xlu1 %1144 }
 0x4a7   :  { %v1178_v52 = vsub.f32 %v3611_v8, %v1148_v2  ;;  %v1177_v9 = vsub.f32 %v3607_v7, %v1145_v55 }
 0x4a8   :  { %v3700_v10 = vpop.eup %2972 }
 0x4a9   :  { %v1200_v11 = vmul.f32 1.442695, %v1177_v9  ;;  %v1227_v12 = vsel %vm308_vm2, %v3700_v10, 0.0  ;;  %v1202_v15 = vmul.f32 1.442695, %v1178_v52 }
 0x4aa   :  { %1228 = vadd.xlane.f32.xlu1 %v1227_v12 }
 0x4ab   :  { %2980 = vpow2.f32 %v1200_v11 }
 0x4ac   :  { %v3704_v16 = vpop.eup %2974  ;;  %2982 = vpow2.f32 %v1202_v15 }
 0x4ad   :  { %v1230_v17 = vsel %vm308_vm2, %v3704_v16, 0.0 }
 0x4ae   :  { %1231 = vadd.xlane.f32.xlu0 %v1230_v17  ;;  %v1154_v18 = vpop.xlane.xlu0 %1153  ;;  %v1151_v8 = vpop.xlane.xlu1 %1150 }
 0x4af   :  { %v1180_v7 = vsub.f32 %v3627_v31, %v1154_v18  ;;  %v1179_v19 = vsub.f32 %v3623_v28, %v1151_v8 }
 0x4b0   :  { %v3710_v20 = vpop.eup %2976 }
 0x4b1   :  { %v3712_v33 = vpop.eup %2978  ;;  %v1206_v34 = vmul.f32 1.442695, %v1180_v7  ;;  %v1204_v36 = vmul.f32 1.442695, %v1179_v19  ;;  %v1236_v38 = vsel %vm308_vm2, %v3710_v20, 0.0 }
 0x4b2   :  { %1237 = vadd.xlane.f32.xlu0 %v1236_v38  ;;  %v1233_v24 = vsel %vm308_vm2, %v3712_v33, 0.0 }
 0x4b3   :  { %2984 = vpow2.f32 %v1206_v34  ;;  %1234 = vadd.xlane.f32.xlu1 %v1233_v24 }
 0x4b4   :  { %2986 = vpow2.f32 %v1204_v36 }
 0x4b6   :  { %v1157_v43 = vpop.xlane.xlu1 %1156  ;;  %v1160_v51 = vpop.xlane.xlu0 %1159 }
 0x4b7   :  { %v1181_v31 = vsub.f32 %v3637_v46, %v1157_v43  ;;  %v1182_v1 = vsub.f32 %v3641_v47, %v1160_v51  ;;  %v1465_v51 = vsel %vm1319_vm3, %v3678_v39, 0 }
 0x4b8   :  { %v3719_v28 = vpop.eup %2980 }
 0x4b9   :  { %v1208_v27 = vmul.f32 1.442695, %v1181_v31  ;;  %v1239_v4 = vsel %vm308_vm2, %v3719_v28, 0.0  ;;  %v3723_v45 = vpop.eup %2982 }
 0x4ba   :  { %1240 = vadd.xlane.f32.xlu1 %v1239_v4  ;;  %v1242_v13 = vsel %vm308_vm2, %v3723_v45, 0.0 }
 0x4bb   :  { %2988 = vpow2.f32 %v1208_v27 }
 0x4be   :  { %1243 = vadd.xlane.f32.xlu1 %v1242_v13  ;;  %v1163_v44 = vpop.xlane.xlu1 %1162 }
 0x4bf   :  { %v1183_v14 = vsub.f32 %v3650_v3, %v1163_v44 }
 0x4c0   :  { %v3727_v48 = vpop.eup %2984 }
 0x4c1   :  { %v3729_v49 = vpop.eup %2986  ;;  %v1248_v46 = vsel %vm308_vm2, %v3727_v48, 0.0  ;;  %v1212_v55 = vmul.f32 1.442695, %v1183_v14 }
 0x4c2   :  { %v1245_v50 = vsel %vm308_vm2, %v3729_v49, 0.0  ;;  %1249 = vadd.xlane.f32.xlu1 %v1248_v46  ;;  %v3753_v52 = vpop.permute.xlu1 %1747 }
 0x4c3   :  { %1246 = vadd.xlane.f32.xlu0 %v1245_v50  ;;  %v1513_v50 = vsel %vm1319_vm3, %v3619_v26, 0 }
 0x4c6   :  { %v3755_v47 = vpop.permute.xlu1 %1795 }
 0x4c8   :  { %v3735_v56 = vpop.eup %2988 }
 0x4c9   :  { %v1251_v58 = vsel %vm308_vm2, %v3735_v56, 0.0 }
 0x4ca   :  { %v1220_v57 = vpop.xlane.xlu0 %1219  ;;  %1252 = vadd.xlane.f32.xlu0 %v1251_v58  ;;  %v3759_v11 = vpop.permute.xlu1 %1843 }
 0x4cb   :  { %2990 = vrcp.f32 %v1220_v57 }
 0x4ce   :  { %v1166_v40 = vpop.xlane.xlu0 %1165 }
 0x4d2   :  { %v3780_v34 = vpop.permute.xlu0 %1699 }
 0x4d3   :  { %1939 = vrot.lane.b32.xlu1 %v3437_v30, %s3191_s5  ;;  %v1210_v30 = vmul.f32 1.442695, %v1182_v1  ;;  %v1609_v1 = vsel %vm1319_vm3, %v3633_v42, 0  ;;  %v1657_v42 = vsel %vm1319_vm3, %v3682_v41, 0  ;;  %v1705_v14 = vsel %vm1319_vm3, %v3780_v34, 0 }
 0x4d5   :  { %2992 = vpow2.f32 %v1210_v30 }
 0x4d8   :  { %v2991_v61 = vpop.eup %2990 }
 0x4d9   :  { %v1282_v25 = vmul.f32 %v2991_v61, %v3654_v21  ;;  %v1184_v21 = vsub.f32 %v3660_v35, %v1166_v40  ;;  %v1561_v61 = vsel %vm1319_vm3, %v3680_v23, 0 }
 0x4db   :  { %v1298_v22 = vpack.c.bf16 %v1282_v25, %v1282_v25  ;;  %v1214_v2 = vmul.f32 1.442695, %v1184_v21 }
 0x4dd   :  { %2778 = vmatmul.mubr.msk.bf16.vlgmr.msra.gmra.mxu1 %vm308_vm2, %v1298_v22  ;;  %2994 = vpow2.f32 %v1214_v2 }
 0x4de   :  { %2788 = vmatpush3.bf16.msra.mxu1 %v1417_v0  ;;  %2789 = vmatprep.mubr.msk.bf16.mxu1 %vm3200_vm1, %v3199_v5  ;;  %2996 = vpow2.f32 %v1212_v55 }
 0x4df   :  { %2799 = vmatprep.subr.bf16.mxu1 %v3199_v5 }
 0x4e0   :  { %1891 = vrot.lane.b32.xlu0 %v3353_v6, %s3191_s5 }
 0x4e2   :  { %v3757_v9 = vpop.eup %2992 }
 0x4e3   :  { %v1254_v6 = vsel %vm308_vm2, %v3757_v9, 0.0 }
 0x4ea   :  { %v3763_v35 = vpop.eup %2994 }
 0x4eb   :  { %v1260_v3 = vsel %vm308_vm2, %v3763_v35, 0.0  ;;  %v3767_v15 = vpop.eup %2996 }
 0x4ec   :  { %v1257_v8 = vsel %vm308_vm2, %v3767_v15, 0.0 }
 0x4f7   :  { %1255 = vadd.xlane.f32.xlu1 %v1254_v6  ;;  %v1753_v6 = vsel %vm1319_vm3, %v3753_v52, 0 }
 0x4fb   :  { %v1169_v12 = vpop.xlane.xlu1 %1168  ;;  %1261 = vadd.xlane.f32.xlu1 %v1260_v3 }
 0x4fc   :  { %v1185_v17 = vsub.f32 %v3674_v37, %v1169_v12 }
 0x4fe   :  { %v1216_v18 = vmul.f32 1.442695, %v1185_v17 }
 0x4ff   :  { %1258 = vadd.xlane.f32.xlu0 %v1257_v8 }
 0x500   :  { %2998 = vpow2.f32 %v1216_v18  ;;  %v1801_v18 = vsel %vm1319_vm3, %v3755_v47, 0 }
 0x50c   :  { %2035 = vrot.lane.b32.xlu1 %v3447_v32, %s3191_s5 }
 0x50d   :  { %v3772_v7 = vpop.eup %2998 }
 0x50e   :  { %v1263_v19 = vsel %vm308_vm2, %v3772_v7, 0.0 }
 0x50f   :  { %1264 = vadd.xlane.f32.xlu0 %v1263_v19  ;;  %v1849_v19 = vsel %vm1319_vm3, %v3759_v11, 0 }
 0x525   :  { %1987 = vrot.lane.b32.xlu0 %v3433_v29, %s3191_s5  ;;  %s3202_s5 = smov 8  }
 0x52b   :  { %v1226_v37 = vpop.xlane.xlu0 %1225 }
 0x52c   :  { %3000 = vrcp.f32 %v1226_v37  ;;  %v1223_v36 = vpop.xlane.xlu1 %1222 }
 0x52d   :  { %3002 = vrcp.f32 %v1223_v36 }
 0x533   :  { %v1229_v38 = vpop.xlane.xlu1 %1228 }
 0x534   :  { %3004 = vrcp.f32 %v1229_v38 }
 0x537   :  { %v1232_v24 = vpop.xlane.xlu0 %1231 }
 0x538   :  { %3006 = vrcp.f32 %v1232_v24 }
 0x539   :  { %v3001_v43 = vpop.eup %3000 }
 0x53a   :  { %v3003_v31 = vpop.eup %3002  ;;  %v1284_v32 = vmul.f32 %v3001_v43, %v3690_v62 }
 0x53b   :  { %v1238_v27 = vpop.xlane.xlu0 %1237  ;;  %v1283_v4 = vmul.f32 %v3003_v31, %v3692_v63 }
 0x53c   :  { %3008 = vrcp.f32 %v1238_v27  ;;  %v1235_v13 = vpop.xlane.xlu1 %1234  ;;  %v1300_v29 = vpack.c.bf16 %v1284_v32, %v1284_v32 }
 0x53d   :  { %3010 = vrcp.f32 %v1235_v13  ;;  %v1299_v46 = vpack.c.bf16 %v1283_v4, %v1283_v4 }
 0x53e   :  { %2790 = vmatmul.mubr.msk.bf16.vlgmr.msra.gmra.mxu1 %vm308_vm2, %v1300_v29 }
 0x53f   :  { %2784 = vmatmul.mubr.msk.bf16.vlgmr.msra.gmra.mxu0 %vm308_vm2, %v1299_v46  ;;  %2800 = vmatpush3.bf16.msra.mxu1 %v1513_v50 }
 0x540   :  { %2794 = vmatpush3.bf16.msra.mxu0 %v1465_v51  ;;  %2795 = vmatprep.mubr.msk.bf16.mxu0 %vm3200_vm1, %v3199_v5 }
 0x541   :  { %v3005_v62 = vpop.eup %3004  ;;  %2805 = vmatprep.subr.bf16.mxu0 %v3199_v5  ;;  %2801 = vmatprep.mubr.msk.bf16.mxu1 %vm3200_vm1, %v3199_v5 }
 0x542   :  { %v1285_v26 = vmul.f32 %v3005_v62, %v3700_v10  ;;  %2811 = vmatprep.subr.bf16.mxu1 %v3199_v5 }
 0x543   :  { %v1241_v63 = vpop.xlane.xlu1 %1240 }
 0x544   :  { %v1301_v57 = vpack.c.bf16 %v1285_v26, %v1285_v26  ;;  %3012 = vrcp.f32 %v1241_v63 }
 0x545   :  { %v3007_v39 = vpop.eup %3006 }
 0x546   :  { %v1286_v58 = vmul.f32 %v3007_v39, %v3704_v16 }
 0x547   :  { %2796 = vmatmul.mubr.msk.bf16.vlgmr.msra.gmra.mxu0 %vm308_vm2, %v1301_v57  ;;  %v1244_v25 = vpop.xlane.xlu1 %1243 }
 0x548   :  { %2806 = vmatpush3.bf16.msra.mxu0 %v1561_v61  ;;  %v1302_v22 = vpack.c.bf16 %v1286_v58, %v1286_v58  ;;  %2807 = vmatprep.mubr.msk.bf16.mxu0 %vm3200_vm1, %v3199_v5  ;;  %3014 = vrcp.f32 %v1244_v25 }
 0x549   :  { %v3009_v10 = vpop.eup %3008  ;;  %2817 = vmatprep.subr.bf16.mxu0 %v3199_v5 }
 0x54a   :  { %v3011_v0 = vpop.eup %3010  ;;  %2802 = vmatmul.mubr.msk.bf16.vlgmr.msra.gmra.mxu1 %vm308_vm2, %v1302_v22  ;;  %v1288_v30 = vmul.f32 %v3009_v10, %v3710_v20 }
 0x54b   :  { %2812 = vmatpush3.bf16.msra.mxu1 %v1609_v1  ;;  %v1287_v23 = vmul.f32 %v3011_v0, %v3712_v33  ;;  %2813 = vmatprep.mubr.msk.bf16.mxu1 %vm3200_vm1, %v3199_v5  ;;  %v1250_v40 = vpop.xlane.xlu1 %1249 }
 0x54c   :  { %v1247_v16 = vpop.xlane.xlu0 %1246  ;;  %2823 = vmatprep.subr.bf16.mxu1 %v3199_v5  ;;  %v1304_v44 = vpack.c.bf16 %v1288_v30, %v1288_v30 }
 0x54d   :  { %3016 = vrcp.f32 %v1247_v16  ;;  %v1303_v21 = vpack.c.bf16 %v1287_v23, %v1287_v23 }
 0x54e   :  { %3018 = vrcp.f32 %v1250_v40 }
 0x54f   :  { %2808 = vmatmul.mubr.msk.bf16.vlgmr.msra.gmra.mxu0 %vm308_vm2, %v1303_v21  ;;  %v1940_v36 = vpop.permute.xlu1 %1939 }
 0x550   :  { %2818 = vmatpush3.bf16.msra.mxu0 %v1657_v42  ;;  %2819 = vmatprep.mubr.msk.bf16.mxu0 %vm3200_vm1, %v3199_v5  ;;  %v1945_v38 = vsel %vm1319_vm3, %v1940_v36, 0 }
 0x551   :  { %2829 = vmatprep.subr.bf16.mxu0 %v3199_v5  ;;  %v3013_v33 = vpop.eup %3012 }
 0x552   :  { %2814 = vmatmul.mubr.msk.bf16.vlgmr.msra.gmra.mxu1 %vm308_vm2, %v1304_v44  ;;  %v1289_v20 = vmul.f32 %v3013_v33, %v3719_v28 }
 0x553   :  { %2824 = vmatpush3.bf16.msra.mxu1 %v1705_v14  ;;  %2825 = vmatprep.mubr.msk.bf16.mxu1 %vm3200_vm1, %v3199_v5  ;;  %v1253_v41 = vpop.xlane.xlu0 %1252 }
 0x554   :  { %2835 = vmatprep.subr.bf16.mxu1 %v3199_v5  ;;  %3020 = vrcp.f32 %v1253_v41  ;;  %v1305_v2 = vpack.c.bf16 %v1289_v20, %v1289_v20 }
 0x555   :  { %v3015_v55 = vpop.eup %3014 }
 0x556   :  { %v1290_v3 = vmul.f32 %v3015_v55, %v3723_v45 }
 0x557   :  { %2820 = vmatmul.mubr.msk.bf16.vlgmr.msra.gmra.mxu0 %vm308_vm2, %v1305_v2  ;;  %v1892_v34 = vpop.permute.xlu0 %1891 }
 0x558   :  { %2830 = vmatpush3.bf16.msra.mxu0 %v1753_v6  ;;  %2831 = vmatprep.mubr.msk.bf16.mxu0 %vm3200_vm1, %v3199_v5  ;;  %v1306_v28 = vpack.c.bf16 %v1290_v3, %v1290_v3  ;;  %v1897_v37 = vsel %vm1319_vm3, %v1892_v34, 0 }
 0x559   :  { %2841 = vmatprep.subr.bf16.mxu0 %v3199_v5 }
 0x55a   :  { %v3017_v12 = vpop.eup %3016  ;;  %2826 = vmatmul.mubr.msk.bf16.vlgmr.msra.gmra.mxu1 %vm308_vm2, %v1306_v28 }
 0x55b   :  { %v3019_v17 = vpop.eup %3018  ;;  %v1291_v52 = vmul.f32 %v3017_v12, %v3729_v49  ;;  %2836 = vmatpush3.bf16.msra.mxu1 %v1801_v18  ;;  %2837 = vmatprep.mubr.msk.bf16.mxu1 %vm3200_vm1, %v3199_v5 }
 0x55c   :  { %2847 = vmatprep.subr.bf16.mxu1 %v3199_v5  ;;  %v1292_v8 = vmul.f32 %v3019_v17, %v3727_v48 }
 0x55d   :  { %v1307_v45 = vpack.c.bf16 %v1291_v52, %v1291_v52 }
 0x55e   :  { %v1308_v49 = vpack.c.bf16 %v1292_v8, %v1292_v8 }
 0x55f   :  { %2832 = vmatmul.mubr.msk.bf16.vlgmr.msra.gmra.mxu0 %vm308_vm2, %v1307_v45 }
 0x560   :  { %2842 = vmatpush3.bf16.msra.mxu0 %v1849_v19  ;;  %2843 = vmatprep.mubr.msk.bf16.mxu0 %vm3200_vm1, %v3199_v5 }
 0x561   :  { %2853 = vmatprep.subr.bf16.mxu0 %v3199_v5  ;;  %v3021_v47 = vpop.eup %3020 }
 0x562   :  { %2838 = vmatmul.mubr.msk.bf16.vlgmr.msra.gmra.mxu1 %vm308_vm2, %v1308_v49  ;;  %v1293_v48 = vmul.f32 %v3021_v47, %v3735_v56 }
 0x563   :  { %2848 = vmatpush3.bf16.msra.mxu1 %v1897_v37  ;;  %2849 = vmatprep.mubr.msk.bf16.mxu1 %vm3200_vm1, %v3199_v5 }
 0x564   :  { %v1309_v11 = vpack.c.bf16 %v1293_v48, %v1293_v48  ;;  %2859 = vmatprep.subr.bf16.mxu1 %v3199_v5 }
 0x567   :  { %2844 = vmatmul.mubr.msk.bf16.vlgmr.msra.gmra.mxu0 %vm308_vm2, %v1309_v11 }
 0x568   :  { %2854 = vmatpush3.bf16.msra.mxu0 %v1945_v38  ;;  %2855 = vmatprep.mubr.msk.bf16.mxu0 %vm3200_vm1, %v3199_v5 }
 0x569   :  { %2865 = vmatprep.subr.bf16.mxu0 %v3199_v5 }
 0x580   :  { %v1256_v24 = vpop.xlane.xlu1 %1255 }
 0x581   :  { %3022 = vrcp.f32 %v1256_v24 }
 0x584   :  { %v1262_v56 = vpop.xlane.xlu1 %1261 }
 0x588   :  { %v1259_v43 = vpop.xlane.xlu0 %1258  ;;  %v2036_v50 = vpop.permute.xlu1 %2035 }
 0x589   :  { %3024 = vrcp.f32 %v1259_v43  ;;  %v2041_v26 = vsel %vm1319_vm3, %v2036_v50, 0 }
 0x58a   :  { %3026 = vrcp.f32 %v1262_v56 }
 0x58e   :  { %v3023_v31 = vpop.eup %3022 }
 0x58f   :  { %v1294_v32 = vmul.f32 %v3023_v31, %v3757_v9 }
 0x591   :  { %v1310_v27 = vpack.c.bf16 %v1294_v32, %v1294_v32 }
 0x593   :  { %2850 = vmatmul.mubr.msk.bf16.vlgmr.msra.gmra.mxu1 %vm308_vm2, %v1310_v27 }
 0x594   :  { %2861 = vmatprep.mubr.msk.bf16.mxu1 %vm3200_vm1, %v3199_v5 }
 0x596   :  { %v3025_v4 = vpop.eup %3024 }
 0x597   :  { %v3027_v13 = vpop.eup %3026  ;;  %v1295_v46 = vmul.f32 %v3025_v4, %v3767_v15 }
 0x598   :  { %v1265_v29 = vpop.xlane.xlu0 %1264  ;;  %v1296_v62 = vmul.f32 %v3027_v13, %v3763_v35 }
 0x599   :  { %3028 = vrcp.f32 %v1265_v29  ;;  %v1311_v51 = vpack.c.bf16 %v1295_v46, %v1295_v46 }
 0x59a   :  { %v1312_v39 = vpack.c.bf16 %v1296_v62, %v1296_v62 }
 0x59b   :  { %2856 = vmatmul.mubr.msk.bf16.vlgmr.msra.gmra.mxu0 %vm308_vm2, %v1311_v51 }
 0x59c   :  { %v1988_v9 = vpop.permute.xlu0 %1987  ;;  %2866 = vmatpush3.bf16.msra.mxu0 %v2041_v26  ;;  %2867 = vmatprep.mubr.msk.bf16.mxu0 %vm3200_vm1, %v3199_v5 }
 0x59d   :  { %v1993_v63 = vsel %vm1319_vm3, %v1988_v9, 0  ;;  %v3866_v57 = vpop.f32.mrf.mxu1  ;;  %v2950_v9 = vld [vmem:[#allocation2 + $0x8] sm:$0xff]  }
 0x59e   :  { %2860 = vmatpush3.bf16.msra.mxu1 %v1993_v63 }
 0x59f   :  { %v2779_v15 = vpop.f32.mrf.mxu1  ;;  %2871 = vmatprep.subr.bf16.mxu1 %v2950_v9 }
 0x5a1   :  { %v1360_v58 = vpop.f32.mrf.mxu1  ;;  %2862 = vmatmul.mubr.msk.bf16.vlgmr.msra.gmra.mxu1 %vm308_vm2, %v1312_v39 }
 0x5a2   :  { %2872 = vmatpush3.bf16.msra.mxu1 %v2950_v9 }
 0x5a3   :  { %v2780_v35 = vpop.f32.mrf.mxu1 }
 0x5a6   :  { %v3029_v61 = vpop.eup %3028 }
 0x5a7   :  { %v1297_v25 = vmul.f32 %v3029_v61, %v3772_v7 }
 0x5a9   :  { %v1313_v22 = vpack.c.bf16 %v1297_v25, %v1297_v25 }
 0x5ab   :  { %2868 = vmatmul.mubr.msk.bf16.vlgmr.msra.gmra.mxu0 %vm308_vm2, %v1313_v22 }
 0x5fe   :  { %v1453_v10 = vpop.f32.mrf.mxu1 }
 0x5ff   :  { %v1405_v0 = vpop.f32.mrf.mxu0 }
 0x600   :  { %v2791_v1 = vpop.f32.mrf.mxu1 }
 0x601   :  { %v2785_v23 = vpop.f32.mrf.mxu0 }
 0x602   :  { %v1456_v16 = vpop.f32.mrf.mxu1 }
 0x603   :  { %v1408_v40 = vpop.f32.mrf.mxu0 }
 0x604   :  { %v2792_v5 = vpop.f32.mrf.mxu1 }
 0x605   :  { %v2786_v30 = vpop.f32.mrf.mxu0 }
 0x607   :  { %v1501_v21 = vpop.f32.mrf.mxu0 }
 0x609   :  { %v2797_v42 = vpop.f32.mrf.mxu0 }
 0x60a   :  { %v3873_v44 = vpop.f32.mrf.mxu1 }
 0x60b   :  { %v1504_v33 = vpop.f32.mrf.mxu0 }
 0x60c   :  { %v2803_v14 = vpop.f32.mrf.mxu1 }
 0x60d   :  { %v2798_v20 = vpop.f32.mrf.mxu0 }
 0x60e   :  { %v1552_v41 = vpop.f32.mrf.mxu1 }
 0x60f   :  { %v1597_v7 = vpop.f32.mrf.mxu0 }
 0x610   :  { %v2918_v2 = vpack.i.bf16 %v1597_v7, %v1405_v0  ;;  %v2804_v55 = vpop.f32.mrf.mxu1 }
 0x611   :  { %v2809_v6 = vpop.f32.mrf.mxu0 }
 0x612   :  { %2919 = vrot.lane.b32.xlu0 %v2918_v2, %s3202_s5  ;;  %v1645_v3 = vpop.f32.mrf.mxu1 }
 0x613   :  { %v1600_v28 = vpop.f32.mrf.mxu0  ;;  %v2923_v12 = vpack.i.bf16 %v1645_v3, %v1453_v10  ;;  %v2951_v10 = vld [vmem:[#allocation2] sm:$0xff]  }
 0x614   :  { %v2815_v17 = vpop.f32.mrf.mxu1  ;;  %2873 = vmatprep.subr.bf16.mxu1 %v2951_v10 }
 0x615   :  { %v2810_v18 = vpop.f32.mrf.mxu0  ;;  %2874 = vmatpush3.bf16.msra.mxu1 %v2951_v10 }
 0x616   :  { %2924 = vrot.lane.b32.xlu0 %v2923_v12, %s3203_s2  ;;  %v1648_v52 = vpop.f32.mrf.mxu1 }
 0x617   :  { %v1693_v45 = vpop.f32.mrf.mxu0 }
 0x618   :  { %v2928_v8 = vpack.i.bf16 %v1693_v45, %v1501_v21  ;;  %v2816_v19 = vpop.f32.mrf.mxu1 }
 0x619   :  { %v2821_v34 = vpop.f32.mrf.mxu0 }
 0x61a   :  { %2929 = vrot.lane.b32.xlu0 %v2928_v8, %s3204_s29  ;;  %v3878_v47 = vpop.f32.mrf.mxu1 }
 0x61b   :  { %v1696_v49 = vpop.f32.mrf.mxu0 }
 0x61c   :  { %v2827_v48 = vpop.f32.mrf.mxu1 }
 0x61d   :  { %v2822_v37 = vpop.f32.mrf.mxu0 }
 0x61e   :  { %v1744_v36 = vpop.f32.mrf.mxu1 }
 0x61f   :  { %v1789_v11 = vpop.f32.mrf.mxu0 }
 0x620   :  { %v2828_v38 = vpop.f32.mrf.mxu1 }
 0x621   :  { %v2833_v24 = vpop.f32.mrf.mxu0 }
 0x622   :  { %v1837_v43 = vpop.f32.mrf.mxu1 }
 0x623   :  { %v1792_v56 = vpop.f32.mrf.mxu0 }
 0x624   :  { %v2839_v32 = vpop.f32.mrf.mxu1 }
 0x625   :  { %v2834_v31 = vpop.f32.mrf.mxu0 }
 0x626   :  { %v1840_v27 = vpop.f32.mrf.mxu1 }
 0x627   :  { %v1885_v4 = vpop.f32.mrf.mxu0 }
 0x628   :  { %v2840_v13 = vpop.f32.mrf.mxu1 }
 0x629   :  { %v2845_v29 = vpop.f32.mrf.mxu0 }
 0x62b   :  { %v1888_v46 = vpop.f32.mrf.mxu0 }
 0x62d   :  { %v2846_v50 = vpop.f32.mrf.mxu0 }
 0x653   :  { %v1933_v51 = vpop.f32.mrf.mxu1 }
 0x655   :  { %v2851_v62 = vpop.f32.mrf.mxu1 }
 0x657   :  { %v1936_v26 = vpop.f32.mrf.mxu1 }
 0x659   :  { %v2852_v63 = vpop.f32.mrf.mxu1 }
 0x65b   :  { %v1981_v15 = vpop.f32.mrf.mxu0 }
 0x65c   :  { %v2933_v39 = vpack.i.bf16 %v1981_v15, %v1789_v11 }
 0x65d   :  { %v2857_v58 = vpop.f32.mrf.mxu0 }
 0x65e   :  { %2934 = vrot.lane.b32.xlu1 %v2933_v39, %s3202_s5 }
 0x65f   :  { %v1984_v35 = vpop.f32.mrf.mxu0 }
 0x661   :  { %v2029_v61 = vpop.f32.mrf.mxu1  ;;  %v2858_v25 = vpop.f32.mrf.mxu0 }
 0x662   :  { %v2938_v22 = vpack.i.bf16 %v2029_v61, %v1837_v43 }
 0x663   :  { %v2863_v0 = vpop.f32.mrf.mxu1 }
 0x664   :  { %2939 = vrot.lane.b32.xlu1 %v2938_v22, %s3203_s2 }
 0x665   :  { %v2032_v1 = vpop.f32.mrf.mxu1 }
 0x667   :  { %v2864_v23 = vpop.f32.mrf.mxu1 }
 0x66b   :  { %v2077_v16 = vpop.f32.mrf.mxu0 }
 0x66c   :  { %v2943_v40 = vpack.i.bf16 %v2077_v16, %v1885_v4  ;;  %v2566_v4 = vld [vmem:[%s3943_s3] ss:$0 sm:$0xff] }
 0x66d   :  { %v2869_v5 = vpop.f32.mrf.mxu0 }
 0x66e   :  { %2944 = vrot.lane.b32.xlu1 %v2943_v40, %s3204_s29 }
 0x66f   :  { %v2080_v30 = vpop.f32.mrf.mxu0 }
 0x671   :  { %v2870_v21 = vpop.f32.mrf.mxu0 }
 0x684   :  { %v2920_v42 = vpop.permute.xlu0 %2919 }
 0x685   :  { %v2922_v14 = vunpack.i.h.bf16 %v2920_v42  ;;  %v2921_v20 = vunpack.i.l.bf16 %v2920_v42 }
 0x687   :  { %v2132_v55 = vsel %vm308_vm2, %v3873_v44, %v2922_v14  ;;  %v2131_v6 = vsel %vm308_vm2, %v3866_v57, %v2921_v20 }
 0x688   :  { %v2925_v33 = vpop.permute.xlu0 %2924 }
 0x689   :  { %v2927_v41 = vunpack.i.h.bf16 %v2925_v33  ;;  %v2926_v7 = vunpack.i.l.bf16 %v2925_v33 }
 0x68b   :  { %v2136_v12 = vsel %vm2135_vm5, %v2131_v6, %v2926_v7  ;;  %v2137_v17 = vsel %vm2135_vm5, %v2132_v55, %v2927_v41  ;;  %v2952_v7 = vld [vmem:[#allocation10 + $0x8] sm:$0xff]  }
 0x68c   :  { %v2930_v2 = vpop.permute.xlu0 %2929  ;;  %2879 = vmatprep.subr.bf16.mxu0 %v2952_v7  ;;  %v2954_v55 = vld [vmem:[%s3950_s10 + $0x18] sm:$0xff]  }
 0x68d   :  { %v2932_v3 = vunpack.i.h.bf16 %v2930_v2  ;;  %v2931_v28 = vunpack.i.l.bf16 %v2930_v2  ;;  %v2953_v2 = vld [vmem:[#allocation10] sm:$0xff]   ;;  %2880 = vmatpush3.bf16.msra.mxu0 %v2952_v7  ;;  %2887 = vmatprep.subr.bf16.mxu1 %v2954_v55 }
 0x68e   :  { %2881 = vmatprep.subr.bf16.mxu0 %v2953_v2 }
 0x68f   :  { %v2142_v18 = vsel %vm2140_vm6, %v2137_v17, %v2932_v3  ;;  %v2141_v52 = vsel %vm2140_vm6, %v2136_v12, %v2931_v28 }
 0x690   :  { %v2145_v45 = vpack.c.bf16 %v2142_v18, %v2141_v52 }
 0x691   :  { %2882 = vmatpush3.bf16.msra.mxu0 %v2953_v2 }
 0x692   :  { %2875 = vmatprep.mubr.msk.bf16.mxu1 %vm121_vm0, %v2145_v45 }
 0x6d0   :  { %v2935_v8 = vpop.permute.xlu1 %2934 }
 0x6d1   :  { %v2937_v34 = vunpack.i.h.bf16 %v2935_v8  ;;  %v2936_v44 = vunpack.i.l.bf16 %v2935_v8 }
 0x6d3   :  { %v2134_v48 = vsel %vm308_vm2, %v1933_v51, %v2937_v34  ;;  %v2133_v36 = vsel %vm308_vm2, %v3878_v47, %v2936_v44 }
 0x6d6   :  { %v2940_v19 = vpop.permute.xlu1 %2939 }
 0x6d7   :  { %v2942_v49 = vunpack.i.h.bf16 %v2940_v19  ;;  %v2941_v37 = vunpack.i.l.bf16 %v2940_v19 }
 0x6d9   :  { %v2138_v24 = vsel %vm2135_vm5, %v2133_v36, %v2941_v37  ;;  %v2139_v56 = vsel %vm2135_vm5, %v2134_v48, %v2942_v49 }
 0x6e0   :  { %v2945_v57 = vpop.permute.xlu1 %2944 }
 0x6e1   :  { %v2947_v11 = vunpack.i.h.bf16 %v2945_v57  ;;  %v2946_v38 = vunpack.i.l.bf16 %v2945_v57  ;;  %v2571_v57 = vld [vmem:[#allocation7] ss:$0 sm:$0xff] }
 0x6e3   :  { %v2143_v43 = vsel %vm2140_vm6, %v2138_v24, %v2946_v38  ;;  %v2144_v31 = vsel %vm2140_vm6, %v2139_v56, %v2947_v11  ;;  %v2572_v56 = vld [vmem:[#allocation8] ss:$0 sm:$0xff] }
 0x6e4   :  { %v2146_v32 = vpack.c.bf16 %v2144_v31, %v2143_v43 }
 0x6e6   :  { %2876 = vmatmul.mubr.msk.bf16.vlgmr.msra.gmra.mxu1 %vm121_vm0, %v2146_v32 }
 0x6e7   :  { %2888 = vmatpush3.bf16.msra.mxu1 %v2954_v55 }
 0x7a6   :  { %v2877_v27 = vpop.f32.mrf.mxu1 }
 0x7a7   :  { %v2219_v47 = vadd.f32 %v2877_v27, %v2566_v4 }
 0x7a8   :  { %v2210_v13 = vpop.f32.mrf.mxu1 }
 0x7a9   :  { %v2211_v29 = vadd.f32 %v2566_v4, %v2210_v13  ;;  %v2227_v63 = vadd.f32 %v2219_v47, %v3330_v59 }
 0x7aa   :  { %v2878_v46 = vpop.f32.mrf.mxu1 }
 0x7ab   :  { %v2225_v50 = vadd.f32 %v2211_v29, %v3323_v53  ;;  %v2222_v62 = vadd.f32 %v2878_v46, %v2566_v4  ;;  %v2235_v58 = vsel %vm121_vm0, %v2227_v63, 0.0 }
 0x7ac   :  { %v2213_v51 = vpop.f32.mrf.mxu1 }
 0x7ad   :  { %v2214_v26 = vadd.f32 %v2566_v4, %v2213_v51  ;;  %v2229_v9 = vsel %vm121_vm0, %v2225_v50, 0.0  ;;  %v2228_v35 = vadd.f32 %v2222_v62, %v3332_v60  ;;  %v2955_v62 = vld [vmem:[%s3950_s10 + $0x10] sm:$0xff]  }
 0x7ae   :  { %2230 = vadd.xlane.f32.xlu0 %v2229_v9  ;;  %2889 = vmatprep.subr.bf16.mxu1 %v2955_v62  ;;  %v2957_v9 = vld [vmem:[%s3950_s10] sm:$0xff]  }
 0x7af   :  { %v2226_v15 = vadd.f32 %v2214_v26, %v3325_v54  ;;  %v2238_v53 = vsel %vm121_vm0, %v2228_v35, 0.0  ;;  %2890 = vmatpush3.bf16.msra.mxu1 %v2955_v62  ;;  %v2956_v26 = vld [vmem:[%s3950_s10 + $0x8] sm:$0xff]  }
 0x7b0   :  { %2891 = vmatprep.subr.bf16.mxu1 %v2956_v26 }
 0x7b1   :  { %v2232_v39 = vsel %vm121_vm0, %v2226_v15, 0.0 }
 0x7b2   :  { %2233 = vadd.xlane.f32.xlu1 %v2232_v39  ;;  %2236 = vadd.xlane.f32.xlu0 %v2235_v58  ;;  %v2573_v39 = vld [vmem:[#allocation11] ss:$0 sm:$0xff] }
 0x7b3   :  { %2892 = vmatpush3.bf16.msra.mxu1 %v2956_v26 }
 0x7b4   :  { %2893 = vmatprep.subr.bf16.mxu1 %v2957_v9 }
 0x7b6   :  { %2239 = vadd.xlane.f32.xlu0 %v2238_v53 }
 0x7b7   :  { %2894 = vmatpush3.bf16.msra.mxu1 %v2957_v9 }
 0x837   :  { %v2231_v61 = vpop.xlane.xlu0 %2230 }
 0x838   :  { %v2241_v25 = vmul.f32 0.03125, %v2231_v61 }
 0x83a   :  { %v2245_v22 = vsub.f32 %v2225_v50, %v2241_v25 }
 0x83b   :  { %v2234_v10 = vpop.xlane.xlu1 %2233  ;;  %v2237_v0 = vpop.xlane.xlu0 %2236 }
 0x83c   :  { %v2242_v59 = vmul.f32 0.03125, %v2234_v10  ;;  %v2243_v1 = vmul.f32 0.03125, %v2237_v0  ;;  %v2249_v23 = vmul.f32 %v2245_v22, %v2245_v22 }
 0x83e   :  { %v2246_v54 = vsub.f32 %v2226_v15, %v2242_v59  ;;  %v2247_v16 = vsub.f32 %v2227_v63, %v2243_v1  ;;  %v2253_v40 = vsel %vm121_vm0, %v2249_v23, 0.0 }
 0x83f   :  { %2254 = vadd.xlane.f32.xlu0 %v2253_v40  ;;  %v2240_v5 = vpop.xlane.xlu0 %2239 }
 0x840   :  { %v2244_v60 = vmul.f32 0.03125, %v2240_v5  ;;  %v2250_v30 = vmul.f32 %v2246_v54, %v2246_v54  ;;  %v2251_v21 = vmul.f32 %v2247_v16, %v2247_v16 }
 0x842   :  { %v2248_v42 = vsub.f32 %v2228_v35, %v2244_v60  ;;  %v2256_v33 = vsel %vm121_vm0, %v2250_v30, 0.0  ;;  %v2259_v14 = vsel %vm121_vm0, %v2251_v21, 0.0 }
 0x843   :  { %2257 = vadd.xlane.f32.xlu1 %v2256_v33  ;;  %2260 = vadd.xlane.f32.xlu0 %v2259_v14 }
 0x844   :  { %v2252_v20 = vmul.f32 %v2248_v42, %v2248_v42 }
 0x846   :  { %v2262_v41 = vsel %vm121_vm0, %v2252_v20, 0.0 }
 0x847   :  { %2263 = vadd.xlane.f32.xlu1 %v2262_v41 }
 0x8c8   :  { %v2255_v6 = vpop.xlane.xlu0 %2254 }
 0x8c9   :  { %v2265_v3 = vmul.f32 0.03125, %v2255_v6 }
 0x8cb   :  { %v2269_v28 = vadd.f32 1e-05, %v2265_v3 }
 0x8cc   :  { %v2258_v12 = vpop.xlane.xlu1 %2257  ;;  %v2261_v17 = vpop.xlane.xlu0 %2260 }
 0x8cd   :  { %3030 = vrsqrt.f32 %v2269_v28  ;;  %v2266_v18 = vmul.f32 0.03125, %v2258_v12  ;;  %v2267_v52 = vmul.f32 0.03125, %v2261_v17 }
 0x8cf   :  { %v2270_v45 = vadd.f32 1e-05, %v2266_v18  ;;  %v2271_v8 = vadd.f32 1e-05, %v2267_v52 }
 0x8d0   :  { %v2264_v19 = vpop.xlane.xlu1 %2263 }
 0x8d1   :  { %3032 = vrsqrt.f32 %v2270_v45  ;;  %v2268_v34 = vmul.f32 0.03125, %v2264_v19 }
 0x8d2   :  { %3034 = vrsqrt.f32 %v2271_v8 }
 0x8d3   :  { %v2272_v44 = vadd.f32 1e-05, %v2268_v34 }
 0x8d5   :  { %3036 = vrsqrt.f32 %v2272_v44 }
 0x8da   :  { %v3031_v49 = vpop.eup %3030 }
 0x8db   :  { %v2277_v37 = vmul.f32 %v3031_v49, %v2245_v22 }
 0x8dd   :  { %v2288_v38 = vmul.f32 %v2571_v57, %v2277_v37 }
 0x8de   :  { %v3033_v48 = vpop.eup %3032 }
 0x8df   :  { %v3035_v36 = vpop.eup %3034  ;;  %v2278_v11 = vmul.f32 %v3033_v48, %v2246_v54  ;;  %v2299_v27 = vadd.f32 %v2572_v56, %v2288_v38 }
 0x8e0   :  { %v2279_v24 = vmul.f32 %v3035_v36, %v2247_v16  ;;  %v2578_v16 = vld [vmem:[%s3951_s11] ss:$0 sm:$0xff]  ;;  %s3158_s11 = scalar_lea.vmem %s2498_s21, 512 }
 0x8e1   :  { %v2289_v43 = vmul.f32 %v2571_v57, %v2278_v11  ;;  %p3159_p2 = scmp.ne.s32.totalorder %s2498_s21, %s3158_s11  ;;  %p3164_p4 = scmp.lt.s32.totalorder %s3158_s11, %s3158_s11 }
 0x8e2   :  { %v3037_v31 = vpop.eup %3036  ;;  %v2290_v13 = vmul.f32 %v2571_v57, %v2279_v24 }
 0x8e3   :  { %v2280_v32 = vmul.f32 %v3037_v31, %v2248_v42  ;;  %v2300_v4 = vadd.f32 %v2572_v56, %v2289_v43  ;;  %p3165_p5 = por %p3164_p4, %p3163_p3 }
 0x8e4   :  { %v2301_v46 = vadd.f32 %v2572_v56, %v2290_v13 }
 0x8e5   :  { %v2303_v47 = vpack.c.bf16 %v2300_v4, %v2299_v27  ;;  %v2291_v29 = vmul.f32 %v2571_v57, %v2280_v32  ;;  %p3166_p6 = pnand %p3165_p5, %p3159_p2 }
 0x8e7   :  { %2883 = vmatprep.mubr.msk.bf16.mxu0 %vm121_vm0, %v2303_v47  ;;  %v2302_v50 = vadd.f32 %v2572_v56, %v2291_v29 }
 0x8e9   :  { %v2304_v51 = vpack.c.bf16 %v2302_v50, %v2301_v46 }
 0x8eb   :  { %2884 = vmatmul.mubr.msk.bf16.vlgmr.msra.gmra.mxu0 %vm121_vm0, %v2304_v51 }
 0x9ab   :  { %v2885_v63 = vpop.f32.mrf.mxu0 }
 0x9ac   :  { %v2377_v61 = vadd.f32 %v2885_v63, %v2573_v39 }
 0x9ad   :  { %v2368_v15 = vpop.f32.mrf.mxu0 }
 0x9ae   :  { %v2369_v35 = vadd.f32 %v2573_v39, %v2368_v15  ;;  %v2385_v1 = vmax.f32 %v2377_v61, 0.0 }
 0x9af   :  { %v2886_v58 = vpop.f32.mrf.mxu0 }
 0x9b0   :  { %v2380_v53 = vadd.f32 %v2886_v58, %v2573_v39  ;;  %v2383_v0 = vmax.f32 %v2369_v35, 0.0 }
 0x9b1   :  { %v2371_v25 = vpop.f32.mrf.mxu0 }
 0x9b2   :  { %v2372_v22 = vadd.f32 %v2573_v39, %v2371_v25  ;;  %v2386_v10 = vmax.f32 %v2380_v53, 0.0 }
 0x9b4   :  { %v2384_v59 = vmax.f32 %v2372_v22, 0.0  ;;  %v2388_v54 = vpack.c.bf16 %v2386_v10, %v2385_v1 }
 0x9b6   :  { %v2387_v23 = vpack.c.bf16 %v2384_v59, %v2383_v0 }
 0x9b8   :  { %2895 = vmatprep.mubr.msk.bf16.mxu1 %vm2428_vm7, %v2387_v23 }
 0x9b9   :  { %2896 = vmatmul.mubr.msk.bf16.vlgmr.msra.gmra.mxu1 %vm2428_vm7, %v2388_v54 }
 0xa79   :  { %v2897_v40 = vpop.f32.mrf.mxu1 }
 0xa7a   :  { %v2478_v5 = vadd.f32 %v2897_v40, %v2578_v16 }
 0xa7b   :  { %v2469_v60 = vpop.f32.mrf.mxu1 }
 0xa7c   :  { %v2486_v30 = vadd.f32 %v2478_v5, %v2301_v46  ;;  %v2470_v21 = vadd.f32 %v2578_v16, %v2469_v60 }
 0xa7d   :  { %v2898_v42 = vpop.f32.mrf.mxu1 }
 0xa7e   :  { %2490 = vst.msk [vmem:[#allocation13 + $0x10] sm:$0xff] %vm121_vm0, %v2486_v30  ;;  %v2484_v33 = vadd.f32 %v2470_v21, %v2299_v27  ;;  %v2481_v14 = vadd.f32 %v2898_v42, %v2578_v16 }
 0xa7f   :  { %v2472_v20 = vpop.f32.mrf.mxu1 }
 0xa80   :  { %2488 = vst.msk [vmem:[#allocation13] sm:$0xff] %vm121_vm0, %v2484_v33  ;;  %v2487_v41 = vadd.f32 %v2481_v14, %v2302_v50  ;;  %v2473_v7 = vadd.f32 %v2578_v16, %v2472_v20 }
 0xa82   :  { %2491 = vst.msk [vmem:[#allocation13 + $0x18] sm:$0xff] %vm121_vm0, %v2487_v41  ;;  %v2485_v2 = vadd.f32 %v2473_v7, %v2300_v4 }
 0xa84   :  { %2489 = vst.msk [vmem:[#allocation13 + $0x8] sm:$0xff] %vm121_vm0, %v2485_v2 }
 0xa85   :  { %3169 = shalt.err (!%p3166_p6)
}
 0xa86   :  { %s3206_s9 = smov 128  }
 0xa87   :  { %2503 = dma.vmem_to_hbm [thread:$0]  %s2498_s21, 512, %s3952_s12, [#allocation4], %s3206_s9, %s3206_s9, %s3202_s5  }
 0xa88   :  { %3186 = dma.done.wait [#allocation4], 512  }
 0xa89   :  { %3187 = vsyncadd [#allocation4], 4294966784 }
 0xa8a   :  { %2507 = vsyncpa [#allocation3], 1 }
 0xa8b   :  { %2508 = vsyncpa [#allocation6], 1 }
 0xa8c   :  { %2509 = vsyncpa [#allocation9], 1 }
 0xa8d   :  { %2510 = vsyncpa [#allocation12], 1 }
 0xa8e   :  { %2511 = vsyncpa [#allocation4], 1 }

</bundles_post_ra>
